<compile_context>
chip_gen: v6e
topology: v6e:2x2x1
jax: 0.10.0
libtpu: 0.0.40
codegen_flags: <defaults>
</compile_context>

<pallas_src>
import jax
import jax.numpy as jnp
from jax.experimental import pallas as pl
from jax.experimental.pallas import tpu as pltpu

N = 16          # nodes per graph
F_IN = 32       # in_dim
D = 32          # out_dim (== in_dim, required by the module's .view/.fc combo)
H = 4           # num_heads (chosen so H*D == 128 -> lane-aligned)
G = 8           # graphs per grid step (G*N = 128 MXU rows; use 16 on v6e/v7x)
HD = H * D      # 128
HN = H * N      # 64   lane-packed (head, source) axis
GN = G * N      # 128  row-packed (graph, node) axis
GD = G * D      # 256  lane-packed (graph, feature) output axis
PACK_W = 256    # lane width of the packed parameter / constant blocks
NEG = -1e9      # masked-edge logit


def _round8(x):
    return (x + 7) // 8 * 8


def _layout(entries):
    """Row layout for a packed block: every sub-block starts at a multiple of 8."""
    off, r = {}, 0
    for name, rows, cols in entries:
        off[name] = (r, rows, cols)
        r += _round8(rows)
    return off, _round8(r)


# Packed parameter block (bf16, PACK_W lanes wide):
#   w1: [ Wg^T | Wg^T@[AL|AR] | 0 ]  (z and per-head el/er from ONE matmul; scores
#        start at lane 128 -> their own aligned lane tile)
#   gb: GATConv bias row
#   w2: [ Wfc^T | Wfc^T@a_src^T | 0 ]  (z2 and the source attention score)
#   fb: fc bias row (same column layout as w2)
_P_ENTRIES = [("w1", F_IN, PACK_W), ("gb", 1, HD), ("w2", HD, 64), ("fb", 1, 64)]
_P_OFF, _P_ROWS = _layout(_P_ENTRIES)

# Packed constants block (f32, PACK_W lanes wide) - resident 0/1 structure matrices.
_C_ENTRIES = [("seg_t", H, HN), ("seg", HN, H), ("seln", GN, HN), ("oneb", GN, GN),
              ("tilen", N, GN), ("tiled", D, GD), ("gdm", GN, GD), ("gcolm", GN, G),
              ("segg", G, GD)]
_C_OFF, _C_ROWS = _layout(_C_ENTRIES)


def _take(ref, off, name):
    r, rows, cols = off[name]
    return ref[r:r + rows, 0:cols]


def _place(buf, off, name, val):
    r, rows, cols = off[name]
    return buf.at[r:r + rows, 0:cols].set(val.astype(buf.dtype))


def gat_layer_kernel(h_ref, adjh_ref, adjs_ref, wp_ref, cm_ref, out_ref):
    f32, bf16 = jnp.float32, jnp.bfloat16
    hb = h_ref[...]                     # (GN, F_IN) bf16   rows = (graph, node)
    adjh = adjh_ref[...]                # (GN, HN)   bf16   [ (g,v), h*N+u ] = edge u->v in g
    adjs = adjs_ref[...].astype(f32)    # (N, GN)           [ v, g*N+u ]     = edge u->v in g

    w1 = _take(wp_ref, _P_OFF, "w1")    # (F_IN, 256) bf16
    gb = _take(wp_ref, _P_OFF, "gb")    # (1, HD)     bf16
    w2 = _take(wp_ref, _P_OFF, "w2")    # (HD, 64)    bf16
    fb = _take(wp_ref, _P_OFF, "fb")    # (1, 64)     bf16

    seg_t = _take(cm_ref, _C_OFF, "seg_t")   # (H, HN)   head -> packed columns
    seg = _take(cm_ref, _C_OFF, "seg")       # (HN, H)   packed columns -> head (sum)
    seln = _take(cm_ref, _C_OFF, "seln")     # (GN, HN)  [ (g,u'), h*N+u ] = (u'==u)
    oneb = _take(cm_ref, _C_OFF, "oneb")     # (GN, GN)  same-graph block of ones
    tilen = _take(cm_ref, _C_OFF, "tilen")   # (N, GN)   [ u', g*N+u ] = (u'==u)
    tiled = _take(cm_ref, _C_OFF, "tiled")   # (D, GD)   [ d', g*D+d ] = (d'==d)
    gdm = _take(cm_ref, _C_OFF, "gdm")       # (GN, GD)  same-graph block mask
    gcolm = _take(cm_ref, _C_OFF, "gcolm")   # (GN, G)   graph one-hot per row
    segg = _take(cm_ref, _C_OFF, "segg")     # (G, GD)   graph -> its D output lanes

    # ---------------- stage 1: dglnn.GATConv on G graphs at once ----------------
    zs = jnp.dot(hb, w1, preferred_element_type=f32)    # (GN, 256): z | el | er
    z = zs[:, 0:HD]                                     # (GN, HD)
    el = zs[:, HD:HD + H]                               # (GN, H) source scores
    er = zs[:, HD + H:HD + 2 * H]                       # (GN, H) destination scores

    # Lane-packed logits e_p[(g,v), h*N+u] = er[(g,v),h] + el[(g,u),h] (MXU expansions).
    er_exp = jnp.dot(er, seg_t, preferred_element_type=f32)            # (GN, HN)
    el_diag = jnp.dot(el, seg_t, preferred_element_type=f32) * seln    # (GN, HN)
    el_bcast = jnp.dot(oneb, el_diag, preferred_element_type=f32)      # (GN, HN)
    e_p = er_exp + el_bcast
    e_p = jnp.where(e_p >= 0.0, e_p, 0.2 * e_p)                        # LeakyReLU(0.2)
    e_p = jnp.where(adjh > 0.0, e_p, NEG)
    # One max per destination row (shared across heads - a per-row constant, so each
    # head's softmax is unchanged); masked entries give exp(NEG) == 0.
    m = jnp.max(e_p, axis=-1, keepdims=True)                           # (GN, 1)
    p = jnp.exp(e_p - m)                                               # (GN, HN)
    s = jnp.dot(p, seg, preferred_element_type=f32)                    # (GN, H) denominators
    inv = pl.reciprocal(s, approx=True)                                # EUP
    alpha = p * jnp.dot(inv, seg_t, preferred_element_type=f32)        # (GN, HN)

    # Per-head aggregation: expand alpha_h to a block-diagonal (GN, GN) on the MXU,
    # mask the cross-graph copies, then one (GN,GN)x(GN,D) matmul per head.
    parts = []
    for hh in range(H):
        a_h = alpha[:, hh * N:(hh + 1) * N]                                    # (GN, N)
        a_bd = jnp.dot(a_h, tilen, preferred_element_type=f32) * oneb          # (GN, GN)
        parts.append(jnp.dot(a_bd, z[:, hh * D:(hh + 1) * D],
                             preferred_element_type=f32))                      # (GN, D)
    gat_out = jnp.concatenate(parts, axis=-1) + gb.astype(f32)                 # (GN, HD)

    # -------- stage 2: fc + custom edge attention + aggregation (lane-dense) --------
    z2s = jnp.dot(gat_out.astype(bf16), w2, preferred_element_type=f32) \
        + fb.astype(f32)                                               # (GN, 64): z2 | es
    z2 = z2s[:, 0:D]                                                   # (GN, D)
    es = z2s[:, D:D + 1]                                               # (GN, 1) source score
    # Destination score is a per-row constant -> drops out of the softmax.
    w_src = jnp.exp(es - jnp.max(es, keepdims=True))                   # (GN, 1)
    # Block-diagonal weighted features, then one matmul against the (dest x source)
    # adjacency yields the numerators directly in the lane-dense (N, G*D) layout.
    wz = jnp.dot(z2 * w_src, tiled, preferred_element_type=f32) * gdm  # (GN, GD)
    num = jnp.dot(adjs, wz, preferred_element_type=f32)                # (N, GD)
    den = jnp.dot(adjs, w_src * gcolm, preferred_element_type=f32)     # (N, G)
    inv2 = pl.reciprocal(den, approx=True)                             # EUP
    out_ref[...] = num * jnp.dot(inv2, segg, preferred_element_type=f32)   # (N, GD)


def pack_params(params):
    """One-time fold of the GATLayer parameter tensors into one tile-aligned bf16 block."""
    f32 = jnp.float32
    wg_t, attn_l, attn_r = params["wg_t"], params["attn_l"], params["attn_r"]
    gbias, wfc_t, bfc, asrc = params["gbias"], params["wfc_t"], params["bfc"], params["asrc"]

    eye_h = jnp.eye(H, dtype=f32)
    # Block-diagonal (HD, H): AL[h*D+d, h] = attn_l[h, d]  (same for AR).
    al = (attn_l[:, :, None] * eye_h[:, None, :]).reshape(HD, H)
    ar = (attn_r[:, :, None] * eye_h[:, None, :]).reshape(HD, H)
    alr = jnp.concatenate([al, ar], axis=1)                            # (HD, 2H)

    w1 = jnp.zeros((F_IN, PACK_W), f32)
    w1 = w1.at[:, 0:HD].set(wg_t)
    w1 = w1.at[:, HD:HD + 2 * H].set(wg_t @ alr)                       # scores at lane 128

    w2 = jnp.zeros((HD, 64), f32)
    w2 = w2.at[:, 0:D].set(wfc_t)
    w2 = w2.at[:, D:D + 1].set(wfc_t @ asrc.T)                         # source attention score
    fb = jnp.zeros((1, 64), f32)
    fb = fb.at[:, 0:D].set(bfc)
    fb = fb.at[:, D:D + 1].set(bfc @ asrc.T)

    wp = jnp.zeros((_P_ROWS, PACK_W), jnp.bfloat16)
    wp = _place(wp, _P_OFF, "w1", w1)
    wp = _place(wp, _P_OFF, "gb", gbias)
    wp = _place(wp, _P_OFF, "w2", w2)
    wp = _place(wp, _P_OFF, "fb", fb)
    return wp


def build_constants():
    """Resident 0/1 structure matrices (replaces per-step iota rebuilds)."""
    f32 = jnp.float32
    col_head = jnp.arange(HN) // N
    col_src = jnp.arange(HN) % N
    row_g = jnp.arange(GN) // N
    row_u = jnp.arange(GN) % N
    col_gd_g = jnp.arange(GD) // D
    col_gd_d = jnp.arange(GD) % D

    mats = {
        "seg_t": (jnp.arange(H)[:, None] == col_head[None, :]),
        "seg":   (col_head[:, None] == jnp.arange(H)[None, :]),
        "seln":  (row_u[:, None] == col_src[None, :]),
        "oneb":  (row_g[:, None] == row_g[None, :]),
        "tilen": (jnp.arange(N)[:, None] == row_u[None, :]),
        "tiled": (jnp.arange(D)[:, None] == col_gd_d[None, :]),
        "gdm":   (row_g[:, None] == col_gd_g[None, :]),
        "gcolm": (row_g[:, None] == jnp.arange(G)[None, :]),
        "segg":  (jnp.arange(G)[:, None] == col_gd_g[None, :]),
    }
    cm = jnp.zeros((_C_ROWS, PACK_W), f32)
    for name, val in mats.items():
        cm = _place(cm, _C_OFF, name, val.astype(f32))
    return cm


def pack_adjacency(adj_b):
    """adj_b: (B, N, N), [b, u, v] = 1 iff edge u -> v.  One-time setup (static graph)."""
    B = adj_b.shape[0]
    assert B % G == 0
    S = B // G
    adj_in = jnp.transpose(adj_b, (0, 2, 1))                            # [b, v, u]
    adjh = jnp.tile(adj_in, (1, 1, H)).reshape(S, GN, HN)               # rows (g,v), cols (h,u)
    adjs = jnp.transpose(adj_in.reshape(S, G, N, N), (0, 2, 1, 3)).reshape(S, N, GN)
    return adjh.astype(jnp.bfloat16), adjs.astype(jnp.bfloat16)


def gat_layer_batched(h_b, adjh_b, adjs_b, wp, cm):
    """h_b: (B, N, F_IN) f32.  adjh_b/adjs_b/wp/cm: packed (see pack_* helpers)."""
    B = h_b.shape[0]
    assert B % G == 0
    S = B // G
    h_p = h_b.reshape(S, GN, F_IN).astype(jnp.bfloat16)
    out_p = pl.pallas_call(
        gat_layer_kernel,
        out_shape=jax.ShapeDtypeStruct((S, N, GD), jnp.float32),
        grid=(S,),
        in_specs=[
            pl.BlockSpec((None, GN, F_IN), lambda s: (s, 0, 0)),
            pl.BlockSpec((None, GN, HN), lambda s: (s, 0, 0)),
            pl.BlockSpec((None, N, GN), lambda s: (s, 0, 0)),
            pl.BlockSpec((_P_ROWS, PACK_W), lambda s: (0, 0)),   # resident across the grid
            pl.BlockSpec((_C_ROWS, PACK_W), lambda s: (0, 0)),   # resident across the grid
        ],
        out_specs=pl.BlockSpec((None, N, GD), lambda s: (s, 0, 0)),
        compiler_params=pltpu.CompilerParams(
            dimension_semantics=("parallel",)),  # v7x: grid steps split across both TCs
    )(h_p, adjh_b, adjs_b, wp, cm)
    # (S, N, G*D) -> (B, N, D)   (layout plumbing in the wrapper, not the kernel)
    return jnp.transpose(out_p.reshape(S, N, G, D), (0, 2, 1, 3)).reshape(B, N, D)


def gat_layer_reference(h, adj_src_dst, p):
    """Pure-JAX f32 reference with identical semantics (original unpacked params)."""
    mask = adj_src_dst > 0.0                                # [u, v]
    z = h @ p["wg_t"]                                       # (N, H*D)
    zr = z.reshape(N, H, D)
    el = jnp.sum(zr * p["attn_l"][None], axis=-1)           # (N, H) src
    er = jnp.sum(zr * p["attn_r"][None], axis=-1)           # (N, H) dst
    e = el[:, None, :] + er[None, :, :]                     # (u, v, H)
    e = jnp.where(e >= 0.0, e, 0.2 * e)
    e = jnp.where(mask[..., None], e, -jnp.inf)
    alpha = jax.nn.softmax(e, axis=0)                       # over sources u
    gat = jnp.einsum("uvh,uhd->vhd", alpha, zr) + p["gbias"].reshape(1, H, D)
    gat = gat.reshape(N, H * D)
    z2 = gat @ p["wfc_t"] + p["bfc"]                        # (N, D)
    es = jnp.sum(z2 * p["asrc"], axis=-1)                   # (N,)
    ed = jnp.sum(z2 * p["adst"], axis=-1)
    e2 = es[:, None] + ed[None, :]                          # (u, v)
    e2 = jnp.where(mask, e2, -jnp.inf)
    a2 = jax.nn.softmax(e2, axis=0)                         # over sources u
    return a2.T @ z2                                        # (v, D)


if __name__ == "__main__":
    key = jax.random.PRNGKey(0)
    ks = jax.random.split(key, 9)

    params = {
        "wg_t":   jax.random.normal(ks[0], (F_IN, HD), jnp.float32) * 0.1,
        "attn_l": jax.random.normal(ks[1], (H, D), jnp.float32) * 0.1,
        "attn_r": jax.random.normal(ks[2], (H, D), jnp.float32) * 0.1,
        "gbias":  jax.random.normal(ks[3], (1, HD), jnp.float32) * 0.1,
        "wfc_t":  jax.random.normal(ks[4], (HD, D), jnp.float32) * 0.1,
        "bfc":    jax.random.normal(ks[5], (1, D), jnp.float32) * 0.1,
        "asrc":   jax.random.normal(ks[6], (1, D), jnp.float32) * 0.1,
        "adst":   jax.random.normal(ks[7], (1, D), jnp.float32) * 0.1,
    }

    # B = 2*G graphs -> grid of 2 steps (keeps both v7x TensorCores busy, G*N = 128
    # MXU rows per step).  Deterministic adjacencies with self-loops (dgl.add_self_loop).
    B = 2 * G
    u = jnp.arange(N)[:, None]
    v = jnp.arange(N)[None, :]
    adj_list = []
    for b in range(B):
        a = ((u + (b + 2) * v) % (3 + (b % 5)) == 0) | (u == v)
        adj_list.append(a.astype(jnp.float32))
    adj_b = jnp.stack(adj_list, axis=0)                     # (B, N, N), [b, u, v]

    h_b = jax.random.normal(ks[8], (B, N, F_IN), jnp.float32)

    # One-time setup: the graph and the weights are static in the module.
    wp = pack_params(params)
    cm = build_constants()
    adjh_b, adjs_b = pack_adjacency(adj_b)

    run = jax.jit(gat_layer_batched)
    out = jax.block_until_ready(run(h_b, adjh_b, adjs_b, wp, cm))

    ref = jax.vmap(lambda hh, aa: gat_layer_reference(hh, aa, params))(h_b, adj_b)
    assert out.shape == (B, N, D)
    err = float(jnp.max(jnp.abs(out - ref)))
    # Tolerance covers the bf16 matmul operands (h / adjacency / weight blocks, per the
    # perf review) and the approximate EUP reciprocals in the softmax normalizations.
    assert bool(jnp.allclose(out, ref, rtol=3e-2, atol=3e-2)), err
    print("KERNEL_OK")
</pallas_src>

<mosaic_0001>
module attributes {stable_mosaic.version = 11 : i64} {
  func.func @gat_layer_kernel(%arg0: i32, %arg1: memref<1x128x32xbf16, #tpu.memory_space<vmem>>, %arg2: memref<1x128x64xbf16, #tpu.memory_space<vmem>>, %arg3: memref<1x16x128xbf16, #tpu.memory_space<vmem>>, %arg4: memref<176x256xbf16, #tpu.memory_space<vmem>>, %arg5: memref<640x256xf32, #tpu.memory_space<vmem>>, %arg6: memref<1x16x256xf32, #tpu.memory_space<vmem>>) attributes {dimension_semantics = [#tpu.dimension_semantics<parallel>], iteration_bounds = array<i64: 2>, scalar_prefetch = 0 : i64, scratch_operands = 0 : i64, tpu.core_type = #tpu.core_type<tc>, window_params = [{transform_indices = @transform_0, window_bounds = array<i64: 1, 128, 32>}, {transform_indices = @transform_1, window_bounds = array<i64: 1, 128, 64>}, {transform_indices = @transform_2, window_bounds = array<i64: 1, 16, 128>}, {pipeline_mode = #tpu.pipeline_mode<synchronous>, transform_indices = @transform_3, window_bounds = array<i64: 176, 256>}, {pipeline_mode = #tpu.pipeline_mode<synchronous>, transform_indices = @transform_4, window_bounds = array<i64: 640, 256>}, {transform_indices = @transform_5, window_bounds = array<i64: 1, 16, 256>}]} {
    %c0 = arith.constant 0 : index
    %c0_0 = arith.constant 0 : index
    %c0_1 = arith.constant 0 : index
    %0 = vector.load %arg1[%c0, %c0_0, %c0_1] : memref<1x128x32xbf16, #tpu.memory_space<vmem>>, vector<1x128x32xbf16>
    %1 = vector.shape_cast %0 : vector<1x128x32xbf16> to vector<128x32xbf16>
    %c0_2 = arith.constant 0 : index
    %c0_3 = arith.constant 0 : index
    %c0_4 = arith.constant 0 : index
    %2 = vector.load %arg2[%c0_2, %c0_3, %c0_4] : memref<1x128x64xbf16, #tpu.memory_space<vmem>>, vector<1x128x64xbf16>
    %3 = vector.shape_cast %2 : vector<1x128x64xbf16> to vector<128x64xbf16>
    %c0_5 = arith.constant 0 : index
    %c0_6 = arith.constant 0 : index
    %c0_7 = arith.constant 0 : index
    %4 = vector.load %arg3[%c0_5, %c0_6, %c0_7] : memref<1x16x128xbf16, #tpu.memory_space<vmem>>, vector<1x16x128xbf16>
    %5 = vector.shape_cast %4 : vector<1x16x128xbf16> to vector<16x128xbf16>
    %6 = arith.extf %5 : vector<16x128xbf16> to vector<16x128xf32>
    %c0_8 = arith.constant 0 : index
    %c0_9 = arith.constant 0 : index
    %7 = vector.load %arg4[%c0_8, %c0_9] : memref<176x256xbf16, #tpu.memory_space<vmem>>, vector<32x256xbf16>
    %c32 = arith.constant 32 : index
    %c0_10 = arith.constant 0 : index
    %8 = vector.load %arg4[%c32, %c0_10] : memref<176x256xbf16, #tpu.memory_space<vmem>>, vector<1x128xbf16>
    %c40 = arith.constant 40 : index
    %c0_11 = arith.constant 0 : index
    %9 = vector.load %arg4[%c40, %c0_11] : memref<176x256xbf16, #tpu.memory_space<vmem>>, vector<128x64xbf16>
    %c168 = arith.constant 168 : index
    %c0_12 = arith.constant 0 : index
    %10 = vector.load %arg4[%c168, %c0_12] : memref<176x256xbf16, #tpu.memory_space<vmem>>, vector<1x64xbf16>
    %c0_13 = arith.constant 0 : index
    %c0_14 = arith.constant 0 : index
    %11 = vector.load %arg5[%c0_13, %c0_14] : memref<640x256xf32, #tpu.memory_space<vmem>>, vector<4x64xf32>
    %c8 = arith.constant 8 : index
    %c0_15 = arith.constant 0 : index
    %12 = vector.load %arg5[%c8, %c0_15] : memref<640x256xf32, #tpu.memory_space<vmem>>, vector<64x4xf32>
    %c72 = arith.constant 72 : index
    %c0_16 = arith.constant 0 : index
    %13 = vector.load %arg5[%c72, %c0_16] : memref<640x256xf32, #tpu.memory_space<vmem>>, vector<128x64xf32>
    %c200 = arith.constant 200 : index
    %c0_17 = arith.constant 0 : index
    %14 = vector.load %arg5[%c200, %c0_17] : memref<640x256xf32, #tpu.memory_space<vmem>>, vector<128x128xf32>
    %c328 = arith.constant 328 : index
    %c0_18 = arith.constant 0 : index
    %15 = vector.load %arg5[%c328, %c0_18] : memref<640x256xf32, #tpu.memory_space<vmem>>, vector<16x128xf32>
    %c344 = arith.constant 344 : index
    %c0_19 = arith.constant 0 : index
    %16 = vector.load %arg5[%c344, %c0_19] : memref<640x256xf32, #tpu.memory_space<vmem>>, vector<32x256xf32>
    %c376 = arith.constant 376 : index
    %c0_20 = arith.constant 0 : index
    %17 = vector.load %arg5[%c376, %c0_20] : memref<640x256xf32, #tpu.memory_space<vmem>>, vector<128x256xf32>
    %c504 = arith.constant 504 : index
    %c0_21 = arith.constant 0 : index
    %18 = vector.load %arg5[%c504, %c0_21] : memref<640x256xf32, #tpu.memory_space<vmem>>, vector<128x8xf32>
    %c632 = arith.constant 632 : index
    %c0_22 = arith.constant 0 : index
    %19 = vector.load %arg5[%c632, %c0_22] : memref<640x256xf32, #tpu.memory_space<vmem>>, vector<8x256xf32>
    %cst = arith.constant dense<0.000000e+00> : vector<128x256xf32>
    %20 = tpu.matmul %1, %7, %cst {dimension_numbers = #tpu.dot_dimension_numbers<[1], [0], [0], [1], [0, 0, 1, 1], [], []>} : vector<128x32xbf16>, vector<32x256xbf16>, vector<128x256xf32> -> vector<128x256xf32>
    %21 = vector.extract_strided_slice %20 {offsets = [0, 0], sizes = [128, 128], strides = [1, 1]} : vector<128x256xf32> to vector<128x128xf32>
    %22 = vector.extract_strided_slice %20 {offsets = [0, 128], sizes = [128, 4], strides = [1, 1]} : vector<128x256xf32> to vector<128x4xf32>
    %23 = vector.extract_strided_slice %20 {offsets = [0, 132], sizes = [128, 4], strides = [1, 1]} : vector<128x256xf32> to vector<128x4xf32>
    %cst_23 = arith.constant dense<0.000000e+00> : vector<128x64xf32>
    %24 = tpu.matmul %23, %11, %cst_23 {dimension_numbers = #tpu.dot_dimension_numbers<[1], [0], [0], [1], [0, 0, 1, 1], [], []>} : vector<128x4xf32>, vector<4x64xf32>, vector<128x64xf32> -> vector<128x64xf32>
    %cst_24 = arith.constant dense<0.000000e+00> : vector<128x64xf32>
    %25 = tpu.matmul %22, %11, %cst_24 {dimension_numbers = #tpu.dot_dimension_numbers<[1], [0], [0], [1], [0, 0, 1, 1], [], []>} : vector<128x4xf32>, vector<4x64xf32>, vector<128x64xf32> -> vector<128x64xf32>
    %26 = arith.mulf %25, %13 : vector<128x64xf32>
    %cst_25 = arith.constant dense<0.000000e+00> : vector<128x64xf32>
    %27 = tpu.matmul %14, %26, %cst_25 {dimension_numbers = #tpu.dot_dimension_numbers<[1], [0], [0], [1], [0, 0, 1, 1], [], []>} : vector<128x128xf32>, vector<128x64xf32>, vector<128x64xf32> -> vector<128x64xf32>
    %28 = arith.addf %24, %27 : vector<128x64xf32>
    %cst_26 = arith.constant 0.000000e+00 : f32
    %29 = vector.broadcast %cst_26 : f32 to vector<128x64xf32>
    %30 = arith.cmpf oge, %28, %29 : vector<128x64xf32>
    %cst_27 = arith.constant 2.000000e-01 : f32
    %31 = vector.broadcast %cst_27 : f32 to vector<128x64xf32>
    %32 = arith.mulf %31, %28 : vector<128x64xf32>
    %33 = arith.select %30, %28, %32 : vector<128x64xi1>, vector<128x64xf32>
    %cst_28 = arith.constant 0.000000e+00 : bf16
    %34 = vector.broadcast %cst_28 : bf16 to vector<128x64xbf16>
    %35 = arith.cmpf ogt, %3, %34 : vector<128x64xbf16>
    %cst_29 = arith.constant -1.000000e+09 : f32
    %36 = vector.broadcast %cst_29 : f32 to vector<128x64xf32>
    %37 = arith.select %35, %33, %36 : vector<128x64xi1>, vector<128x64xf32>
    %cst_30 = arith.constant dense<0xFF800000> : vector<128xf32>
    %38 = vector.multi_reduction <maximumf>, %37, %cst_30 [1] : vector<128x64xf32> to vector<128xf32>
    %39 = vector.shape_cast %38 : vector<128xf32> to vector<128x1xf32>
    %40 = vector.broadcast %39 : vector<128x1xf32> to vector<128x64xf32>
    %41 = arith.subf %37, %40 : vector<128x64xf32>
    %42 = math.exp %41 : vector<128x64xf32>
    %cst_31 = arith.constant dense<0.000000e+00> : vector<128x4xf32>
    %43 = tpu.matmul %42, %12, %cst_31 {dimension_numbers = #tpu.dot_dimension_numbers<[1], [0], [0], [1], [0, 0, 1, 1], [], []>} : vector<128x64xf32>, vector<64x4xf32>, vector<128x4xf32> -> vector<128x4xf32>
    %44 = tpu.reciprocal %43 {approx = true} : vector<128x4xf32> -> vector<128x4xf32>
    %cst_32 = arith.constant dense<0.000000e+00> : vector<128x64xf32>
    %45 = tpu.matmul %44, %11, %cst_32 {dimension_numbers = #tpu.dot_dimension_numbers<[1], [0], [0], [1], [0, 0, 1, 1], [], []>} : vector<128x4xf32>, vector<4x64xf32>, vector<128x64xf32> -> vector<128x64xf32>
    %46 = arith.mulf %42, %45 : vector<128x64xf32>
    %47 = vector.extract_strided_slice %46 {offsets = [0, 0], sizes = [128, 16], strides = [1, 1]} : vector<128x64xf32> to vector<128x16xf32>
    %cst_33 = arith.constant dense<0.000000e+00> : vector<128x128xf32>
    %48 = tpu.matmul %47, %15, %cst_33 {dimension_numbers = #tpu.dot_dimension_numbers<[1], [0], [0], [1], [0, 0, 1, 1], [], []>} : vector<128x16xf32>, vector<16x128xf32>, vector<128x128xf32> -> vector<128x128xf32>
    %49 = arith.mulf %48, %14 : vector<128x128xf32>
    %50 = vector.extract_strided_slice %21 {offsets = [0, 0], sizes = [128, 32], strides = [1, 1]} : vector<128x128xf32> to vector<128x32xf32>
    %cst_34 = arith.constant dense<0.000000e+00> : vector<128x32xf32>
    %51 = tpu.matmul %49, %50, %cst_34 {dimension_numbers = #tpu.dot_dimension_numbers<[1], [0], [0], [1], [0, 0, 1, 1], [], []>} : vector<128x128xf32>, vector<128x32xf32>, vector<128x32xf32> -> vector<128x32xf32>
    %52 = vector.extract_strided_slice %46 {offsets = [0, 16], sizes = [128, 16], strides = [1, 1]} : vector<128x64xf32> to vector<128x16xf32>
    %cst_35 = arith.constant dense<0.000000e+00> : vector<128x128xf32>
    %53 = tpu.matmul %52, %15, %cst_35 {dimension_numbers = #tpu.dot_dimension_numbers<[1], [0], [0], [1], [0, 0, 1, 1], [], []>} : vector<128x16xf32>, vector<16x128xf32>, vector<128x128xf32> -> vector<128x128xf32>
    %54 = arith.mulf %53, %14 : vector<128x128xf32>
    %55 = vector.extract_strided_slice %21 {offsets = [0, 32], sizes = [128, 32], strides = [1, 1]} : vector<128x128xf32> to vector<128x32xf32>
    %cst_36 = arith.constant dense<0.000000e+00> : vector<128x32xf32>
    %56 = tpu.matmul %54, %55, %cst_36 {dimension_numbers = #tpu.dot_dimension_numbers<[1], [0], [0], [1], [0, 0, 1, 1], [], []>} : vector<128x128xf32>, vector<128x32xf32>, vector<128x32xf32> -> vector<128x32xf32>
    %57 = vector.extract_strided_slice %46 {offsets = [0, 32], sizes = [128, 16], strides = [1, 1]} : vector<128x64xf32> to vector<128x16xf32>
    %cst_37 = arith.constant dense<0.000000e+00> : vector<128x128xf32>
    %58 = tpu.matmul %57, %15, %cst_37 {dimension_numbers = #tpu.dot_dimension_numbers<[1], [0], [0], [1], [0, 0, 1, 1], [], []>} : vector<128x16xf32>, vector<16x128xf32>, vector<128x128xf32> -> vector<128x128xf32>
    %59 = arith.mulf %58, %14 : vector<128x128xf32>
    %60 = vector.extract_strided_slice %21 {offsets = [0, 64], sizes = [128, 32], strides = [1, 1]} : vector<128x128xf32> to vector<128x32xf32>
    %cst_38 = arith.constant dense<0.000000e+00> : vector<128x32xf32>
    %61 = tpu.matmul %59, %60, %cst_38 {dimension_numbers = #tpu.dot_dimension_numbers<[1], [0], [0], [1], [0, 0, 1, 1], [], []>} : vector<128x128xf32>, vector<128x32xf32>, vector<128x32xf32> -> vector<128x32xf32>
    %62 = vector.extract_strided_slice %46 {offsets = [0, 48], sizes = [128, 16], strides = [1, 1]} : vector<128x64xf32> to vector<128x16xf32>
    %cst_39 = arith.constant dense<0.000000e+00> : vector<128x128xf32>
    %63 = tpu.matmul %62, %15, %cst_39 {dimension_numbers = #tpu.dot_dimension_numbers<[1], [0], [0], [1], [0, 0, 1, 1], [], []>} : vector<128x16xf32>, vector<16x128xf32>, vector<128x128xf32> -> vector<128x128xf32>
    %64 = arith.mulf %63, %14 : vector<128x128xf32>
    %65 = vector.extract_strided_slice %21 {offsets = [0, 96], sizes = [128, 32], strides = [1, 1]} : vector<128x128xf32> to vector<128x32xf32>
    %cst_40 = arith.constant dense<0.000000e+00> : vector<128x32xf32>
    %66 = tpu.matmul %64, %65, %cst_40 {dimension_numbers = #tpu.dot_dimension_numbers<[1], [0], [0], [1], [0, 0, 1, 1], [], []>} : vector<128x128xf32>, vector<128x32xf32>, vector<128x32xf32> -> vector<128x32xf32>
    %67 = tpu.concatenate %51, %56, %61, %66 in 1 : vector<128x32xf32>, vector<128x32xf32>, vector<128x32xf32>, vector<128x32xf32> -> vector<128x128xf32>
    %68 = arith.extf %8 : vector<1x128xbf16> to vector<1x128xf32>
    %69 = vector.broadcast %68 : vector<1x128xf32> to vector<128x128xf32>
    %70 = arith.addf %67, %69 : vector<128x128xf32>
    %71 = arith.truncf %70 : vector<128x128xf32> to vector<128x128xbf16>
    %cst_41 = arith.constant dense<0.000000e+00> : vector<128x64xf32>
    %72 = tpu.matmul %71, %9, %cst_41 {dimension_numbers = #tpu.dot_dimension_numbers<[1], [0], [0], [1], [0, 0, 1, 1], [], []>} : vector<128x128xbf16>, vector<128x64xbf16>, vector<128x64xf32> -> vector<128x64xf32>
    %73 = arith.extf %10 : vector<1x64xbf16> to vector<1x64xf32>
    %74 = vector.broadcast %73 : vector<1x64xf32> to vector<128x64xf32>
    %75 = arith.addf %72, %74 : vector<128x64xf32>
    %76 = vector.extract_strided_slice %75 {offsets = [0, 0], sizes = [128, 32], strides = [1, 1]} : vector<128x64xf32> to vector<128x32xf32>
    %77 = vector.extract_strided_slice %75 {offsets = [0, 32], sizes = [128, 1], strides = [1, 1]} : vector<128x64xf32> to vector<128x1xf32>
    %78 = vector.shape_cast %77 : vector<128x1xf32> to vector<1x128x1xf32>
    %cst_42 = arith.constant dense<0xFF800000> : vector<1xf32>
    %79 = vector.multi_reduction <maximumf>, %78, %cst_42 [1, 2] : vector<1x128x1xf32> to vector<1xf32>
    %80 = vector.shape_cast %79 : vector<1xf32> to vector<1x1x1xf32>
    %81 = vector.extract %80[0, 0, 0] : f32 from vector<1x1x1xf32>
    %82 = vector.broadcast %81 : f32 to vector<1x1xf32>
    %83 = vector.broadcast %82 : vector<1x1xf32> to vector<128x1xf32>
    %84 = arith.subf %77, %83 : vector<128x1xf32>
    %85 = math.exp %84 : vector<128x1xf32>
    %86 = vector.broadcast %85 : vector<128x1xf32> to vector<128x32xf32>
    %87 = arith.mulf %76, %86 : vector<128x32xf32>
    %cst_43 = arith.constant dense<0.000000e+00> : vector<128x256xf32>
    %88 = tpu.matmul %87, %16, %cst_43 {dimension_numbers = #tpu.dot_dimension_numbers<[1], [0], [0], [1], [0, 0, 1, 1], [], []>} : vector<128x32xf32>, vector<32x256xf32>, vector<128x256xf32> -> vector<128x256xf32>
    %89 = arith.mulf %88, %17 : vector<128x256xf32>
    %cst_44 = arith.constant dense<0.000000e+00> : vector<16x256xf32>
    %90 = tpu.matmul %6, %89, %cst_44 {dimension_numbers = #tpu.dot_dimension_numbers<[1], [0], [0], [1], [0, 0, 1, 1], [], []>} : vector<16x128xf32>, vector<128x256xf32>, vector<16x256xf32> -> vector<16x256xf32>
    %91 = vector.broadcast %85 : vector<128x1xf32> to vector<128x8xf32>
    %92 = arith.mulf %91, %18 : vector<128x8xf32>
    %cst_45 = arith.constant dense<0.000000e+00> : vector<16x8xf32>
    %93 = tpu.matmul %6, %92, %cst_45 {dimension_numbers = #tpu.dot_dimension_numbers<[1], [0], [0], [1], [0, 0, 1, 1], [], []>} : vector<16x128xf32>, vector<128x8xf32>, vector<16x8xf32> -> vector<16x8xf32>
    %94 = tpu.reciprocal %93 {approx = true} : vector<16x8xf32> -> vector<16x8xf32>
    %cst_46 = arith.constant dense<0.000000e+00> : vector<16x256xf32>
    %95 = tpu.matmul %94, %19, %cst_46 {dimension_numbers = #tpu.dot_dimension_numbers<[1], [0], [0], [1], [0, 0, 1, 1], [], []>} : vector<16x8xf32>, vector<8x256xf32>, vector<16x256xf32> -> vector<16x256xf32>
    %96 = arith.mulf %90, %95 : vector<16x256xf32>
    %c0_47 = arith.constant 0 : index
    %c0_48 = arith.constant 0 : index
    %c0_49 = arith.constant 0 : index
    %97 = vector.load %arg6[%c0_47, %c0_48, %c0_49] : memref<1x16x256xf32, #tpu.memory_space<vmem>>, vector<1x16x256xf32>
    %98 = vector.shape_cast %97 : vector<1x16x256xf32> to vector<16x256xf32>
    %99 = vector.shape_cast %96 : vector<16x256xf32> to vector<1x16x256xf32>
    tpu.vector_store %arg6[%c0_47, %c0_48, %c0_49], %99 {strides = array<i32>} : memref<1x16x256xf32, #tpu.memory_space<vmem>>, vector<1x16x256xf32>,
    return
  }
  func.func @transform_0(%arg0: i32) -> (i32, i32, i32) {
    %c0_i32 = arith.constant 0 : i32
    %c0_i32_0 = arith.constant 0 : i32
    %c0_i32_1 = arith.constant 0 : i32
    return %arg0, %c0_i32, %c0_i32_0 : i32, i32, i32
  }
  func.func @transform_1(%arg0: i32) -> (i32, i32, i32) {
    %c0_i32 = arith.constant 0 : i32
    %c0_i32_0 = arith.constant 0 : i32
    %c0_i32_1 = arith.constant 0 : i32
    return %arg0, %c0_i32, %c0_i32_0 : i32, i32, i32
  }
  func.func @transform_2(%arg0: i32) -> (i32, i32, i32) {
    %c0_i32 = arith.constant 0 : i32
    %c0_i32_0 = arith.constant 0 : i32
    %c0_i32_1 = arith.constant 0 : i32
    return %arg0, %c0_i32, %c0_i32_0 : i32, i32, i32
  }
  func.func @transform_3(%arg0: i32) -> (i32, i32) {
    %c0_i32 = arith.constant 0 : i32
    %c0_i32_0 = arith.constant 0 : i32
    %c0_i32_1 = arith.constant 0 : i32
    return %c0_i32, %c0_i32_0 : i32, i32
  }
  func.func @transform_4(%arg0: i32) -> (i32, i32) {
    %c0_i32 = arith.constant 0 : i32
    %c0_i32_0 = arith.constant 0 : i32
    %c0_i32_1 = arith.constant 0 : i32
    return %c0_i32, %c0_i32_0 : i32, i32
  }
  func.func @transform_5(%arg0: i32) -> (i32, i32, i32) {
    %c0_i32 = arith.constant 0 : i32
    %c0_i32_0 = arith.constant 0 : i32
    %c0_i32_1 = arith.constant 0 : i32
    return %arg0, %c0_i32, %c0_i32_0 : i32, i32, i32
  }
}

</mosaic_0001>

<bundles_post_ra>
// kernel: gat_layer_batched.1
= control target key start
LH: loop header
LB: loop body
LE: loop exit
PB: predicated region body
PF: predicated region fallthrough
CT: control target
= control target key end

     0   :  { %10 = vsyncpa [#allocation3], 0  ;;  %s6048_s18 = smov 0   ;;  %s7478_s0 = inlined_call_operand.vmem [shape: bf16[2,128,32], index: 0, kind: input, shape index: {}]   ;;  %s7479_s1 = inlined_call_operand.vmem [shape: bf16[2,128,64], index: 1, kind: input, shape index: {}]   ;;  %s7480_s2 = inlined_call_operand.vmem [shape: bf16[2,16,128], index: 2, kind: input, shape index: {}]   ;;  %s7481_s3 = inlined_call_operand.vmem [shape: bf16[176,256], index: 3, kind: input, shape index: {}]   ;;  %s7482_s4 = inlined_call_operand.hbm [shape: f32[640,256], index: 4, kind: input, shape index: {}]   ;;  %s7483_s5 = inlined_call_operand.vmem [shape: f32[2,16,256], index: 5, kind: output, shape index: {}]  }
   0x1 LB: > { %s4676_s19 = sadd.s32 4294967295, %s6004_s18   ;;  %p4678_p0 = scmp.ge.s32.totalorder %s6004_s18, 1  ;;  %s6004_s18 = sphi %s6048_s18, %s16_s18  }
   0x2   : > { %p167_p1 = scmp.lt.s32.totalorder %s6004_s18, 3  ;;  %s6006_s20 = smov [#allocation2]  }
   0x3   : > { %s182_s21 = sshll.u32 %s6006_s20, 4  ;;  %p5806_p3 = scmp.eq.s32.totalorder %s4676_s19, 0  ;;  %s183_s21 = int_to_ptr.vmem [resolvable:$true] %s182_s21 }
   0x4   : > { %p6056_p2 = pnand %p4678_p0, %p167_p1  ;;  %s5979_s23 = scalar_lea.vmem %s183_s21, 20480 }
   0x5   : > { %p5980_p7 = scmp.ne.s32.totalorder %s183_s21, %s5979_s23  ;;  %p5987_p10 = scmp.lt.s32.totalorder %s183_s21, %s183_s21 }
   0x6   : > { %p5802_p4 = pneg %p6056_p2  ;;  %p5988_p11 = scmp.lt.s32.totalorder %s5979_s23, %s5979_s23 }
   0x8   : > { %p5803_p5 = pnand %p5806_p3, %p5802_p4  ;;  %p5989_p12 = por %p5988_p11, %p5987_p10 }
   0xa   : > { %p5970_p6 = pneg %p5803_p5 }
   0xc   : > { %p5982_p8 = pnand %p5980_p7, %p5970_p6 }
   0xe   : > { %p5983_p9 = pneg %p5982_p8 }
  0x10   : > { %p5990_p13 = pnand %p5989_p12, %p5983_p9 }
  0x12   : > { %5993 = shalt.err (!%p5990_p13)
}
  0x13   : > { %s6007_s24 = smov 256   ;;  %s6008_s25 = smov 16  }
  0x14   : > { %5805 = dma.hbm_to_vmem [thread:$0]  (!%p5803_p5), %s7482_s4, 20480, %s183_s21, [#allocation3], %s6007_s24, %s6007_s24, %s6008_s25  }
  0x15   : > { %222 = sbr.rel (%p6056_p2) target bundleno = 3330 (0xd02), region = 40 }
  0x1a   : > { %5999 = dma.done.wait (%p5806_p3), [#allocation3], 20480  }
  0x1b   : > { %6001 = vsyncadd (%p5806_p3), [#allocation3], 4294946816  ;;  %p260_p0 = scmp.lt.s32.totalorder %s4676_s19, 1  ;;  %v6009_v0 = vmov 0   ;;  %v5830_v1 = vld [vmem:[%s7481_s3 + $0x14] ss:$8 sps:$4 sm:$0xff]  }
  0x1c   : > { %559 = vmatprep.mubr.bf16.mxu0 %v6009_v0  ;;  %v5832_v2 = vld [vmem:[%s7481_s3 + $0x10] ss:$8 sps:$4 sm:$0xff]   ;;  %539 = vmatprep.subr.bf16.mxu0 %v5830_v1  ;;  %v5833_v3 = vld [vmem:[%s7481_s3 + $0x4] ss:$8 sps:$4 sm:$0xff]   ;;  %v5835_v4 = vld [vmem:[%s7481_s3] ss:$8 sps:$4 sm:$0xff]  }
  0x1d   : > { %s7526_s19 = smov (!%p260_p0, %s4676_s19), 1  ;;  %540 = vmatpush1.bf16.msra.mxu0 %v5832_v2  ;;  %vm502_vm0 = vcmask 261120   ;;  %v6106_v13 = vld [vmem:[#allocation2] sm:$0xf]  ;;  %vm689_vm1 = vcmask 1043456   ;;  %vm640_vm2 = vcmask 31744  }
  0x1e   : > { %s4870_s28 = sshll.u32 %s7526_s19, 6  ;;  %541 = vmatprep.subr.bf16.mxu0 %v5833_v3  ;;  %5219 = vmatprep.subr.msk.mxu1 %vm689_vm1, %v6106_v13  ;;  %s6010_s15 = smov 124   ;;  %v366_v46 = vld [vmem:[#allocation2 + $0x190] sm:$0xff]  ;;  %v365_v61 = vld [vmem:[#allocation2 + $0x180] sm:$0xff]  ;;  %vm1336_vm14 = vcmask 523264  }
  0x1f   : > { %s264_s10 = scalar_lea.vmem %s7478_s0, %s4870_s28  ;;  %5220 = vmatpush3.msk.msra.mxu1 %vm689_vm1, %v6106_v13  ;;  %v364_v63 = vld [vmem:[#allocation2 + $0x170] sm:$0xff]  ;;  %v363_v2 = vld [vmem:[#allocation2 + $0x160] sm:$0xff]  ;;  %s6231_s20 = scalar_lea.vmem %s7479_s1, %s4870_s28 }
  0x20   : > { %v5836_v5 = vld [vmem:[%s264_s10] sm:$0xff]   ;;  %v5837_v6 = vld [vmem:[%s264_s10 + $0x8] sm:$0xff]   ;;  %v5838_v7 = vld [vmem:[%s264_s10 + $0x10] sm:$0xff]   ;;  %s6011_s21 = smov 112   ;;  %s6012_s22 = smov 96  }
  0x21   : > { %542 = vmatpush1.bf16.msra.mxu0 %v5835_v4  ;;  %v5839_v8 = vld [vmem:[%s264_s10 + $0x18] sm:$0xff]   ;;  %v5840_v9 = vld [vmem:[%s264_s10 + $0x20] sm:$0xff]   ;;  %v5841_v10 = vld [vmem:[%s264_s10 + $0x28] sm:$0xff]   ;;  %s6013_s23 = smov 80   ;;  %s6014_s24 = smov 64  }
  0x22   : > { %v5842_v11 = vld [vmem:[%s264_s10 + $0x30] sm:$0xff]   ;;  %v5843_v12 = vld [vmem:[%s264_s10 + $0x38] sm:$0xff]   ;;  %s6015_s25 = smov 32   ;;  %s4873_s28 = sshll.u32 %s7526_s19, 5 }
  0x23   : > { %s279_s6 = scalar_lea.vmem %s7483_s5, %s4873_s28 }
  0x24   : > { %4703 = vmatmul.mubr.msk.bf16.vlgmr.msra.gmra.mxu0 %vm502_vm0, %v5836_v5  ;;  %v362_v5 = vld [vmem:[#allocation2 + $0x150] sm:$0xff] }
  0x25   : > { %569 = vmatprep.mubr.bf16.mxu0 %v6009_v0 }
  0x2c   : > { %4704 = vmatmul.mubr.msk.bf16.gmra.mxu0 %vm502_vm0, %v5837_v6 }
  0x2d   : > { %579 = vmatprep.mubr.bf16.mxu0 %v6009_v0 }
  0x34   : > { %4705 = vmatmul.mubr.msk.bf16.gmra.mxu0 %vm502_vm0, %v5838_v7  ;;  %v361_v7 = vld [vmem:[#allocation2 + $0x140] sm:$0xff] }
  0x35   : > { %589 = vmatprep.mubr.bf16.mxu0 %v6009_v0 }
  0x3c   : > { %4706 = vmatmul.mubr.msk.bf16.gmra.mxu0 %vm502_vm0, %v5839_v8 }
  0x3d   : > { %599 = vmatprep.mubr.bf16.mxu0 %v6009_v0 }
  0x44   : > { %4707 = vmatmul.mubr.msk.bf16.gmra.mxu0 %vm502_vm0, %v5840_v9  ;;  %v360_v9 = vld [vmem:[#allocation2 + $0x130] sm:$0xff] }
  0x45   : > { %609 = vmatprep.mubr.bf16.mxu0 %v6009_v0 }
  0x4c   : > { %4708 = vmatmul.mubr.msk.bf16.gmra.mxu0 %vm502_vm0, %v5841_v10 }
  0x4d   : > { %619 = vmatprep.mubr.bf16.mxu0 %v6009_v0 }
  0x54   : > { %4709 = vmatmul.mubr.msk.bf16.gmra.mxu0 %vm502_vm0, %v5842_v11  ;;  %v359_v11 = vld [vmem:[#allocation2 + $0x120] sm:$0xff] }
  0x55   : > { %629 = vmatprep.mubr.bf16.mxu0 %v6009_v0 }
  0x5c   : > { %4710 = vmatmul.mubr.msk.bf16.gmra.mxu0 %vm502_vm0, %v5843_v12 }
  0xe4   : > { %v6112_v14 = vpop.f32.mrf.mxu0 }
  0xe6   : > { %v563_v15 = vpop.f32.mrf.mxu0 }
  0xe7   : > { %999 = vrot.lane.b32.xlu0 %v563_v15, %s6010_s15  ;;  %5221 = vmatprep.mubr.msk.f32.mxu1 %vm640_vm2, %v563_v15  ;;  %v358_v15 = vld [vmem:[#allocation2 + $0x110] sm:$0xff] }
  0xe8   : > { %v6116_v16 = vpop.f32.mrf.mxu0 }
  0xea   : > { %v567_v17 = vpop.f32.mrf.mxu0 }
  0xeb   : > { %1001 = vrot.lane.b32.xlu0 %v567_v17, %s6010_s15  ;;  %5222 = vmatmul.mubr.msk.f32.vlgmr.msra.gmra.mxu1 %vm640_vm2, %v567_v17 }
  0xec   : > { %v6120_v18 = vpop.f32.mrf.mxu0 }
  0xee   : > { %v573_v19 = vpop.f32.mrf.mxu0 }
  0xef   : > { %1003 = vrot.lane.b32.xlu1 %v573_v19, %s6010_s15  ;;  %5224 = vmatprep.mubr.msk.f32.mxu1 %vm640_vm2, %v573_v19  ;;  %v357_v19 = vld [vmem:[#allocation2 + $0x100] sm:$0xff] }
  0xf0   : > { %v6124_v20 = vpop.f32.mrf.mxu0 }
  0xf2   : > { %v577_v21 = vpop.f32.mrf.mxu0 }
  0xf3   : > { %1005 = vrot.lane.b32.xlu1 %v577_v21, %s6010_s15  ;;  %5225 = vmatmul.mubr.msk.f32.gmra.mxu1 %vm640_vm2, %v577_v21 }
  0xf4   : > { %v6128_v22 = vpop.f32.mrf.mxu0 }
  0xf6   : > { %v583_v23 = vpop.f32.mrf.mxu0 }
  0xf7   : > { %1007 = vrot.lane.b32.xlu0 %v583_v23, %s6010_s15  ;;  %5227 = vmatprep.mubr.msk.f32.mxu1 %vm640_vm2, %v583_v23  ;;  %v356_v23 = vld [vmem:[#allocation2 + $0xf0] sm:$0xff] }
  0xf8   : > { %v6132_v24 = vpop.f32.mrf.mxu0 }
  0xfa   : > { %v587_v25 = vpop.f32.mrf.mxu0 }
  0xfb   : > { %1009 = vrot.lane.b32.xlu1 %v587_v25, %s6010_s15  ;;  %5228 = vmatmul.mubr.msk.f32.gmra.mxu1 %vm640_vm2, %v587_v25 }
  0xfc   : > { %v6136_v26 = vpop.f32.mrf.mxu0 }
  0xfe   : > { %v593_v27 = vpop.f32.mrf.mxu0 }
  0xff   : > { %1011 = vrot.lane.b32.xlu0 %v593_v27, %s6010_s15  ;;  %5230 = vmatprep.mubr.msk.f32.mxu1 %vm640_vm2, %v593_v27  ;;  %v355_v27 = vld [vmem:[#allocation2 + $0xe0] sm:$0xff] }
 0x100   : > { %v6140_v28 = vpop.f32.mrf.mxu0 }
 0x102   : > { %v597_v29 = vpop.f32.mrf.mxu0 }
 0x103   : > { %1013 = vrot.lane.b32.xlu1 %v597_v29, %s6010_s15  ;;  %5231 = vmatmul.mubr.msk.f32.gmra.mxu1 %vm640_vm2, %v597_v29 }
 0x104   : > { %v6144_v30 = vpop.f32.mrf.mxu0 }
 0x106   : > { %v603_v31 = vpop.f32.mrf.mxu0 }
 0x107   : > { %1015 = vrot.lane.b32.xlu0 %v603_v31, %s6010_s15  ;;  %5233 = vmatprep.mubr.msk.f32.mxu1 %vm640_vm2, %v603_v31  ;;  %v354_v31 = vld [vmem:[#allocation2 + $0xd0] sm:$0xff] }
 0x108   : > { %v6148_v32 = vpop.f32.mrf.mxu0 }
 0x10a   : > { %v607_v33 = vpop.f32.mrf.mxu0 }
 0x10b   : > { %1017 = vrot.lane.b32.xlu1 %v607_v33, %s6010_s15  ;;  %5234 = vmatmul.mubr.msk.f32.gmra.mxu1 %vm640_vm2, %v607_v33 }
 0x10c   : > { %v6152_v34 = vpop.f32.mrf.mxu0 }
 0x10e   : > { %v613_v35 = vpop.f32.mrf.mxu0 }
 0x10f   : > { %1019 = vrot.lane.b32.xlu0 %v613_v35, %s6010_s15  ;;  %5236 = vmatprep.mubr.msk.f32.mxu1 %vm640_vm2, %v613_v35  ;;  %v353_v35 = vld [vmem:[#allocation2 + $0xc0] sm:$0xff] }
 0x110   : > { %v6156_v36 = vpop.f32.mrf.mxu0 }
 0x112   : > { %v617_v37 = vpop.f32.mrf.mxu0 }
 0x113   : > { %1021 = vrot.lane.b32.xlu1 %v617_v37, %s6010_s15  ;;  %5237 = vmatmul.mubr.msk.f32.gmra.mxu1 %vm640_vm2, %v617_v37 }
 0x114   : > { %v6160_v38 = vpop.f32.mrf.mxu0 }
 0x116   : > { %v623_v39 = vpop.f32.mrf.mxu0 }
 0x117   : > { %1023 = vrot.lane.b32.xlu0 %v623_v39, %s6010_s15  ;;  %5239 = vmatprep.mubr.msk.f32.mxu1 %vm640_vm2, %v623_v39  ;;  %v352_v39 = vld [vmem:[#allocation2 + $0xb0] sm:$0xff] }
 0x118   : > { %v6164_v40 = vpop.f32.mrf.mxu0 }
 0x11a   : > { %v627_v41 = vpop.f32.mrf.mxu0 }
 0x11b   : > { %1025 = vrot.lane.b32.xlu1 %v627_v41, %s6010_s15  ;;  %5240 = vmatmul.mubr.msk.f32.gmra.mxu1 %vm640_vm2, %v627_v41 }
 0x11c   : > { %v6168_v42 = vpop.f32.mrf.mxu0 }
 0x11e   : > { %v633_v43 = vpop.f32.mrf.mxu0 }
 0x11f   : > { %1027 = vrot.lane.b32.xlu0 %v633_v43, %s6010_s15  ;;  %5242 = vmatprep.mubr.msk.f32.mxu1 %vm640_vm2, %v633_v43  ;;  %v351_v43 = vld [vmem:[#allocation2 + $0xa0] sm:$0xff] }
 0x120   : > { %v6172_v44 = vpop.f32.mrf.mxu0 }
 0x122   : > { %v637_v45 = vpop.f32.mrf.mxu0 }
 0x123   : > { %1029 = vrot.lane.b32.xlu1 %v637_v45, %s6010_s15  ;;  %5243 = vmatmul.mubr.msk.f32.gmra.mxu1 %vm640_vm2, %v637_v45 }
 0x124   : > { %5277 = vmatprep.mubr.f32.mxu1 %v366_v46  ;;  %v350_v46 = vld [vmem:[#allocation2 + $0x90] sm:$0xff] }
 0x1ab   : > { %v6176_v47 = vpop.f32.mrf.mxu1 }
 0x1ad   : > { %v6178_v48 = vpop.f32.mrf.mxu1 }
 0x1b3   : > { %v5226_v49 = vpop.f32.mrf.mxu1 }
 0x1b4   : > { %v841_v41 = vmul.f32 %v5226_v49, %v353_v35  ;;  %v369_v49 = vld [vmem:[#allocation2 + $0x1c0] sm:$0xff] }
 0x1b5   : > { %v6180_v50 = vpop.f32.mrf.mxu1 }
 0x1b6   : > { %v840_v45 = vmul.f32 %v6180_v50, %v352_v39  ;;  %v372_v50 = vld [vmem:[#allocation2 + $0x1f0] sm:$0xff] }
 0x1bb   : > { %v5229_v51 = vpop.f32.mrf.mxu1 }
 0x1bc   : > { %v843_v33 = vmul.f32 %v5229_v51, %v355_v27  ;;  %v838_v51 = vmul.f32 %v6178_v48, %v350_v46  ;;  %v371_v48 = vld [vmem:[#allocation2 + $0x1e0] sm:$0xff]  ;;  %v346_v27 = vld [vmem:[#allocation2 + $0x50] sm:$0xff] }
 0x1bd   : > { %v779_v52 = vpop.f32.mrf.mxu1 }
 0x1be   : > { %v842_v37 = vmul.f32 %v779_v52, %v354_v31  ;;  %v367_v52 = vld [vmem:[#allocation2 + $0x1a0] sm:$0xff] }
 0x1c3   : > { %v5232_v53 = vpop.f32.mrf.mxu1 }
 0x1c4   : > { %v845_v25 = vmul.f32 %v5232_v53, %v357_v19  ;;  %v839_v53 = vmul.f32 %v6176_v47, %v351_v43  ;;  %v370_v47 = vld [vmem:[#allocation2 + $0x1d0] sm:$0xff] }
 0x1c5   : > { %v789_v54 = vpop.f32.mrf.mxu1 }
 0x1c6   : > { %v844_v29 = vmul.f32 %v789_v54, %v356_v23  ;;  %v368_v54 = vld [vmem:[#allocation2 + $0x1b0] sm:$0xff] }
 0x1c7   : > { %v348_v23 = vld [vmem:[#allocation2 + $0x70] sm:$0xff] }
 0x1cb   : > { %v5235_v55 = vpop.f32.mrf.mxu1 }
 0x1cc   : > { %v847_v17 = vmul.f32 %v5235_v55, %v359_v11  ;;  %v373_v55 = vld [vmem:[#allocation2 + $0x200] sm:$0xff] }
 0x1cd   : > { %v799_v56 = vpop.f32.mrf.mxu1 }
 0x1ce   : > { %v846_v21 = vmul.f32 %v799_v56, %v358_v15  ;;  %v374_v56 = vld [vmem:[#allocation2 + $0x210] sm:$0xff] }
 0x1d3   : > { %v5238_v57 = vpop.f32.mrf.mxu1 }
 0x1d4   : > { %v849_v10 = vmul.f32 %v5238_v57, %v361_v7  ;;  %v375_v57 = vld [vmem:[#allocation2 + $0x220] sm:$0xff] }
 0x1d5   : > { %v809_v58 = vpop.f32.mrf.mxu1 }
 0x1d6   : > { %v848_v12 = vmul.f32 %v809_v58, %v360_v9  ;;  %v376_v58 = vld [vmem:[#allocation2 + $0x230] sm:$0xff] }
 0x1db   : > { %v5241_v59 = vpop.f32.mrf.mxu1 }
 0x1dc   : > { %v851_v6 = vmul.f32 %v5241_v59, %v363_v2  ;;  %v377_v59 = vld [vmem:[#allocation2 + $0x240] sm:$0xff]  ;;  %v1004_v2 = vpop.permute.xlu1 %1003 }
 0x1dd   : > { %v819_v60 = vpop.f32.mrf.mxu1 }
 0x1de   : > { %v850_v8 = vmul.f32 %v819_v60, %v362_v5  ;;  %v378_v60 = vld [vmem:[#allocation2 + $0x250] sm:$0xff] }
 0x1e3   : > { %v5244_v62 = vpop.f32.mrf.mxu1 }
 0x1e4   : > { %v853_v1 = vmul.f32 %v5244_v62, %v365_v61  ;;  %v379_v61 = vld [vmem:[#allocation2 + $0x260] sm:$0xff]  ;;  %v380_v62 = vld [vmem:[#allocation2 + $0x270] sm:$0xff] }
 0x1e5   : > { %v829_v3 = vpop.f32.mrf.mxu1 }
 0x1e6   : > { %v852_v4 = vmul.f32 %v829_v3, %v364_v63  ;;  %5245 = vmatprep.subr.mxu1 %v853_v1  ;;  %v1000_v63 = vpop.permute.xlu0 %999 }
 0x1e7   : > { %5246 = vmatpush3.msra.mxu1 %v853_v1  ;;  %v381_v1 = vld [vmem:[#allocation2 + $0x280] sm:$0xff] }
 0x1e8   : > { %5247 = vmatprep.subr.mxu1 %v852_v4 }
 0x1e9   : > { %5248 = vmatpush3.msra.mxu1 %v852_v4  ;;  %v1006_v4 = vpop.permute.xlu1 %1005 }
 0x1ea   : > { %5249 = vmatprep.subr.mxu1 %v851_v6  ;;  %v1002_v3 = vpop.permute.xlu0 %1001 }
 0x1eb   : > { %5250 = vmatpush3.msra.mxu1 %v851_v6 }
 0x1ec   : > { %5251 = vmatprep.subr.mxu1 %v850_v8 }
 0x1ed   : > { %5252 = vmatpush3.msra.mxu1 %v850_v8  ;;  %v1010_v6 = vpop.permute.xlu1 %1009 }
 0x1ee   : > { %5253 = vmatprep.subr.mxu1 %v849_v10  ;;  %v1008_v5 = vpop.permute.xlu0 %1007 }
 0x1ef   : > { %5254 = vmatpush3.msra.mxu1 %v849_v10 }
 0x1f0   : > { %5255 = vmatprep.subr.mxu1 %v848_v12 }
 0x1f1   : > { %5256 = vmatpush3.msra.mxu1 %v848_v12  ;;  %v1014_v8 = vpop.permute.xlu1 %1013 }
 0x1f2   : > { %5257 = vmatprep.subr.mxu1 %v847_v17  ;;  %v1012_v7 = vpop.permute.xlu0 %1011 }
 0x1f3   : > { %5258 = vmatpush3.msra.mxu1 %v847_v17 }
 0x1f4   : > { %5259 = vmatprep.subr.mxu1 %v846_v21 }
 0x1f5   : > { %5260 = vmatpush3.msra.mxu1 %v846_v21  ;;  %v349_v21 = vld [vmem:[#allocation2 + $0x80] sm:$0xff] }
 0x1f6   : > { %5261 = vmatprep.subr.mxu1 %v845_v25  ;;  %v1016_v9 = vpop.permute.xlu0 %1015  ;;  %5327 = vmatprep.subr.mxu0 %v349_v21 }
 0x1f7   : > { %5262 = vmatpush3.msra.mxu1 %v845_v25  ;;  %5328 = vmatpush3.msra.mxu0 %v349_v21  ;;  %v347_v25 = vld [vmem:[#allocation2 + $0x60] sm:$0xff] }
 0x1f8   : > { %5263 = vmatprep.subr.mxu1 %v844_v29  ;;  %5329 = vmatprep.subr.mxu0 %v348_v23 }
 0x1f9   : > { %5264 = vmatpush3.msra.mxu1 %v844_v29  ;;  %5330 = vmatpush3.msra.mxu0 %v348_v23  ;;  %v345_v29 = vld [vmem:[#allocation2 + $0x40] sm:$0xff] }
 0x1fa   : > { %5265 = vmatprep.subr.mxu1 %v843_v33  ;;  %v1020_v10 = vpop.permute.xlu0 %1019  ;;  %5331 = vmatprep.subr.mxu0 %v347_v25 }
 0x1fb   : > { %5266 = vmatpush3.msra.mxu1 %v843_v33  ;;  %5332 = vmatpush3.msra.mxu0 %v347_v25 }
 0x1fc   : > { %5267 = vmatprep.subr.mxu1 %v842_v37  ;;  %5333 = vmatprep.subr.mxu0 %v346_v27 }
 0x1fd   : > { %5268 = vmatpush3.msra.mxu1 %v842_v37  ;;  %5334 = vmatpush3.msra.mxu0 %v346_v27 }
 0x1fe   : > { %5269 = vmatprep.subr.mxu1 %v841_v41  ;;  %v1024_v12 = vpop.permute.xlu0 %1023  ;;  %5335 = vmatprep.subr.mxu0 %v345_v29 }
 0x1ff   : > { %5270 = vmatpush3.msra.mxu1 %v841_v41  ;;  %5336 = vmatpush3.msra.mxu0 %v345_v29 }
 0x200   : > { %5271 = vmatprep.subr.mxu1 %v840_v45 }
 0x201   : > { %5272 = vmatpush3.msra.mxu1 %v840_v45 }
 0x202   : > { %5273 = vmatprep.subr.mxu1 %v839_v53  ;;  %v1028_v17 = vpop.permute.xlu0 %1027 }
 0x203   : > { %5274 = vmatpush3.msra.mxu1 %v839_v53 }
 0x204   : > { %5275 = vmatprep.subr.mxu1 %v838_v51 }
 0x205   : > { %5276 = vmatpush3.msra.mxu1 %v838_v51 }
 0x206   : > { %5278 = vmatmul.mubr.f32.vlgmr.msra.gmra.mxu1 %v367_v52  ;;  %5301 = vmatprep.subr.msk.mxu1 %vm689_vm1, %v6106_v13  ;;  %v300_v52 = vld [vmem:[%s6231_s20 + $0x4] sm:$0xf] }
 0x207   : > { %5302 = vmatpush3.msk.msra.mxu1 %vm689_vm1, %v6106_v13  ;;  %5280 = vmatprep.mubr.f32.mxu1 %v368_v54  ;;  %v299_v54 = vld [vmem:[%s6231_s20] sm:$0xf]  ;;  %vm1257_vm3 = vcmp.gt.bf16.partialorder %v300_v52, 0 }
 0x208   : > { %5367 = vmatprep.subr.msk.mxu1 %vm689_vm1, %v6106_v13  ;;  %vm1256_vm4 = vcmp.gt.bf16.partialorder %v299_v54, 0 }
 0x20a   : > { %5281 = vmatmul.mubr.f32.gmra.mxu1 %v369_v49 }
 0x20b   : > { %5283 = vmatprep.mubr.f32.mxu1 %v370_v47  ;;  %v301_v47 = vld [vmem:[%s6231_s20 + $0x8] sm:$0xf] }
 0x20c   : > { %vm1258_vm5 = vcmp.gt.bf16.partialorder %v301_v47, 0 }
 0x20e   : > { %5284 = vmatmul.mubr.f32.gmra.mxu1 %v371_v48  ;;  %v302_v48 = vld [vmem:[%s6231_s20 + $0xc] sm:$0xf] }
 0x20f   : > { %5286 = vmatprep.mubr.f32.mxu1 %v372_v50  ;;  %v304_v50 = vld [vmem:[%s6231_s20 + $0x14] sm:$0xf]  ;;  %vm1259_vm6 = vcmp.gt.bf16.partialorder %v302_v48, 0 }
 0x210   : > { %vm1261_vm7 = vcmp.gt.bf16.partialorder %v304_v50, 0 }
 0x212   : > { %5287 = vmatmul.mubr.f32.gmra.mxu1 %v373_v55 }
 0x213   : > { %5289 = vmatprep.mubr.f32.mxu1 %v374_v56  ;;  %v303_v56 = vld [vmem:[%s6231_s20 + $0x10] sm:$0xf] }
 0x214   : > { %vm1260_vm8 = vcmp.gt.bf16.partialorder %v303_v56, 0 }
 0x216   : > { %5290 = vmatmul.mubr.f32.gmra.mxu1 %v375_v57 }
 0x217   : > { %5292 = vmatprep.mubr.f32.mxu1 %v376_v58  ;;  %v1273_v58 = vsel %vm1257_vm3, 65537, %v6009_v0 }
 0x21a   : > { %5293 = vmatmul.mubr.f32.gmra.mxu1 %v377_v59  ;;  %v1272_v59 = vsel %vm1256_vm4, 65537, %v6009_v0 }
 0x21b   : > { %5295 = vmatprep.mubr.f32.mxu1 %v378_v60 }
 0x21e   : > { %5296 = vmatmul.mubr.f32.gmra.mxu1 %v379_v61  ;;  %v306_v61 = vld [vmem:[%s6231_s20 + $0x1c] sm:$0xf] }
 0x21f   : > { %5298 = vmatprep.mubr.f32.mxu1 %v380_v62  ;;  %v1274_v62 = vsel %vm1258_vm5, 65537, %v6009_v0  ;;  %vm1263_vm9 = vcmp.gt.bf16.partialorder %v306_v61, 0 }
 0x220   : > { %v1279_v23 = vsel %vm1263_vm9, 65537, %v6009_v0 }
 0x222   : > { %5299 = vmatmul.mubr.f32.gmra.mxu1 %v381_v1  ;;  %v305_v1 = vld [vmem:[%s6231_s20 + $0x18] sm:$0xf] }
 0x223   : > { %5303 = vmatprep.mubr.msk.f32.mxu1 %vm640_vm2, %v1000_v63  ;;  %v1275_v63 = vsel %vm1259_vm6, 65537, %v6009_v0  ;;  %vm1262_vm10 = vcmp.gt.bf16.partialorder %v305_v1, 0 }
 0x224   : > { %v1278_v29 = vsel %vm1262_vm10, 65537, %v6009_v0 }
 0x225   : > { %v1294_v1 = vunpack.c.l.b16 %v1278_v29  ;;  %v312_v29 = vld [vmem:[%s6231_s20 + $0x34] sm:$0xf] }
 0x226   : > { %5304 = vmatmul.mubr.msk.f32.vlgmr.msra.gmra.mxu1 %vm640_vm2, %v1002_v3 }
 0x227   : > { %5368 = vmatpush3.msk.msra.mxu1 %vm689_vm1, %v6106_v13  ;;  %5306 = vmatprep.mubr.msk.f32.mxu1 %vm640_vm2, %v1004_v2  ;;  %v1018_v13 = vpop.permute.xlu1 %1017  ;;  %v1277_v2 = vsel %vm1261_vm7, 65537, %v6009_v0 }
 0x228   : > { %5421 = vmatprep.subr.mxu1 %v6172_v44 }
 0x22a   : > { %5307 = vmatmul.mubr.msk.f32.gmra.mxu1 %vm640_vm2, %v1006_v4  ;;  %v1289_v4 = vunpack.c.l.b16 %v1273_v58 }
 0x22b   : > { %5309 = vmatprep.mubr.msk.f32.mxu1 %vm640_vm2, %v1008_v5  ;;  %v1022_v11 = vpop.permute.xlu1 %1021  ;;  %v1288_v5 = vunpack.c.l.b16 %v1272_v59 }
 0x22c   : > { %vm6261_vm13 = vcmp.ne.s32.totalorder %v1289_v4, 0 }
 0x22d   : > { %vm6265_vm15 = vcmp.ne.s32.totalorder %v1288_v5, 0 }
 0x22e   : > { %5310 = vmatmul.mubr.msk.f32.gmra.mxu1 %vm640_vm2, %v1010_v6  ;;  %v1276_v6 = vsel %vm1260_vm8, 65537, %v6009_v0 }
 0x22f   : > { %5312 = vmatprep.mubr.msk.f32.mxu1 %vm640_vm2, %v1012_v7  ;;  %v1026_v15 = vpop.permute.xlu1 %1025  ;;  %v307_v7 = vld [vmem:[%s6231_s20 + $0x20] sm:$0xf] }
 0x230   : > { %vm1264_vm11 = vcmp.gt.bf16.partialorder %v307_v7, 0  ;;  %v309_v7 = vld [vmem:[%s6231_s20 + $0x28] sm:$0xf] }
 0x231   : > { %v1280_v48 = vsel %vm1264_vm11, 65537, %v6009_v0 }
 0x232   : > { %5313 = vmatmul.mubr.msk.f32.gmra.mxu1 %vm640_vm2, %v1014_v8  ;;  %v308_v8 = vld [vmem:[%s6231_s20 + $0x24] sm:$0xf] }
 0x233   : > { %5315 = vmatprep.mubr.msk.f32.mxu1 %vm640_vm2, %v1016_v9  ;;  %v1030_v19 = vpop.permute.xlu1 %1029  ;;  %vm1265_vm12 = vcmp.gt.bf16.partialorder %v308_v8, 0 }
 0x234   : > { %v1281_v50 = vsel %vm1265_vm12, 65537, %v6009_v0  ;;  %vm1266_vm12 = vcmp.gt.bf16.partialorder %v309_v7, 0 }
 0x236   : > { %5316 = vmatmul.mubr.msk.f32.gmra.mxu1 %vm640_vm2, %v1018_v13  ;;  %v1290_v13 = vunpack.c.l.b16 %v1274_v62 }
 0x237   : > { %5318 = vmatprep.mubr.msk.f32.mxu1 %vm640_vm2, %v1020_v10  ;;  %v1291_v10 = vunpack.c.l.b16 %v1275_v63 }
 0x238   : > { %vm6272_vm3 = vcmp.ne.s32.totalorder %v1290_v13, 0  ;;  %v1296_v13 = vunpack.c.l.b16 %v1280_v48 }
 0x239   : > { %vm6276_vm4 = vcmp.ne.s32.totalorder %v1291_v10, 0  ;;  %v1297_v10 = vunpack.c.l.b16 %v1281_v50 }
 0x23a   : > { %5319 = vmatmul.mubr.msk.f32.gmra.mxu1 %vm640_vm2, %v1022_v11  ;;  %v1293_v11 = vunpack.c.l.b16 %v1277_v2  ;;  %v1295_v2 = vunpack.c.l.b16 %v1279_v23 }
 0x23b   : > { %5321 = vmatprep.mubr.msk.f32.mxu1 %vm640_vm2, %v1024_v12 }
 0x23c   : > { %vm6287_vm7 = vcmp.ne.s32.totalorder %v1293_v11, 0  ;;  %vm6306_vm11 = vcmp.ne.s32.totalorder %v1295_v2, 0 }
 0x23e   : > { %5322 = vmatmul.mubr.msk.f32.gmra.mxu1 %vm640_vm2, %v1026_v15  ;;  %v1292_v15 = vunpack.c.l.b16 %v1276_v6 }
 0x23f   : > { %5324 = vmatprep.mubr.msk.f32.mxu1 %vm640_vm2, %v1028_v17 }
 0x240   : > { %vm6283_vm6 = vcmp.ne.s32.totalorder %v1292_v15, 0 }
 0x242   : > { %5325 = vmatmul.mubr.msk.f32.gmra.mxu1 %vm640_vm2, %v1030_v19  ;;  %v344_v19 = vld [vmem:[#allocation2 + $0x30] sm:$0xff] }
 0x243   : > { %5337 = vmatprep.subr.mxu0 %v344_v19 }
 0x244   : > { %5338 = vmatpush3.msra.mxu0 %v344_v19 }
 0x2c6   : > { %v5279_v31 = vpop.f32.mrf.mxu1 }
 0x2c8   : > { %v920_v33 = vpop.f32.mrf.mxu1 }
 0x2ca   : > { %v6210_v35 = vpop.f32.mrf.mxu1 }
 0x2cc   : > { %v6212_v37 = vpop.f32.mrf.mxu1 }
 0x2ce   : > { %v6214_v39 = vpop.f32.mrf.mxu1 }
 0x2d0   : > { %v6216_v41 = vpop.f32.mrf.mxu1 }
 0x2d2   : > { %v6218_v43 = vpop.f32.mrf.mxu1 }
 0x2d4   : > { %v6220_v45 = vpop.f32.mrf.mxu1 }
 0x2d6   : > { %v6222_v46 = vpop.f32.mrf.mxu1 }
 0x2d8   : > { %v6224_v53 = vpop.f32.mrf.mxu1 }
 0x2da   : > { %v6233_v51 = vpop.f32.mrf.mxu1 }
 0x2dc   : > { %v6237_v49 = vpop.f32.mrf.mxu1 }
 0x2de   : > { %v6242_v55 = vpop.f32.mrf.mxu1 }
 0x2e0   : > { %v6245_v57 = vpop.f32.mrf.mxu1 }
 0x2e2   : > { %v6249_v60 = vpop.f32.mrf.mxu1 }
 0x2e4   : > { %v6256_v3 = vpop.f32.mrf.mxu1 }
 0x2e6   : > { %v5305_v9 = vpop.f32.mrf.mxu1 }
 0x2e7   : > { %v1135_v12 = vadd.f32 %v5305_v9, %v5279_v31  ;;  %v310_v31 = vld [vmem:[%s6231_s20 + $0x2c] sm:$0xf] }
 0x2e8   : > { %v1129_v17 = vpop.f32.mrf.mxu1  ;;  %vm1267_vm8 = vcmp.gt.bf16.partialorder %v310_v31, 0 }
 0x2e9   : > { %v1225_v25 = vmul.f32 0.2, %v1135_v12  ;;  %v1130_v27 = vadd.f32 %v1129_v17, %v920_v33  ;;  %vm1209_vm1 = vcmp.ge.f32.partialorder %v1135_v12, 0.0  ;;  %v6312_v21 = vsel %vm1267_vm8, 65537, %v6009_v0 }
 0x2ea   : > { %v5308_v52 = vpop.f32.mrf.mxu1 }
 0x2eb   : > { %v1224_v56 = vmul.f32 0.2, %v1130_v27  ;;  %v1145_v33 = vadd.f32 %v5308_v52, %v6210_v35  ;;  %v1241_v58 = vsel %vm1209_vm1, %v1135_v12, %v1225_v25  ;;  %vm1208_vm5 = vcmp.ge.f32.partialorder %v1130_v27, 0.0 }
 0x2ec   : > { %v1139_v62 = vpop.f32.mrf.mxu1  ;;  %v6293_v63 = vsel %vm6261_vm13, %v1241_v58, -1e+09  ;;  %vm6325_vm13 = vcmp.ne.s32.totalorder %v1294_v1, 0  ;;  %v1282_v1 = vsel %vm1266_vm12, 65537, %v6009_v0 }
 0x2ed   : > { %v1227_v4 = vmul.f32 0.2, %v1145_v33  ;;  %v1140_v35 = vadd.f32 %v1139_v62, %v6212_v37  ;;  %v1340_v5 = vsel %vm1336_vm14, %v6293_v63, -inf  ;;  %v1240_v6 = vsel %vm1208_vm5, %v1130_v27, %v1224_v56  ;;  %v311_v27 = vld [vmem:[%s6231_s20 + $0x30] sm:$0xf] }
 0x2ee   : > { %1341 = vmax.xlane.f32.xlu1 %v1340_v5  ;;  %v5311_v8 = vpop.f32.mrf.mxu1  ;;  %v6301_v9 = vsel %vm6265_vm15, %v1240_v6, -1e+09  ;;  %vm1211_vm9 = vcmp.ge.f32.partialorder %v1145_v33, 0.0  ;;  %vm6332_vm5 = vcmp.ne.s32.totalorder %v1296_v13, 0  ;;  %vm1268_vm8 = vcmp.gt.bf16.partialorder %v311_v27, 0 }
 0x2ef   : > { %v1226_v11 = vmul.f32 0.2, %v1140_v35  ;;  %v1155_v12 = vadd.f32 %v5311_v8, %v6214_v39  ;;  %v1337_v37 = vsel %vm1336_vm14, %v6301_v9, -inf  ;;  %vm1210_vm10 = vcmp.ge.f32.partialorder %v1140_v35, 0.0  ;;  %v313_v5 = vld [vmem:[%s6231_s20 + $0x38] sm:$0xf] }
 0x2f0   : > { %v1149_v15 = vpop.f32.mrf.mxu1  ;;  %1338 = vmax.xlane.f32.xlu0 %v1337_v37  ;;  %v1243_v17 = vsel %vm1211_vm9, %v1145_v33, %v1227_v4  ;;  %v1298_v37 = vunpack.c.l.b16 %v1282_v1 }
 0x2f1   : > { %v1229_v23 = vmul.f32 0.2, %v1155_v12  ;;  %v1150_v25 = vadd.f32 %v1149_v15, %v6216_v41  ;;  %v1242_v39 = vsel %vm1210_vm10, %v1140_v35, %v1226_v11  ;;  %v6323_v50 = vsel %vm6276_vm4, %v1243_v17, -1e+09 }
 0x2f2   : > { %v5314_v52 = vpop.f32.mrf.mxu1  ;;  %v6319_v48 = vsel %vm6272_vm3, %v1242_v39, -1e+09  ;;  %vm1213_vm15 = vcmp.ge.f32.partialorder %v1155_v12, 0.0  ;;  %vm6336_vm3 = vcmp.ne.s32.totalorder %v1297_v10, 0  ;;  %vm1269_vm4 = vcmp.gt.bf16.partialorder %v312_v29, 0 }
 0x2f3   : > { %v1228_v31 = vmul.f32 0.2, %v1150_v25  ;;  %v1165_v41 = vadd.f32 %v5314_v52, %v6218_v43  ;;  %v1343_v33 = vsel %vm1336_vm14, %v6319_v48, -inf  ;;  %vm1212_vm1 = vcmp.ge.f32.partialorder %v1150_v25, 0.0 }
 0x2f4   : > { %v1159_v58 = vpop.f32.mrf.mxu1  ;;  %1344 = vmax.xlane.f32.xlu0 %v1343_v33  ;;  %v1245_v62 = vsel %vm1213_vm15, %v1155_v12, %v1229_v23  ;;  %v1299_v43 = vunpack.c.l.b16 %v6312_v21  ;;  %v1346_v13 = vsel %vm1336_vm14, %v6323_v50, -inf  ;;  %v1284_v15 = vsel %vm1268_vm8, 65537, %v6009_v0 }
 0x2f5   : > { %v1231_v2 = vmul.f32 0.2, %v1165_v41  ;;  %v1160_v4 = vadd.f32 %v1159_v58, %v6220_v45  ;;  %v1244_v35 = vsel %vm1212_vm1, %v1150_v25, %v1228_v31  ;;  %v6353_v7 = vsel %vm6287_vm7, %v1245_v62, -1e+09  ;;  %v314_v25 = vld [vmem:[%s6231_s20 + $0x3c] sm:$0xf] }
 0x2f6   : > { %v5317_v6 = vpop.f32.mrf.mxu1  ;;  %v6347_v8 = vsel %vm6283_vm6, %v1244_v35, -1e+09  ;;  %vm1215_vm9 = vcmp.ge.f32.partialorder %v1165_v41, 0.0  ;;  %v6362_v61 = vsel %vm1269_vm4, 65537, %v6009_v0  ;;  %vm1270_vm6 = vcmp.gt.bf16.partialorder %v313_v5, 0 }
 0x2f7   : > { %v1230_v10 = vmul.f32 0.2, %v1160_v4  ;;  %v1175_v45 = vadd.f32 %v5317_v6, %v6222_v46  ;;  %v1349_v11 = vsel %vm1336_vm14, %v6347_v8, -inf  ;;  %vm1214_vm10 = vcmp.ge.f32.partialorder %v1160_v4, 0.0 }
 0x2f8   : > { %v1169_v12 = vpop.f32.mrf.mxu1  ;;  %1350 = vmax.xlane.f32.xlu1 %v1349_v11  ;;  %1347 = vmax.xlane.f32.xlu0 %v1346_v13  ;;  %v1247_v59 = vsel %vm1215_vm9, %v1165_v41, %v1231_v2  ;;  %v1352_v31 = vsel %vm1336_vm14, %v6353_v7, -inf  ;;  %v1300_v62 = vunpack.c.l.b16 %v1284_v15  ;;  %vm1271_vm15 = vcmp.gt.bf16.partialorder %v314_v25, 0 }
 0x2f9   : > { %v1233_v17 = vmul.f32 0.2, %v1175_v45  ;;  %v1170_v23 = vadd.f32 %v1169_v12, %v6224_v53  ;;  %v1246_v46 = vsel %vm1214_vm10, %v1160_v4, %v1230_v10  ;;  %v6374_v27 = vsel %vm6306_vm11, %v1247_v59, -1e+09 }
 0x2fa   : > { %v5320_v39 = vpop.f32.mrf.mxu1  ;;  %v6368_v52 = vsel %vm6325_vm13, %v1246_v46, -1e+09  ;;  %vm1217_vm7 = vcmp.ge.f32.partialorder %v1175_v45, 0.0  ;;  %vm6379_vm13 = vcmp.ne.s32.totalorder %v1298_v37, 0  ;;  %v1358_v13 = vsel %vm1336_vm14, %v6374_v27, -inf }
 0x2fb   : > { %v1232_v29 = vmul.f32 0.2, %v1170_v23  ;;  %v1185_v41 = vadd.f32 %v5320_v39, %v6233_v51  ;;  %v1355_v53 = vsel %vm1336_vm14, %v6368_v52, -inf  ;;  %vm1216_vm12 = vcmp.ge.f32.partialorder %v1170_v23, 0.0 }
 0x2fc   : > { %v1179_v33 = vpop.f32.mrf.mxu1  ;;  %1356 = vmax.xlane.f32.xlu1 %v1355_v53  ;;  %1353 = vmax.xlane.f32.xlu0 %v1352_v31  ;;  %v1249_v58 = vsel %vm1217_vm7, %v1175_v45, %v1233_v17  ;;  %v1286_v51 = vsel %vm1270_vm6, 65537, %v6009_v0  ;;  %v1301_v12 = vunpack.c.l.b16 %v6362_v61  ;;  %v343_v61 = vld [vmem:[#allocation2 + $0x20] sm:$0xff] }
 0x2fd   : > { %v1235_v1 = vmul.f32 0.2, %v1185_v41  ;;  %v1180_v2 = vadd.f32 %v1179_v33, %v6237_v49  ;;  %v1248_v4 = vsel %vm1216_vm12, %v1170_v23, %v1232_v29  ;;  %v6394_v10 = vsel %vm6336_vm3, %v1249_v58, -1e+09  ;;  %5339 = vmatprep.subr.mxu0 %v343_v61 }
 0x2fe   : > { %v5323_v35 = vpop.f32.mrf.mxu1  ;;  %v6388_v6 = vsel %vm6332_vm5, %v1248_v4, -1e+09  ;;  %vm1219_vm11 = vcmp.ge.f32.partialorder %v1185_v41, 0.0  ;;  %vm6399_vm5 = vcmp.ne.s32.totalorder %v1300_v62, 0  ;;  %vm6405_vm3 = vcmp.ne.s32.totalorder %v1299_v43, 0  ;;  %5340 = vmatpush3.msra.mxu0 %v343_v61 }
 0x2ff   : > { %v1234_v49 = vmul.f32 0.2, %v1180_v2  ;;  %v1195_v45 = vadd.f32 %v5323_v35, %v6242_v55  ;;  %v1361_v5 = vsel %vm1336_vm14, %v6388_v6, -inf  ;;  %vm1218_vm1 = vcmp.ge.f32.partialorder %v1180_v2, 0.0 }
 0x300   : > { %v1189_v11 = vpop.f32.mrf.mxu1  ;;  %1362 = vmax.xlane.f32.xlu1 %v1361_v5  ;;  %1359 = vmax.xlane.f32.xlu0 %v1358_v13  ;;  %v1287_v55 = vsel %vm1271_vm15, 65537, %v6009_v0  ;;  %v1251_v17 = vsel %vm1219_vm11, %v1185_v41, %v1235_v1  ;;  %v1364_v21 = vsel %vm1336_vm14, %v6394_v10, -inf  ;;  %v1302_v43 = vunpack.c.l.b16 %v1286_v51 }
 0x301   : > { %v1237_v59 = vmul.f32 0.2, %v1195_v45  ;;  %v1190_v37 = vadd.f32 %v1189_v11, %v6245_v57  ;;  %v1250_v15 = vsel %vm1218_vm1, %v1180_v2, %v1234_v49  ;;  %vm1221_vm4 = vcmp.ge.f32.partialorder %v1195_v45, 0.0  ;;  %v342_v49 = vld [vmem:[#allocation2 + $0x10] sm:$0xff] }
 0x302   : > { %v5326_v23 = vpop.f32.mrf.mxu1  ;;  %v6416_v46 = vsel %vm6379_vm13, %v1250_v15, -1e+09  ;;  %v6425_v31 = vsel %vm6405_vm3, %v1251_v17, -1e+09  ;;  %vm6427_vm9 = vcmp.ne.s32.totalorder %v1301_v12, 0  ;;  %v1303_v41 = vunpack.c.l.b16 %v1287_v55  ;;  %5341 = vmatprep.subr.mxu0 %v342_v49 }
 0x303   : > { %v1236_v39 = vmul.f32 0.2, %v1190_v37  ;;  %v1205_v0 = vadd.f32 %v5326_v23, %v6249_v60  ;;  %v1367_v57 = vsel %vm1336_vm14, %v6416_v46, -inf  ;;  %vm1220_vm8 = vcmp.ge.f32.partialorder %v1190_v37, 0.0  ;;  %5342 = vmatpush3.msra.mxu0 %v342_v49 }
 0x304   : > { %v1199_v25 = vpop.f32.mrf.mxu1  ;;  %1368 = vmax.xlane.f32.xlu1 %v1367_v57  ;;  %1365 = vmax.xlane.f32.xlu0 %v1364_v21  ;;  %v1253_v56 = vsel %vm1221_vm4, %v1195_v45, %v1237_v59  ;;  %vm1318_vm10 = vcmp.ne.s32.totalorder %v1302_v43, 0  ;;  %v1370_v1 = vsel %vm1336_vm14, %v6425_v31, -inf  ;;  %vm1319_vm12 = vcmp.ne.s32.totalorder %v1303_v41, 0 }
 0x305   : > { %v1239_v53 = vmul.f32 0.2, %v1205_v0  ;;  %v1200_v60 = vadd.f32 %v1199_v25, %v6256_v3  ;;  %v1252_v33 = vsel %vm1220_vm8, %v1190_v37, %v1236_v39  ;;  %vm1223_vm6 = vcmp.ge.f32.partialorder %v1205_v0, 0.0 }
 0x306   : > { %v6435_v58 = vsel %vm6399_vm5, %v1252_v33, -1e+09  ;;  %v6443_v3 = vsel %vm6427_vm9, %v1253_v56, -1e+09  ;;  %vm3700_vm13 = vcmask 785408  }
 0x307   : > { %v1238_v62 = vmul.f32 0.2, %v1200_v60  ;;  %v1373_v19 = vsel %vm1336_vm14, %v6435_v58, -inf  ;;  %vm1222_vm7 = vcmp.ge.f32.partialorder %v1200_v60, 0.0  ;;  %v1255_v4 = vsel %vm1223_vm6, %v1205_v0, %v1239_v53 }
 0x308   : > { %1374 = vmax.xlane.f32.xlu1 %v1373_v19  ;;  %1371 = vmax.xlane.f32.xlu0 %v1370_v1  ;;  %v1376_v13 = vsel %vm1336_vm14, %v6443_v3, -inf  ;;  %v6451_v45 = vsel %vm1319_vm12, %v1255_v4, -1e+09 }
 0x309   : > { %v1254_v2 = vsel %vm1222_vm7, %v1200_v60, %v1238_v62  ;;  %v1382_v5 = vsel %vm1336_vm14, %v6451_v45, -inf }
 0x30a   : > { %v6445_v51 = vsel %vm1318_vm10, %v1254_v2, -1e+09 }
 0x30b   : > { %v1379_v35 = vsel %vm1336_vm14, %v6445_v51, -inf }
 0x30c   : > { %1380 = vmax.xlane.f32.xlu1 %v1379_v35  ;;  %1377 = vmax.xlane.f32.xlu0 %v1376_v13 }
 0x310   : > { %1383 = vmax.xlane.f32.xlu0 %v1382_v5 }
 0x377   : > { %v1342_v11 = vpop.xlane.xlu1 %1341 }
 0x378   : > { %v1386_v54 = vsub.f32 %v6293_v63, %v1342_v11 }
 0x379   : > { %v1339_v47 = vpop.xlane.xlu0 %1338 }
 0x37a   : > { %v1385_v12 = vsub.f32 %v6301_v9, %v1339_v47  ;;  %v1403_v55 = vmul.f32 1.442695, %v1386_v54 }
 0x37c   : > { %v1401_v59 = vmul.f32 1.442695, %v1385_v12 }
 0x37d   : > { %v1345_v37 = vpop.xlane.xlu0 %1344 }
 0x37e   : > { %5852 = vpow2.f32 %v1401_v59  ;;  %v1387_v15 = vsub.f32 %v6319_v48, %v1345_v37 }
 0x37f   : > { %5854 = vpow2.f32 %v1403_v55 }
 0x380   : > { %v1405_v17 = vmul.f32 1.442695, %v1387_v15 }
 0x381   : > { %v1351_v23 = vpop.xlane.xlu1 %1350  ;;  %v1348_v21 = vpop.xlane.xlu0 %1347 }
 0x382   : > { %5856 = vpow2.f32 %v1405_v17  ;;  %v1389_v43 = vsub.f32 %v6347_v8, %v1351_v23  ;;  %v1388_v61 = vsub.f32 %v6323_v50, %v1348_v21 }
 0x384   : > { %v1409_v39 = vmul.f32 1.442695, %v1389_v43  ;;  %v1407_v63 = vmul.f32 1.442695, %v1388_v61 }
 0x385   : > { %v1357_v0 = vpop.xlane.xlu1 %1356  ;;  %v1354_v57 = vpop.xlane.xlu0 %1353 }
 0x386   : > { %5858 = vpow2.f32 %v1409_v39  ;;  %v1391_v9 = vsub.f32 %v6368_v52, %v1357_v0  ;;  %v1390_v25 = vsub.f32 %v6353_v7, %v1354_v57 }
 0x387   : > { %5860 = vpow2.f32 %v1407_v63 }
 0x388   : > { %v1413_v48 = vmul.f32 1.442695, %v1391_v9  ;;  %v1411_v29 = vmul.f32 1.442695, %v1390_v25 }
 0x389   : > { %v1363_v41 = vpop.xlane.xlu1 %1362  ;;  %v1360_v53 = vpop.xlane.xlu0 %1359 }
 0x38a   : > { %5862 = vpow2.f32 %v1413_v48  ;;  %v1393_v60 = vsub.f32 %v6388_v6, %v1363_v41  ;;  %v1392_v8 = vsub.f32 %v6374_v27, %v1360_v53 }
 0x38b   : > { %v6464_v50 = vpop.eup %5852  ;;  %5864 = vpow2.f32 %v1411_v29 }
 0x38c   : > { %v6466_v33 = vpop.eup %5854  ;;  %v1417_v56 = vmul.f32 1.442695, %v1393_v60  ;;  %v1415_v62 = vmul.f32 1.442695, %v1392_v8  ;;  %5343 = vmatprep.mubr.msk.f32.mxu0 %vm1336_vm14, %v6464_v50 }
 0x38d   : > { %v1369_v7 = vpop.xlane.xlu1 %1368  ;;  %5344 = vmatmul.mubr.msk.f32.vlgmr.msra.gmra.mxu0 %vm1336_vm14, %v6466_v33  ;;  %v1366_v52 = vpop.xlane.xlu0 %1365 }
 0x38e   : > { %5866 = vpow2.f32 %v1417_v56  ;;  %v1395_v6 = vsub.f32 %v6416_v46, %v1369_v7  ;;  %v1394_v27 = vsub.f32 %v6394_v10, %v1366_v52 }
 0x38f   : > { %v6474_v19 = vpop.eup %5856  ;;  %5868 = vpow2.f32 %v1415_v62 }
 0x390   : > { %v1421_v1 = vmul.f32 1.442695, %v1395_v6  ;;  %v1419_v2 = vmul.f32 1.442695, %v1394_v27  ;;  %5346 = vmatprep.mubr.msk.f32.mxu0 %vm1336_vm14, %v6474_v19 }
 0x391   : > { %v1375_v4 = vpop.xlane.xlu1 %1374  ;;  %v1372_v35 = vpop.xlane.xlu0 %1371 }
 0x392   : > { %5870 = vpow2.f32 %v1421_v1  ;;  %v1397_v13 = vsub.f32 %v6435_v58, %v1375_v4  ;;  %v1396_v49 = vsub.f32 %v6425_v31, %v1372_v35 }
 0x393   : > { %v6480_v5 = vpop.eup %5858  ;;  %5872 = vpow2.f32 %v1419_v2 }
 0x394   : > { %v6482_v46 = vpop.eup %5860  ;;  %v1425_v10 = vmul.f32 1.442695, %v1397_v13  ;;  %v1423_v11 = vmul.f32 1.442695, %v1396_v49 }
 0x395   : > { %5347 = vmatmul.mubr.msk.f32.gmra.mxu0 %vm1336_vm14, %v6482_v46  ;;  %v1381_v54 = vpop.xlane.xlu1 %1380  ;;  %v1378_v47 = vpop.xlane.xlu0 %1377 }
 0x396   : > { %5874 = vpow2.f32 %v1425_v10  ;;  %v1399_v12 = vsub.f32 %v6445_v51, %v1381_v54  ;;  %5349 = vmatprep.mubr.msk.f32.mxu0 %vm1336_vm14, %v6480_v5  ;;  %v1398_v31 = vsub.f32 %v6443_v3, %v1378_v47 }
 0x397   : > { %v6490_v58 = vpop.eup %5862  ;;  %5876 = vpow2.f32 %v1423_v11 }
 0x398   : > { %v6492_v55 = vpop.eup %5864  ;;  %v1429_v59 = vmul.f32 1.442695, %v1399_v12  ;;  %v1427_v37 = vmul.f32 1.442695, %v1398_v31 }
 0x399   : > { %5350 = vmatmul.mubr.msk.f32.gmra.mxu0 %vm1336_vm14, %v6492_v55  ;;  %v1384_v15 = vpop.xlane.xlu0 %1383 }
 0x39a   : > { %5878 = vpow2.f32 %v1429_v59  ;;  %5352 = vmatprep.mubr.msk.f32.mxu0 %vm1336_vm14, %v6490_v58  ;;  %v1400_v51 = vsub.f32 %v6451_v45, %v1384_v15 }
 0x39b   : > { %v6499_v17 = vpop.eup %5866  ;;  %5880 = vpow2.f32 %v1427_v37 }
 0x39c   : > { %v6501_v3 = vpop.eup %5868  ;;  %v1431_v23 = vmul.f32 1.442695, %v1400_v51 }
 0x39d   : > { %5353 = vmatmul.mubr.msk.f32.gmra.mxu0 %vm1336_vm14, %v6501_v3 }
 0x39e   : > { %5882 = vpow2.f32 %v1431_v23  ;;  %5355 = vmatprep.mubr.msk.f32.mxu0 %vm1336_vm14, %v6499_v17 }
 0x39f   : > { %v6507_v21 = vpop.eup %5870 }
 0x3a0   : > { %v6509_v43 = vpop.eup %5872 }
 0x3a1   : > { %5356 = vmatmul.mubr.msk.f32.gmra.mxu0 %vm1336_vm14, %v6509_v43 }
 0x3a2   : > { %5358 = vmatprep.mubr.msk.f32.mxu0 %vm1336_vm14, %v6507_v21 }
 0x3a3   : > { %v6515_v45 = vpop.eup %5874 }
 0x3a4   : > { %v6517_v61 = vpop.eup %5876 }
 0x3a5   : > { %5359 = vmatmul.mubr.msk.f32.gmra.mxu0 %vm1336_vm14, %v6517_v61 }
 0x3a6   : > { %5361 = vmatprep.mubr.msk.f32.mxu0 %vm1336_vm14, %v6515_v45 }
 0x3a7   : > { %v6523_v39 = vpop.eup %5878 }
 0x3a8   : > { %v6525_v63 = vpop.eup %5880 }
 0x3a9   : > { %5362 = vmatmul.mubr.msk.f32.gmra.mxu0 %vm1336_vm14, %v6525_v63 }
 0x3aa   : > { %5364 = vmatprep.mubr.msk.f32.mxu0 %vm1336_vm14, %v6523_v39 }
 0x3ab   : > { %v6531_v0 = vpop.eup %5882 }
 0x3ad   : > { %5365 = vmatmul.mubr.msk.f32.gmra.mxu0 %vm1336_vm14, %v6531_v0 }
 0x44d   : > { %v5345_v57 = vpop.f32.mrf.mxu0 }
 0x44f   : > { %v1547_v9 = vpop.f32.mrf.mxu0 }
 0x450   : > { %5884 = vrcp.f32 %v1547_v9  ;;  %v6585_v9 = vld [vmem:[#allocation2 + $0x290] sm:$0xff] }
 0x451   : > { %5886 = vrcp.f32 %v5345_v57  ;;  %v6582_v57 = vld [vmem:[#allocation2 + $0x2a0] sm:$0xff] }
 0x452   : > { %5393 = vmatprep.subr.mxu0 %v6582_v57 }
 0x453   : > { %5394 = vmatpush3.msra.mxu0 %v6582_v57 }
 0x454   : > { %5395 = vmatprep.subr.mxu0 %v6585_v9 }
 0x455   : > { %v5348_v25 = vpop.f32.mrf.mxu0  ;;  %5396 = vmatpush3.msra.mxu0 %v6585_v9 }
 0x456   : > { %5477 = vmatprep.subr.mxu0 %v6582_v57 }
 0x457   : > { %v1557_v48 = vpop.f32.mrf.mxu0 }
 0x458   : > { %5888 = vrcp.f32 %v1557_v48 }
 0x459   : > { %5890 = vrcp.f32 %v5348_v25  ;;  %v5351_v29 = vpop.f32.mrf.mxu0 }
 0x45b   : > { %v1567_v41 = vpop.f32.mrf.mxu0 }
 0x45c   : > { %5892 = vrcp.f32 %v1567_v41 }
 0x45d   : > { %v5885_v53 = vpop.eup %5884  ;;  %5894 = vrcp.f32 %v5351_v29  ;;  %v5354_v60 = vpop.f32.mrf.mxu0 }
 0x45e   : > { %v5887_v8 = vpop.eup %5886  ;;  %5369 = vmatprep.mubr.msk.f32.mxu1 %vm640_vm2, %v5885_v53 }
 0x45f   : > { %v1577_v56 = vpop.f32.mrf.mxu0  ;;  %5370 = vmatmul.mubr.msk.f32.vlgmr.msra.gmra.mxu1 %vm640_vm2, %v5887_v8 }
 0x460   : > { %5896 = vrcp.f32 %v1577_v56  ;;  %5422 = vmatpush3.msra.mxu1 %v6172_v44 }
 0x461   : > { %5898 = vrcp.f32 %v5354_v60  ;;  %v5357_v62 = vpop.f32.mrf.mxu0  ;;  %5423 = vmatprep.subr.mxu1 %v6168_v42 }
 0x462   : > { %5424 = vmatpush3.msra.mxu1 %v6168_v42 }
 0x463   : > { %v1587_v7 = vpop.f32.mrf.mxu0  ;;  %5425 = vmatprep.subr.mxu1 %v6164_v40 }
 0x464   : > { %5900 = vrcp.f32 %v1587_v7  ;;  %5426 = vmatpush3.msra.mxu1 %v6164_v40 }
 0x465   : > { %v5889_v52 = vpop.eup %5888  ;;  %5902 = vrcp.f32 %v5357_v62  ;;  %v5360_v6 = vpop.f32.mrf.mxu0  ;;  %5427 = vmatprep.subr.mxu1 %v6160_v38 }
 0x466   : > { %v5891_v27 = vpop.eup %5890  ;;  %5372 = vmatprep.mubr.msk.f32.mxu1 %vm640_vm2, %v5889_v52  ;;  %5428 = vmatpush3.msra.mxu1 %v6160_v38 }
 0x467   : > { %v1597_v1 = vpop.f32.mrf.mxu0  ;;  %5373 = vmatmul.mubr.msk.f32.gmra.mxu1 %vm640_vm2, %v5891_v27  ;;  %5429 = vmatprep.subr.mxu1 %v6156_v36 }
 0x468   : > { %5904 = vrcp.f32 %v1597_v1  ;;  %5430 = vmatpush3.msra.mxu1 %v6156_v36 }
 0x469   : > { %v5893_v2 = vpop.eup %5892  ;;  %5906 = vrcp.f32 %v5360_v6  ;;  %v5363_v4 = vpop.f32.mrf.mxu0  ;;  %5431 = vmatprep.subr.mxu1 %v6152_v34 }
 0x46a   : > { %v5895_v35 = vpop.eup %5894  ;;  %5375 = vmatprep.mubr.msk.f32.mxu1 %vm640_vm2, %v5893_v2  ;;  %5432 = vmatpush3.msra.mxu1 %v6152_v34 }
 0x46b   : > { %v1607_v13 = vpop.f32.mrf.mxu0  ;;  %5376 = vmatmul.mubr.msk.f32.gmra.mxu1 %vm640_vm2, %v5895_v35  ;;  %5433 = vmatprep.subr.mxu1 %v6148_v32 }
 0x46c   : > { %5908 = vrcp.f32 %v1607_v13  ;;  %5434 = vmatpush3.msra.mxu1 %v6148_v32 }
 0x46d   : > { %v5897_v49 = vpop.eup %5896  ;;  %5910 = vrcp.f32 %v5363_v4  ;;  %v5366_v10 = vpop.f32.mrf.mxu0  ;;  %5435 = vmatprep.subr.mxu1 %v6144_v30 }
 0x46e   : > { %v5899_v11 = vpop.eup %5898  ;;  %5378 = vmatprep.mubr.msk.f32.mxu1 %vm640_vm2, %v5897_v49  ;;  %5436 = vmatpush3.msra.mxu1 %v6144_v30 }
 0x46f   : > { %v1617_v54 = vpop.f32.mrf.mxu0  ;;  %5379 = vmatmul.mubr.msk.f32.gmra.mxu1 %vm640_vm2, %v5899_v11  ;;  %5437 = vmatprep.subr.mxu1 %v6140_v28 }
 0x470   : > { %5912 = vrcp.f32 %v1617_v54  ;;  %5438 = vmatpush3.msra.mxu1 %v6140_v28 }
 0x471   : > { %v5901_v47 = vpop.eup %5900  ;;  %5914 = vrcp.f32 %v5366_v10  ;;  %5439 = vmatprep.subr.mxu1 %v6136_v26 }
 0x472   : > { %v5903_v12 = vpop.eup %5902  ;;  %5381 = vmatprep.mubr.msk.f32.mxu1 %vm640_vm2, %v5901_v47  ;;  %5440 = vmatpush3.msra.mxu1 %v6136_v26 }
 0x473   : > { %5382 = vmatmul.mubr.msk.f32.gmra.mxu1 %vm640_vm2, %v5903_v12  ;;  %5441 = vmatprep.subr.mxu1 %v6132_v24 }
 0x474   : > { %5442 = vmatpush3.msra.mxu1 %v6132_v24 }
 0x475   : > { %v5905_v31 = vpop.eup %5904  ;;  %5443 = vmatprep.subr.mxu1 %v6128_v22 }
 0x476   : > { %v5907_v59 = vpop.eup %5906  ;;  %5384 = vmatprep.mubr.msk.f32.mxu1 %vm640_vm2, %v5905_v31  ;;  %5444 = vmatpush3.msra.mxu1 %v6128_v22 }
 0x477   : > { %5385 = vmatmul.mubr.msk.f32.gmra.mxu1 %vm640_vm2, %v5907_v59  ;;  %5445 = vmatprep.subr.mxu1 %v6124_v20 }
 0x478   : > { %5446 = vmatpush3.msra.mxu1 %v6124_v20 }
 0x479   : > { %v5909_v37 = vpop.eup %5908  ;;  %5447 = vmatprep.subr.mxu1 %v6120_v18 }
 0x47a   : > { %v5911_v15 = vpop.eup %5910  ;;  %5387 = vmatprep.mubr.msk.f32.mxu1 %vm640_vm2, %v5909_v37  ;;  %5448 = vmatpush3.msra.mxu1 %v6120_v18 }
 0x47b   : > { %5388 = vmatmul.mubr.msk.f32.gmra.mxu1 %vm640_vm2, %v5911_v15  ;;  %5449 = vmatprep.subr.mxu1 %v6116_v16 }
 0x47c   : > { %5450 = vmatpush3.msra.mxu1 %v6116_v16 }
 0x47d   : > { %v5913_v51 = vpop.eup %5912  ;;  %5451 = vmatprep.subr.mxu1 %v6112_v14 }
 0x47e   : > { %v5915_v23 = vpop.eup %5914  ;;  %5390 = vmatprep.mubr.msk.f32.mxu1 %vm640_vm2, %v5913_v51  ;;  %5452 = vmatpush3.msra.mxu1 %v6112_v14 }
 0x47f   : > { %5391 = vmatmul.mubr.msk.f32.gmra.mxu1 %vm640_vm2, %v5915_v23  ;;  %vm1851_vm2 = vcmask 130048  }
 0x51f   : > { %v5371_v25 = vpop.f32.mrf.mxu1 }
 0x520   : > { %v6592_v48 = vmul.f32 %v6466_v33, %v5371_v25 }
 0x521   : > { %v1756_v29 = vpop.f32.mrf.mxu1 }
 0x522   : > { %v6595_v41 = vmul.f32 %v6464_v50, %v1756_v29  ;;  %2208 = vrot.lane.b32.xlu0 %v6592_v48, %s6011_s21 }
 0x524   : > { %2206 = vrot.lane.b32.xlu1 %v6595_v41, %s6011_s21  ;;  %5397 = vmatprep.mubr.msk.f32.mxu0 %vm1851_vm2, %v6595_v41 }
 0x525   : > { %5398 = vmatmul.mubr.msk.f32.vlgmr.msra.gmra.mxu0 %vm1851_vm2, %v6592_v48 }
 0x526   : > { %5478 = vmatpush3.msra.mxu0 %v6582_v57 }
 0x527   : > { %v5374_v33 = vpop.f32.mrf.mxu1  ;;  %5479 = vmatprep.subr.mxu0 %v6585_v9 }
 0x528   : > { %5480 = vmatpush3.msra.mxu0 %v6585_v9  ;;  %v6613_v60 = vmul.f32 %v6482_v46, %v5374_v33 }
 0x529   : > { %v1766_v50 = vpop.f32.mrf.mxu1  ;;  %5561 = vmatprep.subr.mxu0 %v6582_v57 }
 0x52a   : > { %v6610_v53 = vmul.f32 %v6474_v19, %v1766_v50 }
 0x52b   : > { %v5377_v8 = vpop.f32.mrf.mxu1 }
 0x52c   : > { %2210 = vrot.lane.b32.xlu1 %v6610_v53, %s6011_s21  ;;  %5400 = vmatprep.mubr.msk.f32.mxu0 %vm1851_vm2, %v6610_v53  ;;  %v6625_v19 = vmul.f32 %v6492_v55, %v5377_v8 }
 0x52d   : > { %v1776_v56 = vpop.f32.mrf.mxu1  ;;  %5401 = vmatmul.mubr.msk.f32.gmra.mxu0 %vm1851_vm2, %v6613_v60 }
 0x52e   : > { %v6622_v62 = vmul.f32 %v6480_v5, %v1776_v56 }
 0x52f   : > { %v5380_v7 = vpop.f32.mrf.mxu1 }
 0x530   : > { %2212 = vrot.lane.b32.xlu1 %v6613_v60, %s6011_s21  ;;  %2214 = vrot.lane.b32.xlu0 %v6622_v62, %s6011_s21  ;;  %v1842_v55 = vmul.f32 %v6501_v3, %v5380_v7 }
 0x531   : > { %5403 = vmatprep.mubr.msk.f32.mxu0 %vm1851_vm2, %v6622_v62  ;;  %v1786_v46 = vpop.f32.mrf.mxu1 }
 0x532   : > { %v6634_v52 = vmul.f32 %v6490_v58, %v1786_v46  ;;  %5404 = vmatmul.mubr.msk.f32.gmra.mxu0 %vm1851_vm2, %v6625_v19 }
 0x533   : > { %v5383_v5 = vpop.f32.mrf.mxu1 }
 0x534   : > { %2216 = vrot.lane.b32.xlu1 %v6625_v19, %s6011_s21  ;;  %2218 = vrot.lane.b32.xlu0 %v6634_v52, %s6011_s21  ;;  %v1844_v1 = vmul.f32 %v6509_v43, %v5383_v5 }
 0x535   : > { %5406 = vmatprep.mubr.msk.f32.mxu0 %vm1851_vm2, %v6634_v52  ;;  %v1796_v6 = vpop.f32.mrf.mxu1 }
 0x536   : > { %v1843_v27 = vmul.f32 %v6499_v17, %v1796_v6  ;;  %5407 = vmatmul.mubr.msk.f32.gmra.mxu0 %vm1851_vm2, %v1842_v55 }
 0x537   : > { %v5386_v58 = vpop.f32.mrf.mxu1 }
 0x538   : > { %2220 = vrot.lane.b32.xlu1 %v1842_v55, %s6011_s21  ;;  %2222 = vrot.lane.b32.xlu0 %v1843_v27, %s6011_s21  ;;  %v1846_v35 = vmul.f32 %v6517_v61, %v5386_v58 }
 0x539   : > { %5409 = vmatprep.mubr.msk.f32.mxu0 %vm1851_vm2, %v1843_v27  ;;  %v1806_v3 = vpop.f32.mrf.mxu1 }
 0x53a   : > { %v1845_v2 = vmul.f32 %v6507_v21, %v1806_v3  ;;  %5410 = vmatmul.mubr.msk.f32.gmra.mxu0 %vm1851_vm2, %v1844_v1  ;;  %v6856_v3 = vld [vmem:[#allocation2 + $0x1c0] sm:$0xff] }
 0x53b   : > { %v5389_v4 = vpop.f32.mrf.mxu1 }
 0x53c   : > { %2224 = vrot.lane.b32.xlu1 %v1844_v1, %s6011_s21  ;;  %2226 = vrot.lane.b32.xlu0 %v1845_v2, %s6011_s21  ;;  %v1848_v49 = vmul.f32 %v6525_v63, %v5389_v4 }
 0x53d   : > { %5412 = vmatprep.mubr.msk.f32.mxu0 %vm1851_vm2, %v1845_v2  ;;  %v1816_v17 = vpop.f32.mrf.mxu1 }
 0x53e   : > { %v1847_v43 = vmul.f32 %v6515_v45, %v1816_v17  ;;  %5413 = vmatmul.mubr.msk.f32.gmra.mxu0 %vm1851_vm2, %v1846_v35 }
 0x53f   : > { %v5392_v13 = vpop.f32.mrf.mxu1 }
 0x540   : > { %2228 = vrot.lane.b32.xlu1 %v1846_v35, %s6011_s21  ;;  %2230 = vrot.lane.b32.xlu0 %v1847_v43, %s6011_s21  ;;  %v1850_v10 = vmul.f32 %v6531_v0, %v5392_v13  ;;  %v6861_v13 = vld [vmem:[#allocation2 + $0x1d0] sm:$0xff] }
 0x541   : > { %5415 = vmatprep.mubr.msk.f32.mxu0 %vm1851_vm2, %v1847_v43  ;;  %v1826_v21 = vpop.f32.mrf.mxu1 }
 0x542   : > { %v1849_v61 = vmul.f32 %v6523_v39, %v1826_v21  ;;  %5416 = vmatmul.mubr.msk.f32.gmra.mxu0 %vm1851_vm2, %v1848_v49  ;;  %v6864_v21 = vld [vmem:[#allocation2 + $0x1e0] sm:$0xff] }
 0x544   : > { %2232 = vrot.lane.b32.xlu1 %v1848_v49, %s6011_s21  ;;  %2234 = vrot.lane.b32.xlu0 %v1849_v61, %s6011_s21 }
 0x545   : > { %5418 = vmatprep.mubr.msk.f32.mxu0 %vm1851_vm2, %v1849_v61 }
 0x546   : > { %5419 = vmatmul.mubr.msk.f32.gmra.mxu0 %vm1851_vm2, %v1850_v10 }
 0x548   : > { %2236 = vrot.lane.b32.xlu1 %v1850_v10, %s6011_s21  ;;  %2640 = vrot.lane.b32.xlu0 %v6595_v41, %s6012_s22 }
 0x54c   : > { %2642 = vrot.lane.b32.xlu1 %v6592_v48, %s6012_s22  ;;  %2644 = vrot.lane.b32.xlu0 %v6610_v53, %s6012_s22 }
 0x550   : > { %2646 = vrot.lane.b32.xlu1 %v6613_v60, %s6012_s22  ;;  %2648 = vrot.lane.b32.xlu0 %v6622_v62, %s6012_s22 }
 0x554   : > { %2650 = vrot.lane.b32.xlu1 %v6625_v19, %s6012_s22  ;;  %2652 = vrot.lane.b32.xlu0 %v6634_v52, %s6012_s22 }
 0x558   : > { %2654 = vrot.lane.b32.xlu1 %v1842_v55, %s6012_s22  ;;  %2656 = vrot.lane.b32.xlu0 %v1843_v27, %s6012_s22 }
 0x55c   : > { %2658 = vrot.lane.b32.xlu1 %v1844_v1, %s6012_s22  ;;  %2660 = vrot.lane.b32.xlu0 %v1845_v2, %s6012_s22 }
 0x560   : > { %2662 = vrot.lane.b32.xlu1 %v1846_v35, %s6012_s22  ;;  %2664 = vrot.lane.b32.xlu0 %v1847_v43, %s6012_s22 }
 0x564   : > { %2666 = vrot.lane.b32.xlu1 %v1848_v49, %s6012_s22  ;;  %2668 = vrot.lane.b32.xlu0 %v1849_v61, %s6012_s22 }
 0x568   : > { %2670 = vrot.lane.b32.xlu1 %v1850_v10, %s6012_s22  ;;  %3058 = vrot.lane.b32.xlu0 %v6595_v41, %s6013_s23 }
 0x56c   : > { %3060 = vrot.lane.b32.xlu1 %v6592_v48, %s6013_s23  ;;  %3062 = vrot.lane.b32.xlu0 %v6610_v53, %s6013_s23 }
 0x570   : > { %3064 = vrot.lane.b32.xlu1 %v6613_v60, %s6013_s23  ;;  %3066 = vrot.lane.b32.xlu0 %v6622_v62, %s6013_s23 }
 0x574   : > { %3068 = vrot.lane.b32.xlu1 %v6625_v19, %s6013_s23  ;;  %3070 = vrot.lane.b32.xlu0 %v6634_v52, %s6013_s23  ;;  %v6840_v19 = vld [vmem:[#allocation2 + $0x190] sm:$0xff] }
 0x578   : > { %3072 = vrot.lane.b32.xlu1 %v1842_v55, %s6013_s23  ;;  %3074 = vrot.lane.b32.xlu0 %v1843_v27, %s6013_s23 }
 0x57c   : > { %3076 = vrot.lane.b32.xlu1 %v1844_v1, %s6013_s23  ;;  %3078 = vrot.lane.b32.xlu0 %v1845_v2, %s6013_s23 }
 0x580   : > { %3080 = vrot.lane.b32.xlu1 %v1846_v35, %s6013_s23  ;;  %3082 = vrot.lane.b32.xlu0 %v1847_v43, %s6013_s23 }
 0x584   : > { %3084 = vrot.lane.b32.xlu1 %v1848_v49, %s6013_s23  ;;  %3086 = vrot.lane.b32.xlu0 %v1849_v61, %s6013_s23 }
 0x588   : > { %3088 = vrot.lane.b32.xlu1 %v1850_v10, %s6013_s23  ;;  %2477 = vrot.lane.b32.xlu0 %v6172_v44, %s6012_s22 }
 0x58c   : > { %2475 = vrot.lane.b32.xlu1 %v6168_v42, %s6012_s22  ;;  %2473 = vrot.lane.b32.xlu0 %v6164_v40, %s6012_s22 }
 0x590   : > { %2471 = vrot.lane.b32.xlu1 %v6160_v38, %s6012_s22  ;;  %2469 = vrot.lane.b32.xlu0 %v6156_v36, %s6012_s22 }
 0x594   : > { %2467 = vrot.lane.b32.xlu1 %v6152_v34, %s6012_s22  ;;  %2465 = vrot.lane.b32.xlu0 %v6148_v32, %s6012_s22  ;;  %v2209_v39 = vpop.permute.xlu0 %2208 }
 0x596   : > { %v2207_v45 = vpop.permute.xlu1 %2206 }
 0x597   : > { %5481 = vmatprep.mubr.msk.f32.mxu0 %vm1851_vm2, %v2207_v45 }
 0x598   : > { %2463 = vrot.lane.b32.xlu1 %v6144_v30, %s6012_s22  ;;  %2461 = vrot.lane.b32.xlu0 %v6140_v28, %s6012_s22 }
 0x599   : > { %5482 = vmatmul.mubr.msk.f32.vlgmr.msra.gmra.mxu0 %vm1851_vm2, %v2209_v39 }
 0x59a   : > { %5562 = vmatpush3.msra.mxu0 %v6582_v57 }
 0x59b   : > { %5563 = vmatprep.subr.mxu0 %v6585_v9 }
 0x59c   : > { %2459 = vrot.lane.b32.xlu1 %v6136_v26, %s6012_s22  ;;  %2457 = vrot.lane.b32.xlu0 %v6132_v24, %s6012_s22 }
 0x59d   : > { %5564 = vmatpush3.msra.mxu0 %v6585_v9 }
 0x59e   : > { %v2211_v63 = vpop.permute.xlu1 %2210  ;;  %5645 = vmatprep.subr.mxu0 %v6582_v57 }
 0x59f   : > { %5484 = vmatprep.mubr.msk.f32.mxu0 %vm1851_vm2, %v2211_v63 }
 0x5a0   : > { %2455 = vrot.lane.b32.xlu1 %v6128_v22, %s6012_s22  ;;  %2453 = vrot.lane.b32.xlu0 %v6124_v20, %s6012_s22 }
 0x5a2   : > { %v2213_v0 = vpop.permute.xlu1 %2212  ;;  %v2215_v11 = vpop.permute.xlu0 %2214 }
 0x5a3   : > { %5485 = vmatmul.mubr.msk.f32.gmra.mxu0 %vm1851_vm2, %v2213_v0  ;;  %v6869_v0 = vld [vmem:[#allocation2 + $0x1f0] sm:$0xff] }
 0x5a4   : > { %2451 = vrot.lane.b32.xlu1 %v6120_v18, %s6012_s22  ;;  %2449 = vrot.lane.b32.xlu0 %v6116_v16, %s6012_s22 }
 0x5a5   : > { %5487 = vmatprep.mubr.msk.f32.mxu0 %vm1851_vm2, %v2215_v11 }
 0x5a6   : > { %v2217_v54 = vpop.permute.xlu1 %2216  ;;  %v2219_v47 = vpop.permute.xlu0 %2218 }
 0x5a7   : > { %5488 = vmatmul.mubr.msk.f32.gmra.mxu0 %vm1851_vm2, %v2217_v54  ;;  %v6872_v54 = vld [vmem:[#allocation2 + $0x200] sm:$0xff] }
 0x5a8   : > { %2447 = vrot.lane.b32.xlu1 %v6112_v14, %s6012_s22  ;;  %2895 = vrot.lane.b32.xlu0 %v6172_v44, %s6014_s24 }
 0x5a9   : > { %5490 = vmatprep.mubr.msk.f32.mxu0 %vm1851_vm2, %v2219_v47 }
 0x5aa   : > { %v2221_v12 = vpop.permute.xlu1 %2220  ;;  %v2223_v31 = vpop.permute.xlu0 %2222 }
 0x5ab   : > { %5491 = vmatmul.mubr.msk.f32.gmra.mxu0 %vm1851_vm2, %v2221_v12 }
 0x5ac   : > { %2893 = vrot.lane.b32.xlu1 %v6168_v42, %s6014_s24  ;;  %2891 = vrot.lane.b32.xlu0 %v6164_v40, %s6014_s24 }
 0x5ad   : > { %5493 = vmatprep.mubr.msk.f32.mxu0 %vm1851_vm2, %v2223_v31 }
 0x5ae   : > { %v2225_v59 = vpop.permute.xlu1 %2224  ;;  %v2227_v37 = vpop.permute.xlu0 %2226 }
 0x5af   : > { %5494 = vmatmul.mubr.msk.f32.gmra.mxu0 %vm1851_vm2, %v2225_v59 }
 0x5b0   : > { %2889 = vrot.lane.b32.xlu1 %v6160_v38, %s6014_s24  ;;  %2887 = vrot.lane.b32.xlu0 %v6156_v36, %s6014_s24 }
 0x5b1   : > { %5496 = vmatprep.mubr.msk.f32.mxu0 %vm1851_vm2, %v2227_v37 }
 0x5b2   : > { %v2229_v15 = vpop.permute.xlu1 %2228  ;;  %v2231_v51 = vpop.permute.xlu0 %2230 }
 0x5b3   : > { %5497 = vmatmul.mubr.msk.f32.gmra.mxu0 %vm1851_vm2, %v2229_v15  ;;  %v6876_v15 = vld [vmem:[#allocation2 + $0x210] sm:$0xff] }
 0x5b4   : > { %2885 = vrot.lane.b32.xlu1 %v6152_v34, %s6014_s24  ;;  %2883 = vrot.lane.b32.xlu0 %v6148_v32, %s6014_s24 }
 0x5b5   : > { %5499 = vmatprep.mubr.msk.f32.mxu0 %vm1851_vm2, %v2231_v51 }
 0x5b6   : > { %v2233_v23 = vpop.permute.xlu1 %2232  ;;  %v2235_v25 = vpop.permute.xlu0 %2234 }
 0x5b7   : > { %5500 = vmatmul.mubr.msk.f32.gmra.mxu0 %vm1851_vm2, %v2233_v23  ;;  %v6879_v23 = vld [vmem:[#allocation2 + $0x220] sm:$0xff] }
 0x5b8   : > { %2881 = vrot.lane.b32.xlu1 %v6144_v30, %s6014_s24  ;;  %2879 = vrot.lane.b32.xlu0 %v6140_v28, %s6014_s24 }
 0x5b9   : > { %5502 = vmatprep.mubr.msk.f32.mxu0 %vm1851_vm2, %v2235_v25 }
 0x5ba   : > { %v2237_v48 = vpop.permute.xlu1 %2236  ;;  %v2641_v29 = vpop.permute.xlu0 %2640 }
 0x5bb   : > { %5503 = vmatmul.mubr.msk.f32.gmra.mxu0 %vm1851_vm2, %v2237_v48 }
 0x5bc   : > { %2877 = vrot.lane.b32.xlu1 %v6136_v26, %s6014_s24  ;;  %2875 = vrot.lane.b32.xlu0 %v6132_v24, %s6014_s24 }
 0x5bd   : > { %5565 = vmatprep.mubr.msk.f32.mxu0 %vm1851_vm2, %v2641_v29 }
 0x5be   : > { %v2643_v41 = vpop.permute.xlu1 %2642  ;;  %v2645_v33 = vpop.permute.xlu0 %2644 }
 0x5bf   : > { %5566 = vmatmul.mubr.msk.f32.vlgmr.msra.gmra.mxu0 %vm1851_vm2, %v2643_v41 }
 0x5c0   : > { %2873 = vrot.lane.b32.xlu1 %v6128_v22, %s6014_s24  ;;  %2871 = vrot.lane.b32.xlu0 %v6124_v20, %s6014_s24 }
 0x5c1   : > { %5568 = vmatprep.mubr.msk.f32.mxu0 %vm1851_vm2, %v2645_v33  ;;  %5646 = vmatpush3.msra.mxu0 %v6582_v57 }
 0x5c2   : > { %v2647_v50 = vpop.permute.xlu1 %2646  ;;  %v2649_v53 = vpop.permute.xlu0 %2648  ;;  %5647 = vmatprep.subr.mxu0 %v6585_v9 }
 0x5c3   : > { %5569 = vmatmul.mubr.msk.f32.gmra.mxu0 %vm1851_vm2, %v2647_v50  ;;  %v6882_v50 = vld [vmem:[#allocation2 + $0x230] sm:$0xff] }
 0x5c4   : > { %2869 = vrot.lane.b32.xlu1 %v6120_v18, %s6014_s24  ;;  %2867 = vrot.lane.b32.xlu0 %v6116_v16, %s6014_s24 }
 0x5c5   : > { %5571 = vmatprep.mubr.msk.f32.mxu0 %vm1851_vm2, %v2649_v53  ;;  %5648 = vmatpush3.msra.mxu0 %v6585_v9 }
 0x5c6   : > { %v2651_v60 = vpop.permute.xlu1 %2650  ;;  %v2653_v8 = vpop.permute.xlu0 %2652 }
 0x5c7   : > { %5572 = vmatmul.mubr.msk.f32.gmra.mxu0 %vm1851_vm2, %v2651_v60  ;;  %v6885_v60 = vld [vmem:[#allocation2 + $0x240] sm:$0xff] }
 0x5c8   : > { %2865 = vrot.lane.b32.xlu1 %v6112_v14, %s6014_s24  ;;  %3313 = vrot.lane.b32.xlu0 %v6172_v44, %s6015_s25 }
 0x5c9   : > { %5574 = vmatprep.mubr.msk.f32.mxu0 %vm1851_vm2, %v2653_v8 }
 0x5ca   : > { %v2655_v57 = vpop.permute.xlu1 %2654  ;;  %v2657_v56 = vpop.permute.xlu0 %2656 }
 0x5cb   : > { %5575 = vmatmul.mubr.msk.f32.gmra.mxu0 %vm1851_vm2, %v2655_v57 }
 0x5cc   : > { %3311 = vrot.lane.b32.xlu1 %v6168_v42, %s6015_s25  ;;  %3309 = vrot.lane.b32.xlu0 %v6164_v40, %s6015_s25 }
 0x5cd   : > { %5577 = vmatprep.mubr.msk.f32.mxu0 %vm1851_vm2, %v2657_v56 }
 0x5ce   : > { %v2659_v9 = vpop.permute.xlu1 %2658  ;;  %v2661_v62 = vpop.permute.xlu0 %2660 }
 0x5cf   : > { %5578 = vmatmul.mubr.msk.f32.gmra.mxu0 %vm1851_vm2, %v2659_v9 }
 0x5d0   : > { %3307 = vrot.lane.b32.xlu1 %v6160_v38, %s6015_s25  ;;  %3305 = vrot.lane.b32.xlu0 %v6156_v36, %s6015_s25 }
 0x5d1   : > { %5580 = vmatprep.mubr.msk.f32.mxu0 %vm1851_vm2, %v2661_v62 }
 0x5d2   : > { %v2663_v44 = vpop.permute.xlu1 %2662  ;;  %v2665_v7 = vpop.permute.xlu0 %2664 }
 0x5d3   : > { %5581 = vmatmul.mubr.msk.f32.gmra.mxu0 %vm1851_vm2, %v2663_v44  ;;  %v6888_v44 = vld [vmem:[#allocation2 + $0x250] sm:$0xff] }
 0x5d4   : > { %3303 = vrot.lane.b32.xlu1 %v6152_v34, %s6015_s25  ;;  %3301 = vrot.lane.b32.xlu0 %v6148_v32, %s6015_s25 }
 0x5d5   : > { %5583 = vmatprep.mubr.msk.f32.mxu0 %vm1851_vm2, %v2665_v7 }
 0x5d6   : > { %v2667_v40 = vpop.permute.xlu1 %2666  ;;  %v2669_v42 = vpop.permute.xlu0 %2668 }
 0x5d7   : > { %5584 = vmatmul.mubr.msk.f32.gmra.mxu0 %vm1851_vm2, %v2667_v40  ;;  %v6891_v40 = vld [vmem:[#allocation2 + $0x260] sm:$0xff] }
 0x5d8   : > { %3299 = vrot.lane.b32.xlu1 %v6144_v30, %s6015_s25  ;;  %3297 = vrot.lane.b32.xlu0 %v6140_v28, %s6015_s25 }
 0x5d9   : > { %5586 = vmatprep.mubr.msk.f32.mxu0 %vm1851_vm2, %v2669_v42 }
 0x5da   : > { %v2671_v36 = vpop.permute.xlu1 %2670  ;;  %v3059_v38 = vpop.permute.xlu0 %3058 }
 0x5db   : > { %5587 = vmatmul.mubr.msk.f32.gmra.mxu0 %vm1851_vm2, %v2671_v36 }
 0x5dc   : > { %3295 = vrot.lane.b32.xlu1 %v6136_v26, %s6015_s25  ;;  %3293 = vrot.lane.b32.xlu0 %v6132_v24, %s6015_s25 }
 0x5dd   : > { %5649 = vmatprep.mubr.msk.f32.mxu0 %vm1851_vm2, %v3059_v38 }
 0x5de   : > { %v3061_v32 = vpop.permute.xlu1 %3060  ;;  %v3063_v34 = vpop.permute.xlu0 %3062 }
 0x5df   : > { %5650 = vmatmul.mubr.msk.f32.vlgmr.msra.gmra.mxu0 %vm1851_vm2, %v3061_v32 }
 0x5e0   : > { %3291 = vrot.lane.b32.xlu1 %v6128_v22, %s6015_s25  ;;  %3289 = vrot.lane.b32.xlu0 %v6124_v20, %s6015_s25 }
 0x5e1   : > { %5652 = vmatprep.mubr.msk.f32.mxu0 %vm1851_vm2, %v3063_v34 }
 0x5e2   : > { %v3065_v28 = vpop.permute.xlu1 %3064  ;;  %v3067_v30 = vpop.permute.xlu0 %3066 }
 0x5e3   : > { %5653 = vmatmul.mubr.msk.f32.gmra.mxu0 %vm1851_vm2, %v3065_v28  ;;  %v6894_v28 = vld [vmem:[#allocation2 + $0x270] sm:$0xff] }
 0x5e4   : > { %3287 = vrot.lane.b32.xlu1 %v6120_v18, %s6015_s25  ;;  %3285 = vrot.lane.b32.xlu0 %v6116_v16, %s6015_s25  ;;  %v6846_v18 = vld [vmem:[#allocation2 + $0x1a0] sm:$0xff] }
 0x5e5   : > { %5655 = vmatprep.mubr.msk.f32.mxu0 %vm1851_vm2, %v3067_v30  ;;  %v5399_v24 = vpop.f32.mrf.mxu0 }
 0x5e6   : > { %v3069_v26 = vpop.permute.xlu1 %3068  ;;  %v3071_v22 = vpop.permute.xlu0 %3070  ;;  %v2046_v16 = vmul.f32 %v6846_v18, %v5399_v24  ;;  %v6897_v24 = vld [vmem:[#allocation2 + $0x280] sm:$0xff] }
 0x5e7   : > { %5656 = vmatmul.mubr.msk.f32.gmra.mxu0 %vm1851_vm2, %v3069_v26  ;;  %v1966_v20 = vpop.f32.mrf.mxu0 }
 0x5e8   : > { %v2045_v46 = vmul.f32 %v6840_v19, %v1966_v20  ;;  %3283 = vrot.lane.b32.xlu1 %v6112_v14, %s6015_s25  ;;  %5658 = vmatprep.mubr.msk.f32.mxu0 %vm1851_vm2, %v3071_v22  ;;  %v6852_v14 = vld [vmem:[#allocation2 + $0x1b0] sm:$0xff] }
 0x5ea   : > { %v3073_v52 = vpop.permute.xlu1 %3072  ;;  %v3075_v5 = vpop.permute.xlu0 %3074  ;;  %5453 = vmatprep.mubr.f32.mxu1 %v2045_v46 }
 0x5eb   : > { %5659 = vmatmul.mubr.msk.f32.gmra.mxu0 %vm1851_vm2, %v3073_v52  ;;  %5454 = vmatmul.mubr.f32.vlgmr.msra.gmra.mxu1 %v2046_v16 }
 0x5ec   : > { %5661 = vmatprep.mubr.msk.f32.mxu0 %vm1851_vm2, %v3075_v5 }
 0x5ed   : > { %v5402_v55 = vpop.f32.mrf.mxu0 }
 0x5ee   : > { %v3077_v6 = vpop.permute.xlu1 %3076  ;;  %v3079_v27 = vpop.permute.xlu0 %3078  ;;  %v2048_v2 = vmul.f32 %v6856_v3, %v5402_v55 }
 0x5ef   : > { %v1976_v58 = vpop.f32.mrf.mxu0  ;;  %5662 = vmatmul.mubr.msk.f32.gmra.mxu0 %vm1851_vm2, %v3077_v6 }
 0x5f0   : > { %v2047_v1 = vmul.f32 %v6852_v14, %v1976_v58  ;;  %5664 = vmatprep.mubr.msk.f32.mxu0 %vm1851_vm2, %v3079_v27 }
 0x5f2   : > { %v5405_v4 = vpop.f32.mrf.mxu0  ;;  %5456 = vmatprep.mubr.f32.mxu1 %v2047_v1  ;;  %v3081_v35 = vpop.permute.xlu1 %3080 }
 0x5f3   : > { %v3083_v17 = vpop.permute.xlu0 %3082  ;;  %5457 = vmatmul.mubr.f32.gmra.mxu1 %v2048_v2  ;;  %5665 = vmatmul.mubr.msk.f32.gmra.mxu0 %vm1851_vm2, %v3081_v35  ;;  %v2050_v61 = vmul.f32 %v6864_v21, %v5405_v4 }
 0x5f4   : > { %v1986_v43 = vpop.f32.mrf.mxu0  ;;  %5667 = vmatprep.mubr.msk.f32.mxu0 %vm1851_vm2, %v3083_v17 }
 0x5f5   : > { %v2049_v49 = vmul.f32 %v6861_v13, %v1986_v43 }
 0x5f6   : > { %v5408_v10 = vpop.f32.mrf.mxu0  ;;  %v3085_v45 = vpop.permute.xlu1 %3084 }
 0x5f7   : > { %5459 = vmatprep.mubr.f32.mxu1 %v2049_v49  ;;  %v3087_v39 = vpop.permute.xlu0 %3086  ;;  %5668 = vmatmul.mubr.msk.f32.gmra.mxu0 %vm1851_vm2, %v3085_v45  ;;  %v2052_v47 = vmul.f32 %v6872_v54, %v5408_v10 }
 0x5f8   : > { %v1996_v63 = vpop.f32.mrf.mxu0  ;;  %5460 = vmatmul.mubr.f32.gmra.mxu1 %v2050_v61  ;;  %5670 = vmatprep.mubr.msk.f32.mxu0 %vm1851_vm2, %v3087_v39 }
 0x5f9   : > { %v2051_v11 = vmul.f32 %v6869_v0, %v1996_v63 }
 0x5fa   : > { %v5411_v12 = vpop.f32.mrf.mxu0  ;;  %v3089_v31 = vpop.permute.xlu1 %3088 }
 0x5fb   : > { %5462 = vmatprep.mubr.f32.mxu1 %v2051_v11  ;;  %v2478_v59 = vpop.permute.xlu0 %2477  ;;  %5671 = vmatmul.mubr.msk.f32.gmra.mxu0 %vm1851_vm2, %v3089_v31  ;;  %v2054_v25 = vmul.f32 %v6879_v23, %v5411_v12 }
 0x5fc   : > { %v2006_v37 = vpop.f32.mrf.mxu0  ;;  %5463 = vmatmul.mubr.f32.gmra.mxu1 %v2052_v47  ;;  %5505 = vmatprep.subr.mxu1 %v2478_v59 }
 0x5fd   : > { %v2053_v51 = vmul.f32 %v6876_v15, %v2006_v37  ;;  %5506 = vmatpush3.msra.mxu1 %v2478_v59 }
 0x5fe   : > { %v5414_v48 = vpop.f32.mrf.mxu0  ;;  %v2476_v29 = vpop.permute.xlu1 %2475 }
 0x5ff   : > { %5465 = vmatprep.mubr.f32.mxu1 %v2053_v51  ;;  %v2474_v41 = vpop.permute.xlu0 %2473  ;;  %5507 = vmatprep.subr.mxu1 %v2476_v29  ;;  %v2056_v8 = vmul.f32 %v6885_v60, %v5414_v48 }
 0x600   : > { %v2016_v33 = vpop.f32.mrf.mxu0  ;;  %5466 = vmatmul.mubr.f32.gmra.mxu1 %v2054_v25 }
 0x601   : > { %v2055_v53 = vmul.f32 %v6882_v50, %v2016_v33  ;;  %5508 = vmatpush3.msra.mxu1 %v2476_v29 }
 0x602   : > { %v5417_v57 = vpop.f32.mrf.mxu0  ;;  %5509 = vmatprep.subr.mxu1 %v2474_v41  ;;  %v2472_v56 = vpop.permute.xlu1 %2471 }
 0x603   : > { %5468 = vmatprep.mubr.f32.mxu1 %v2055_v53  ;;  %5510 = vmatpush3.msra.mxu1 %v2474_v41  ;;  %v2470_v9 = vpop.permute.xlu0 %2469  ;;  %v2058_v42 = vmul.f32 %v6891_v40, %v5417_v57 }
 0x604   : > { %v2026_v62 = vpop.f32.mrf.mxu0  ;;  %5469 = vmatmul.mubr.f32.gmra.mxu1 %v2056_v8  ;;  %5511 = vmatprep.subr.mxu1 %v2472_v56 }
 0x605   : > { %v2057_v7 = vmul.f32 %v6888_v44, %v2026_v62  ;;  %5512 = vmatpush3.msra.mxu1 %v2472_v56 }
 0x606   : > { %v5420_v36 = vpop.f32.mrf.mxu0  ;;  %5513 = vmatprep.subr.mxu1 %v2470_v9  ;;  %v2468_v38 = vpop.permute.xlu1 %2467 }
 0x607   : > { %5471 = vmatprep.mubr.f32.mxu1 %v2057_v7  ;;  %5514 = vmatpush3.msra.mxu1 %v2470_v9  ;;  %v2466_v32 = vpop.permute.xlu0 %2465  ;;  %v2060_v26 = vmul.f32 %v6897_v24, %v5420_v36 }
 0x608   : > { %v2036_v34 = vpop.f32.mrf.mxu0  ;;  %5472 = vmatmul.mubr.f32.gmra.mxu1 %v2058_v42  ;;  %5515 = vmatprep.subr.mxu1 %v2468_v38 }
 0x609   : > { %v2059_v30 = vmul.f32 %v6894_v28, %v2036_v34  ;;  %5516 = vmatpush3.msra.mxu1 %v2468_v38 }
 0x60a   : > { %5517 = vmatprep.subr.mxu1 %v2466_v32  ;;  %v2464_v22 = vpop.permute.xlu1 %2463 }
 0x60b   : > { %5474 = vmatprep.mubr.f32.mxu1 %v2059_v30  ;;  %5518 = vmatpush3.msra.mxu1 %v2466_v32  ;;  %v2462_v20 = vpop.permute.xlu0 %2461 }
 0x60c   : > { %5475 = vmatmul.mubr.f32.gmra.mxu1 %v2060_v26  ;;  %5519 = vmatprep.subr.mxu1 %v2464_v22 }
 0x60d   : > { %5520 = vmatpush3.msra.mxu1 %v2464_v22 }
 0x60e   : > { %5521 = vmatprep.subr.mxu1 %v2462_v20  ;;  %v2460_v46 = vpop.permute.xlu1 %2459 }
 0x60f   : > { %5522 = vmatpush3.msra.mxu1 %v2462_v20  ;;  %v2458_v16 = vpop.permute.xlu0 %2457 }
 0x610   : > { %5523 = vmatprep.subr.mxu1 %v2460_v46 }
 0x611   : > { %5524 = vmatpush3.msra.mxu1 %v2460_v46 }
 0x612   : > { %5525 = vmatprep.subr.mxu1 %v2458_v16  ;;  %v2456_v52 = vpop.permute.xlu1 %2455 }
 0x613   : > { %5526 = vmatpush3.msra.mxu1 %v2458_v16  ;;  %v2454_v5 = vpop.permute.xlu0 %2453 }
 0x614   : > { %5527 = vmatprep.subr.mxu1 %v2456_v52 }
 0x615   : > { %5528 = vmatpush3.msra.mxu1 %v2456_v52 }
 0x616   : > { %5529 = vmatprep.subr.mxu1 %v2454_v5  ;;  %v2452_v55 = vpop.permute.xlu1 %2451 }
 0x617   : > { %5530 = vmatpush3.msra.mxu1 %v2454_v5  ;;  %v2450_v6 = vpop.permute.xlu0 %2449 }
 0x618   : > { %5531 = vmatprep.subr.mxu1 %v2452_v55 }
 0x619   : > { %5532 = vmatpush3.msra.mxu1 %v2452_v55 }
 0x61a   : > { %5533 = vmatprep.subr.mxu1 %v2450_v6  ;;  %v2448_v27 = vpop.permute.xlu1 %2447 }
 0x61b   : > { %5534 = vmatpush3.msra.mxu1 %v2450_v6  ;;  %v2896_v58 = vpop.permute.xlu0 %2895 }
 0x61c   : > { %5535 = vmatprep.subr.mxu1 %v2448_v27 }
 0x61d   : > { %5536 = vmatpush3.msra.mxu1 %v2448_v27 }
 0x61e   : > { %5589 = vmatprep.subr.mxu1 %v2896_v58  ;;  %v2894_v1 = vpop.permute.xlu1 %2893 }
 0x61f   : > { %v2892_v2 = vpop.permute.xlu0 %2891 }
 0x622   : > { %v2890_v4 = vpop.permute.xlu1 %2889 }
 0x623   : > { %v2888_v35 = vpop.permute.xlu0 %2887 }
 0x626   : > { %v2886_v17 = vpop.permute.xlu1 %2885 }
 0x627   : > { %v2884_v43 = vpop.permute.xlu0 %2883 }
 0x62a   : > { %v2882_v61 = vpop.permute.xlu1 %2881 }
 0x62b   : > { %v2880_v63 = vpop.permute.xlu0 %2879 }
 0x62e   : > { %v2878_v11 = vpop.permute.xlu1 %2877 }
 0x62f   : > { %v2876_v12 = vpop.permute.xlu0 %2875 }
 0x632   : > { %v2874_v59 = vpop.permute.xlu1 %2873 }
 0x633   : > { %v2872_v29 = vpop.permute.xlu0 %2871 }
 0x636   : > { %v2870_v8 = vpop.permute.xlu1 %2869 }
 0x637   : > { %v2868_v7 = vpop.permute.xlu0 %2867 }
 0x63a   : > { %v2866_v36 = vpop.permute.xlu1 %2865 }
 0x63b   : > { %v3314_v26 = vpop.permute.xlu0 %3313 }
 0x63e   : > { %v3312_v16 = vpop.permute.xlu1 %3311 }
 0x63f   : > { %v3310_v27 = vpop.permute.xlu0 %3309 }
 0x659   : > { %v5483_v49 = vpop.f32.mrf.mxu0 }
 0x65a   : > { %v2416_v39 = vmul.f32 %v6846_v18, %v5483_v49 }
 0x65b   : > { %v2336_v10 = vpop.f32.mrf.mxu0 }
 0x65c   : > { %v2415_v45 = vmul.f32 %v6840_v19, %v2336_v10 }
 0x65e   : > { %5537 = vmatprep.mubr.f32.mxu1 %v2415_v45 }
 0x65f   : > { %5538 = vmatmul.mubr.f32.vlgmr.msra.gmra.mxu1 %v2416_v39 }
 0x660   : > { %5590 = vmatpush3.msra.mxu1 %v2896_v58 }
 0x661   : > { %5591 = vmatprep.subr.mxu1 %v2894_v1 }
 0x662   : > { %5592 = vmatpush3.msra.mxu1 %v2894_v1  ;;  %v3308_v1 = vpop.permute.xlu1 %3307 }
 0x663   : > { %5593 = vmatprep.subr.mxu1 %v2892_v2  ;;  %v5486_v47 = vpop.f32.mrf.mxu0 }
 0x664   : > { %5594 = vmatpush3.msra.mxu1 %v2892_v2  ;;  %v2418_v51 = vmul.f32 %v6856_v3, %v5486_v47 }
 0x665   : > { %5595 = vmatprep.subr.mxu1 %v2890_v4  ;;  %v2346_v31 = vpop.f32.mrf.mxu0 }
 0x666   : > { %v2417_v37 = vmul.f32 %v6852_v14, %v2346_v31  ;;  %5596 = vmatpush3.msra.mxu1 %v2890_v4  ;;  %v3304_v45 = vpop.permute.xlu1 %3303 }
 0x667   : > { %5597 = vmatprep.subr.mxu1 %v2888_v35  ;;  %v5489_v25 = vpop.f32.mrf.mxu0 }
 0x668   : > { %5598 = vmatpush3.msra.mxu1 %v2888_v35  ;;  %5540 = vmatprep.mubr.f32.mxu1 %v2417_v37  ;;  %v2420_v33 = vmul.f32 %v6864_v21, %v5489_v25 }
 0x669   : > { %5599 = vmatprep.subr.mxu1 %v2886_v17  ;;  %v2356_v48 = vpop.f32.mrf.mxu0  ;;  %5541 = vmatmul.mubr.f32.gmra.mxu1 %v2418_v51 }
 0x66a   : > { %v2419_v41 = vmul.f32 %v6861_v13, %v2356_v48  ;;  %5600 = vmatpush3.msra.mxu1 %v2886_v17 }
 0x66b   : > { %5601 = vmatprep.subr.mxu1 %v2884_v43  ;;  %v5492_v53 = vpop.f32.mrf.mxu0 }
 0x66c   : > { %5602 = vmatpush3.msra.mxu1 %v2884_v43  ;;  %5543 = vmatprep.mubr.f32.mxu1 %v2419_v41  ;;  %v2422_v9 = vmul.f32 %v6872_v54, %v5492_v53  ;;  %v3306_v43 = vpop.permute.xlu0 %3305 }
 0x66d   : > { %5603 = vmatprep.subr.mxu1 %v2882_v61  ;;  %v2366_v57 = vpop.f32.mrf.mxu0  ;;  %5544 = vmatmul.mubr.f32.gmra.mxu1 %v2420_v33 }
 0x66e   : > { %v2421_v56 = vmul.f32 %v6869_v0, %v2366_v57  ;;  %5604 = vmatpush3.msra.mxu1 %v2882_v61 }
 0x66f   : > { %5605 = vmatprep.subr.mxu1 %v2880_v63  ;;  %v5495_v62 = vpop.f32.mrf.mxu0 }
 0x670   : > { %5606 = vmatpush3.msra.mxu1 %v2880_v63  ;;  %5546 = vmatprep.mubr.f32.mxu1 %v2421_v56  ;;  %v2424_v32 = vmul.f32 %v6879_v23, %v5495_v62 }
 0x671   : > { %5607 = vmatprep.subr.mxu1 %v2878_v11  ;;  %v2376_v42 = vpop.f32.mrf.mxu0  ;;  %5547 = vmatmul.mubr.f32.gmra.mxu1 %v2422_v9 }
 0x672   : > { %v2423_v38 = vmul.f32 %v6876_v15, %v2376_v42  ;;  %5608 = vmatpush3.msra.mxu1 %v2878_v11 }
 0x673   : > { %5609 = vmatprep.subr.mxu1 %v2876_v12  ;;  %v5498_v34 = vpop.f32.mrf.mxu0 }
 0x674   : > { %5610 = vmatpush3.msra.mxu1 %v2876_v12  ;;  %5549 = vmatprep.mubr.f32.mxu1 %v2423_v38  ;;  %v2426_v20 = vmul.f32 %v6885_v60, %v5498_v34  ;;  %v3302_v12 = vpop.permute.xlu0 %3301 }
 0x675   : > { %5611 = vmatprep.subr.mxu1 %v2874_v59  ;;  %v2386_v30 = vpop.f32.mrf.mxu0  ;;  %5550 = vmatmul.mubr.f32.gmra.mxu1 %v2424_v32 }
 0x676   : > { %v2425_v22 = vmul.f32 %v6882_v50, %v2386_v30  ;;  %5612 = vmatpush3.msra.mxu1 %v2874_v59  ;;  %v3300_v59 = vpop.permute.xlu1 %3299 }
 0x677   : > { %5613 = vmatprep.subr.mxu1 %v2872_v29  ;;  %v5501_v46 = vpop.f32.mrf.mxu0 }
 0x678   : > { %5614 = vmatpush3.msra.mxu1 %v2872_v29  ;;  %5552 = vmatprep.mubr.f32.mxu1 %v2425_v22  ;;  %v2428_v55 = vmul.f32 %v6891_v40, %v5501_v46  ;;  %v3298_v29 = vpop.permute.xlu0 %3297 }
 0x679   : > { %5615 = vmatprep.subr.mxu1 %v2870_v8  ;;  %v2396_v52 = vpop.f32.mrf.mxu0  ;;  %5553 = vmatmul.mubr.f32.gmra.mxu1 %v2426_v20 }
 0x67a   : > { %v2427_v5 = vmul.f32 %v6888_v44, %v2396_v52  ;;  %5616 = vmatpush3.msra.mxu1 %v2870_v8  ;;  %v3296_v8 = vpop.permute.xlu1 %3295 }
 0x67b   : > { %5617 = vmatprep.subr.mxu1 %v2868_v7  ;;  %v5504_v6 = vpop.f32.mrf.mxu0 }
 0x67c   : > { %5618 = vmatpush3.msra.mxu1 %v2868_v7  ;;  %5555 = vmatprep.mubr.f32.mxu1 %v2427_v5  ;;  %v2430_v4 = vmul.f32 %v6897_v24, %v5504_v6  ;;  %v3294_v7 = vpop.permute.xlu0 %3293 }
 0x67d   : > { %5619 = vmatprep.subr.mxu1 %v2866_v36  ;;  %v2406_v58 = vpop.f32.mrf.mxu0  ;;  %5556 = vmatmul.mubr.f32.gmra.mxu1 %v2428_v55 }
 0x67e   : > { %v2429_v2 = vmul.f32 %v6894_v28, %v2406_v58  ;;  %5620 = vmatpush3.msra.mxu1 %v2866_v36  ;;  %v3292_v36 = vpop.permute.xlu1 %3291 }
 0x67f   : > { %5673 = vmatprep.subr.mxu1 %v3314_v26  ;;  %v5567_v35 = vpop.f32.mrf.mxu0 }
 0x680   : > { %5558 = vmatprep.mubr.f32.mxu1 %v2429_v2  ;;  %v2850_v61 = vmul.f32 %v6846_v18, %v5567_v35 }
 0x681   : > { %5559 = vmatmul.mubr.f32.gmra.mxu1 %v2430_v4  ;;  %v2770_v17 = vpop.f32.mrf.mxu0 }
 0x682   : > { %v2849_v49 = vmul.f32 %v6840_v19, %v2770_v17 }
 0x683   : > { %v5570_v10 = vpop.f32.mrf.mxu0 }
 0x684   : > { %5621 = vmatprep.mubr.f32.mxu1 %v2849_v49  ;;  %v2852_v11 = vmul.f32 %v6856_v3, %v5570_v10 }
 0x685   : > { %v2780_v39 = vpop.f32.mrf.mxu0  ;;  %5622 = vmatmul.mubr.f32.vlgmr.msra.gmra.mxu1 %v2850_v61 }
 0x686   : > { %v2851_v63 = vmul.f32 %v6852_v14, %v2780_v39  ;;  %5674 = vmatpush3.msra.mxu1 %v3314_v26  ;;  %v3290_v26 = vpop.permute.xlu0 %3289 }
 0x687   : > { %5675 = vmatprep.subr.mxu1 %v3312_v16  ;;  %v5573_v47 = vpop.f32.mrf.mxu0 }
 0x688   : > { %5676 = vmatpush3.msra.mxu1 %v3312_v16  ;;  %5624 = vmatprep.mubr.f32.mxu1 %v2851_v63  ;;  %v2854_v51 = vmul.f32 %v6864_v21, %v5573_v47  ;;  %v3288_v16 = vpop.permute.xlu1 %3287 }
 0x689   : > { %5677 = vmatprep.subr.mxu1 %v3310_v27  ;;  %v2790_v31 = vpop.f32.mrf.mxu0  ;;  %5625 = vmatmul.mubr.f32.gmra.mxu1 %v2852_v11 }
 0x68a   : > { %v2853_v37 = vmul.f32 %v6861_v13, %v2790_v31  ;;  %5678 = vmatpush3.msra.mxu1 %v3310_v27  ;;  %v3286_v27 = vpop.permute.xlu0 %3285 }
 0x68b   : > { %5679 = vmatprep.subr.mxu1 %v3308_v1  ;;  %v5576_v25 = vpop.f32.mrf.mxu0 }
 0x68c   : > { %5680 = vmatpush3.msra.mxu1 %v3308_v1  ;;  %5627 = vmatprep.mubr.f32.mxu1 %v2853_v37  ;;  %v2856_v33 = vmul.f32 %v6872_v54, %v5576_v25  ;;  %v3284_v1 = vpop.permute.xlu1 %3283 }
 0x68d   : > { %5681 = vmatprep.subr.mxu1 %v3306_v43  ;;  %v2800_v48 = vpop.f32.mrf.mxu0  ;;  %5628 = vmatmul.mubr.f32.gmra.mxu1 %v2854_v51 }
 0x68e   : > { %v2855_v41 = vmul.f32 %v6869_v0, %v2800_v48  ;;  %5682 = vmatpush3.msra.mxu1 %v3306_v43 }
 0x68f   : > { %5683 = vmatprep.subr.mxu1 %v3304_v45  ;;  %v5579_v53 = vpop.f32.mrf.mxu0 }
 0x690   : > { %5684 = vmatpush3.msra.mxu1 %v3304_v45  ;;  %5630 = vmatprep.mubr.f32.mxu1 %v2855_v41  ;;  %v2858_v9 = vmul.f32 %v6879_v23, %v5579_v53 }
 0x691   : > { %5685 = vmatprep.subr.mxu1 %v3302_v12  ;;  %v2810_v57 = vpop.f32.mrf.mxu0  ;;  %5631 = vmatmul.mubr.f32.gmra.mxu1 %v2856_v33 }
 0x692   : > { %v2857_v56 = vmul.f32 %v6876_v15, %v2810_v57  ;;  %5686 = vmatpush3.msra.mxu1 %v3302_v12 }
 0x693   : > { %5687 = vmatprep.subr.mxu1 %v3300_v59  ;;  %v5582_v62 = vpop.f32.mrf.mxu0 }
 0x694   : > { %5688 = vmatpush3.msra.mxu1 %v3300_v59  ;;  %5633 = vmatprep.mubr.f32.mxu1 %v2857_v56  ;;  %v2860_v32 = vmul.f32 %v6885_v60, %v5582_v62 }
 0x695   : > { %5689 = vmatprep.subr.mxu1 %v3298_v29  ;;  %v2820_v42 = vpop.f32.mrf.mxu0  ;;  %5634 = vmatmul.mubr.f32.gmra.mxu1 %v2858_v9 }
 0x696   : > { %v2859_v38 = vmul.f32 %v6882_v50, %v2820_v42  ;;  %5690 = vmatpush3.msra.mxu1 %v3298_v29 }
 0x697   : > { %5691 = vmatprep.subr.mxu1 %v3296_v8  ;;  %v5585_v34 = vpop.f32.mrf.mxu0 }
 0x698   : > { %5692 = vmatpush3.msra.mxu1 %v3296_v8  ;;  %5636 = vmatprep.mubr.f32.mxu1 %v2859_v38  ;;  %v2862_v20 = vmul.f32 %v6891_v40, %v5585_v34 }
 0x699   : > { %5693 = vmatprep.subr.mxu1 %v3294_v7  ;;  %v2830_v30 = vpop.f32.mrf.mxu0  ;;  %5637 = vmatmul.mubr.f32.gmra.mxu1 %v2860_v32 }
 0x69a   : > { %v2861_v22 = vmul.f32 %v6888_v44, %v2830_v30  ;;  %5694 = vmatpush3.msra.mxu1 %v3294_v7 }
 0x69b   : > { %5695 = vmatprep.subr.mxu1 %v3292_v36  ;;  %v5588_v46 = vpop.f32.mrf.mxu0 }
 0x69c   : > { %5696 = vmatpush3.msra.mxu1 %v3292_v36  ;;  %5639 = vmatprep.mubr.f32.mxu1 %v2861_v22  ;;  %v2864_v55 = vmul.f32 %v6897_v24, %v5588_v46 }
 0x69d   : > { %5697 = vmatprep.subr.mxu1 %v3290_v26  ;;  %v2840_v52 = vpop.f32.mrf.mxu0  ;;  %5640 = vmatmul.mubr.f32.gmra.mxu1 %v2862_v20 }
 0x69e   : > { %v2863_v5 = vmul.f32 %v6894_v28, %v2840_v52  ;;  %5698 = vmatpush3.msra.mxu1 %v3290_v26 }
 0x69f   : > { %5699 = vmatprep.subr.mxu1 %v3288_v16  ;;  %v5651_v6 = vpop.f32.mrf.mxu0 }
 0x6a0   : > { %5700 = vmatpush3.msra.mxu1 %v3288_v16  ;;  %5642 = vmatprep.mubr.f32.mxu1 %v2863_v5  ;;  %v3268_v4 = vmul.f32 %v6846_v18, %v5651_v6 }
 0x6a1   : > { %5701 = vmatprep.subr.mxu1 %v3286_v27  ;;  %5643 = vmatmul.mubr.f32.gmra.mxu1 %v2864_v55  ;;  %v3188_v58 = vpop.f32.mrf.mxu0 }
 0x6a2   : > { %v3267_v2 = vmul.f32 %v6840_v19, %v3188_v58  ;;  %5702 = vmatpush3.msra.mxu1 %v3286_v27  ;;  %v5844_v58 = vld [vmem:[%s7481_s3 + $0x98] ss:$8 sps:$4 sm:$0xff]  }
 0x6a3   : > { %5703 = vmatprep.subr.mxu1 %v3284_v1  ;;  %v5654_v35 = vpop.f32.mrf.mxu0  ;;  %5729 = vmatprep.subr.bf16.mxu0 %v5844_v58 }
 0x6a4   : > { %5704 = vmatpush3.msra.mxu1 %v3284_v1  ;;  %5705 = vmatprep.mubr.f32.mxu1 %v3267_v2  ;;  %v3270_v49 = vmul.f32 %v6856_v3, %v5654_v35 }
 0x6a5   : > { %v3198_v17 = vpop.f32.mrf.mxu0  ;;  %5706 = vmatmul.mubr.f32.vlgmr.msra.gmra.mxu1 %v3268_v4  ;;  %5730 = vmatpush3.bf16.msra.mxu0 %v5844_v58  ;;  %v5845_v4 = vld [vmem:[%s7481_s3 + $0x88] ss:$8 sps:$4 sm:$0xff]  }
 0x6a6   : > { %v3269_v43 = vmul.f32 %v6852_v14, %v3198_v17  ;;  %5731 = vmatprep.subr.bf16.mxu0 %v5845_v4 }
 0x6a7   : > { %v5657_v61 = vpop.f32.mrf.mxu0 }
 0x6a8   : > { %5708 = vmatprep.mubr.f32.mxu1 %v3269_v43  ;;  %v3272_v19 = vmul.f32 %v6864_v21, %v5657_v61  ;;  %v5846_v43 = vld [vmem:[%s7481_s3 + $0x78] ss:$8 sps:$4 sm:$0xff]  }
 0x6a9   : > { %v3208_v10 = vpop.f32.mrf.mxu0  ;;  %5709 = vmatmul.mubr.f32.gmra.mxu1 %v3270_v49  ;;  %5732 = vmatpush3.bf16.msra.mxu0 %v5845_v4 }
 0x6aa   : > { %v3271_v45 = vmul.f32 %v6861_v13, %v3208_v10  ;;  %5733 = vmatprep.subr.bf16.mxu0 %v5846_v43  ;;  %v5847_v10 = vld [vmem:[%s7481_s3 + $0x68] ss:$8 sps:$4 sm:$0xff]  }
 0x6ab   : > { %v5660_v39 = vpop.f32.mrf.mxu0 }
 0x6ac   : > { %5711 = vmatprep.mubr.f32.mxu1 %v3271_v45  ;;  %v3274_v11 = vmul.f32 %v6872_v54, %v5660_v39  ;;  %v5848_v39 = vld [vmem:[%s7481_s3 + $0x58] ss:$8 sps:$4 sm:$0xff]  }
 0x6ad   : > { %v3218_v18 = vpop.f32.mrf.mxu0  ;;  %5712 = vmatmul.mubr.f32.gmra.mxu1 %v3272_v19  ;;  %5734 = vmatpush3.bf16.msra.mxu0 %v5846_v43 }
 0x6ae   : > { %v3273_v63 = vmul.f32 %v6869_v0, %v3218_v18  ;;  %5735 = vmatprep.subr.bf16.mxu0 %v5847_v10 }
 0x6af   : > { %v5663_v47 = vpop.f32.mrf.mxu0 }
 0x6b0   : > { %5714 = vmatprep.mubr.f32.mxu1 %v3273_v63  ;;  %v3276_v12 = vmul.f32 %v6879_v23, %v5663_v47 }
 0x6b1   : > { %v3228_v14 = vpop.f32.mrf.mxu0  ;;  %5715 = vmatmul.mubr.f32.gmra.mxu1 %v3274_v11  ;;  %5736 = vmatpush3.bf16.msra.mxu0 %v5847_v10  ;;  %v5849_v11 = vld [vmem:[%s7481_s3 + $0x48] ss:$8 sps:$4 sm:$0xff]  }
 0x6b2   : > { %v3275_v3 = vmul.f32 %v6876_v15, %v3228_v14  ;;  %5737 = vmatprep.subr.bf16.mxu0 %v5848_v39 }
 0x6b3   : > { %v5666_v31 = vpop.f32.mrf.mxu0 }
 0x6b4   : > { %5717 = vmatprep.mubr.f32.mxu1 %v3275_v3  ;;  %v3278_v59 = vmul.f32 %v6885_v60, %v5666_v31  ;;  %v5850_v3 = vld [vmem:[%s7481_s3 + $0x38] ss:$8 sps:$4 sm:$0xff]  }
 0x6b5   : > { %v3238_v13 = vpop.f32.mrf.mxu0  ;;  %5718 = vmatmul.mubr.f32.gmra.mxu1 %v3276_v12  ;;  %5738 = vmatpush3.bf16.msra.mxu0 %v5848_v39 }
 0x6b6   : > { %v3277_v21 = vmul.f32 %v6882_v50, %v3238_v13  ;;  %v6948_v50 = vpop.f32.mrf.mxu1  ;;  %5739 = vmatprep.subr.bf16.mxu0 %v5849_v11  ;;  %v5851_v13 = vld [vmem:[%s7481_s3 + $0x28] ss:$8 sps:$4 sm:$0xff]  }
 0x6b7   : > { %v5669_v37 = vpop.f32.mrf.mxu0 }
 0x6b8   : > { %5720 = vmatprep.mubr.f32.mxu1 %v3277_v21  ;;  %v3280_v51 = vmul.f32 %v6891_v40, %v5669_v37  ;;  %v6950_v60 = vpop.f32.mrf.mxu1 }
 0x6b9   : > { %v3248_v0 = vpop.f32.mrf.mxu0  ;;  %5721 = vmatmul.mubr.f32.gmra.mxu1 %v3278_v59  ;;  %5740 = vmatpush3.bf16.msra.mxu0 %v5849_v11 }
 0x6ba   : > { %v3279_v54 = vmul.f32 %v6888_v44, %v3248_v0  ;;  %v6952_v29 = vpop.f32.mrf.mxu1  ;;  %5741 = vmatprep.subr.bf16.mxu0 %v5850_v3 }
 0x6bb   : > { %v5672_v25 = vpop.f32.mrf.mxu0 }
 0x6bc   : > { %5723 = vmatprep.mubr.f32.mxu1 %v3279_v54  ;;  %v3282_v48 = vmul.f32 %v6897_v24, %v5672_v25  ;;  %v6954_v41 = vpop.f32.mrf.mxu1 }
 0x6bd   : > { %v3258_v15 = vpop.f32.mrf.mxu0  ;;  %5724 = vmatmul.mubr.f32.gmra.mxu1 %v3280_v51  ;;  %5742 = vmatpush3.bf16.msra.mxu0 %v5850_v3 }
 0x6be   : > { %v3281_v23 = vmul.f32 %v6894_v28, %v3258_v15  ;;  %v6956_v44 = vpop.f32.mrf.mxu1  ;;  %5743 = vmatprep.subr.bf16.mxu0 %v5851_v13 }
 0x6c0   : > { %5726 = vmatprep.mubr.f32.mxu1 %v3281_v23  ;;  %v6958_v40 = vpop.f32.mrf.mxu1 }
 0x6c1   : > { %5727 = vmatmul.mubr.f32.gmra.mxu1 %v3282_v48  ;;  %5744 = vmatpush3.bf16.msra.mxu0 %v5851_v13 }
 0x6c2   : > { %v6960_v33 = vpop.f32.mrf.mxu1 }
 0x6c4   : > { %v6962_v53 = vpop.f32.mrf.mxu1 }
 0x6c6   : > { %v6964_v28 = vpop.f32.mrf.mxu1 }
 0x6c8   : > { %v6966_v24 = vpop.f32.mrf.mxu1 }
 0x6ca   : > { %v6968_v8 = vpop.f32.mrf.mxu1 }
 0x6cc   : > { %v6970_v57 = vpop.f32.mrf.mxu1 }
 0x6ce   : > { %v6972_v56 = vpop.f32.mrf.mxu1 }
 0x6d0   : > { %v6974_v9 = vpop.f32.mrf.mxu1 }
 0x6d2   : > { %v6976_v62 = vpop.f32.mrf.mxu1 }
 0x6d4   : > { %v6978_v7 = vpop.f32.mrf.mxu1 }
 0x71f   : > { %v5539_v42 = vpop.f32.mrf.mxu1 }
 0x720   : > { %3494 = vrot.lane.b32.xlu1 %v5539_v42, %s6015_s25 }
 0x721   : > { %v2561_v36 = vpop.f32.mrf.mxu1 }
 0x722   : > { %3492 = vrot.lane.b32.xlu0 %v2561_v36, %s6015_s25 }
 0x729   : > { %v5542_v38 = vpop.f32.mrf.mxu1 }
 0x72a   : > { %3498 = vrot.lane.b32.xlu1 %v5542_v38, %s6015_s25 }
 0x72b   : > { %v2571_v32 = vpop.f32.mrf.mxu1 }
 0x72c   : > { %3496 = vrot.lane.b32.xlu0 %v2571_v32, %s6015_s25 }
 0x72d   : > { %v5545_v34 = vpop.f32.mrf.mxu1 }
 0x72e   : > { %3502 = vrot.lane.b32.xlu1 %v5545_v34, %s6015_s25 }
 0x72f   : > { %v2581_v30 = vpop.f32.mrf.mxu1 }
 0x730   : > { %3500 = vrot.lane.b32.xlu0 %v2581_v30, %s6015_s25 }
 0x731   : > { %v5548_v26 = vpop.f32.mrf.mxu1 }
 0x732   : > { %3506 = vrot.lane.b32.xlu1 %v5548_v26, %s6015_s25 }
 0x733   : > { %v2591_v22 = vpop.f32.mrf.mxu1 }
 0x734   : > { %3504 = vrot.lane.b32.xlu0 %v2591_v22, %s6015_s25 }
 0x735   : > { %v5551_v20 = vpop.f32.mrf.mxu1 }
 0x736   : > { %3510 = vrot.lane.b32.xlu1 %v5551_v20, %s6015_s25 }
 0x737   : > { %v2601_v46 = vpop.f32.mrf.mxu1 }
 0x738   : > { %3508 = vrot.lane.b32.xlu0 %v2601_v46, %s6015_s25 }
 0x739   : > { %v5554_v16 = vpop.f32.mrf.mxu1 }
 0x73a   : > { %3514 = vrot.lane.b32.xlu1 %v5554_v16, %s6015_s25 }
 0x73b   : > { %v2611_v52 = vpop.f32.mrf.mxu1 }
 0x73c   : > { %3512 = vrot.lane.b32.xlu0 %v2611_v52, %s6015_s25 }
 0x73d   : > { %v5557_v5 = vpop.f32.mrf.mxu1 }
 0x73e   : > { %3518 = vrot.lane.b32.xlu1 %v5557_v5, %s6015_s25 }
 0x73f   : > { %v2621_v55 = vpop.f32.mrf.mxu1 }
 0x740   : > { %3516 = vrot.lane.b32.xlu0 %v2621_v55, %s6015_s25 }
 0x741   : > { %v5560_v6 = vpop.f32.mrf.mxu1 }
 0x742   : > { %3522 = vrot.lane.b32.xlu1 %v5560_v6, %s6015_s25 }
 0x743   : > { %v2631_v27 = vpop.f32.mrf.mxu1 }
 0x744   : > { %3520 = vrot.lane.b32.xlu0 %v2631_v27, %s6015_s25 }
 0x745   : > { %v5623_v1 = vpop.f32.mrf.mxu1 }
 0x746   : > { %3558 = vrot.lane.b32.xlu1 %v5623_v1, %s6014_s24 }
 0x747   : > { %v2979_v2 = vpop.f32.mrf.mxu1 }
 0x748   : > { %3556 = vrot.lane.b32.xlu0 %v2979_v2, %s6014_s24 }
 0x749   : > { %v5626_v35 = vpop.f32.mrf.mxu1 }
 0x74a   : > { %3562 = vrot.lane.b32.xlu1 %v5626_v35, %s6014_s24 }
 0x74b   : > { %v2989_v17 = vpop.f32.mrf.mxu1 }
 0x74c   : > { %3560 = vrot.lane.b32.xlu0 %v2989_v17, %s6014_s24 }
 0x74d   : > { %v5629_v49 = vpop.f32.mrf.mxu1 }
 0x74e   : > { %3566 = vrot.lane.b32.xlu1 %v5629_v49, %s6014_s24 }
 0x74f   : > { %v2999_v61 = vpop.f32.mrf.mxu1 }
 0x750   : > { %3564 = vrot.lane.b32.xlu0 %v2999_v61, %s6014_s24 }
 0x751   : > { %v5632_v45 = vpop.f32.mrf.mxu1 }
 0x752   : > { %3570 = vrot.lane.b32.xlu1 %v5632_v45, %s6014_s24 }
 0x753   : > { %v3009_v19 = vpop.f32.mrf.mxu1 }
 0x754   : > { %3568 = vrot.lane.b32.xlu0 %v3009_v19, %s6014_s24 }
 0x755   : > { %v5635_v18 = vpop.f32.mrf.mxu1 }
 0x756   : > { %3574 = vrot.lane.b32.xlu1 %v5635_v18, %s6014_s24 }
 0x757   : > { %v3019_v63 = vpop.f32.mrf.mxu1 }
 0x758   : > { %3572 = vrot.lane.b32.xlu0 %v3019_v63, %s6014_s24 }
 0x759   : > { %v5638_v47 = vpop.f32.mrf.mxu1 }
 0x75a   : > { %3578 = vrot.lane.b32.xlu1 %v5638_v47, %s6014_s24 }
 0x75b   : > { %v3029_v14 = vpop.f32.mrf.mxu1 }
 0x75c   : > { %3576 = vrot.lane.b32.xlu0 %v3029_v14, %s6014_s24 }
 0x75d   : > { %v5641_v12 = vpop.f32.mrf.mxu1 }
 0x75e   : > { %3582 = vrot.lane.b32.xlu1 %v5641_v12, %s6014_s24  ;;  %v3718_v12 = vlaneseq }
 0x75f   : > { %v3039_v31 = vpop.f32.mrf.mxu1 }
 0x760   : > { %3580 = vrot.lane.b32.xlu0 %v3039_v31, %s6014_s24 }
 0x761   : > { %v5644_v21 = vpop.f32.mrf.mxu1 }
 0x762   : > { %3586 = vrot.lane.b32.xlu1 %v5644_v21, %s6014_s24  ;;  %v7080_v21 = vshrl.u32 %v3718_v12, 7 }
 0x763   : > { %v3049_v59 = vpop.f32.mrf.mxu1 }
 0x764   : > { %3584 = vrot.lane.b32.xlu0 %v3049_v59, %s6014_s24  ;;  %v323_v59 = vld [vmem:[%s7481_s3 + $0x20] sm:$0x1]  ;;  %s4872_s24 = sshll.u32 %s7526_s19, 3 }
 0x765   : > { %v5707_v37 = vpop.f32.mrf.mxu1  ;;  %s274_s27 = scalar_lea.vmem %s7480_s2, %s4872_s24 }
 0x766   : > { %3622 = vrot.lane.b32.xlu1 %v5707_v37, %s6012_s22 }
 0x767   : > { %v3397_v0 = vpop.f32.mrf.mxu1 }
 0x768   : > { %3620 = vrot.lane.b32.xlu0 %v3397_v0, %s6012_s22 }
 0x769   : > { %v5710_v54 = vpop.f32.mrf.mxu1 }
 0x76a   : > { %3626 = vrot.lane.b32.xlu1 %v5710_v54, %s6012_s22  ;;  %v3717_v54 = vunpack.c.l.bf16 %v323_v59 }
 0x76b   : > { %v3407_v51 = vpop.f32.mrf.mxu1 }
 0x76c   : > { %3624 = vrot.lane.b32.xlu0 %v3407_v51, %s6012_s22  ;;  %v3720_v51 = vsub.s32 0, %v7080_v21 }
 0x76d   : > { %v5713_v25 = vpop.f32.mrf.mxu1 }
 0x76e   : > { %3630 = vrot.lane.b32.xlu1 %v5713_v25, %s6012_s22 }
 0x76f   : > { %v3417_v15 = vpop.f32.mrf.mxu1 }
 0x770   : > { %3628 = vrot.lane.b32.xlu0 %v3417_v15, %s6012_s22 }
 0x771   : > { %v5716_v23 = vpop.f32.mrf.mxu1 }
 0x772   : > { %3634 = vrot.lane.b32.xlu1 %v5716_v23, %s6012_s22 }
 0x773   : > { %v3427_v48 = vpop.f32.mrf.mxu1 }
 0x774   : > { %3632 = vrot.lane.b32.xlu0 %v3427_v48, %s6012_s22  ;;  %v7097_v48 = vrot.slane %v3717_v54, %v3720_v51 }
 0x775   : > { %v5719_v42 = vpop.f32.mrf.mxu1 }
 0x776   : > { %3638 = vrot.lane.b32.xlu1 %v5719_v42, %s6012_s22 }
 0x777   : > { %v3437_v36 = vpop.f32.mrf.mxu1 }
 0x778   : > { %3636 = vrot.lane.b32.xlu0 %v3437_v36, %s6012_s22 }
 0x779   : > { %v5722_v38 = vpop.f32.mrf.mxu1 }
 0x77a   : > { %3642 = vrot.lane.b32.xlu1 %v5722_v38, %s6012_s22 }
 0x77b   : > { %v3447_v32 = vpop.f32.mrf.mxu1 }
 0x77c   : > { %3640 = vrot.lane.b32.xlu0 %v3447_v32, %s6012_s22 }
 0x77d   : > { %v5725_v34 = vpop.f32.mrf.mxu1 }
 0x77e   : > { %3646 = vrot.lane.b32.xlu1 %v5725_v34, %s6012_s22 }
 0x77f   : > { %v3457_v30 = vpop.f32.mrf.mxu1 }
 0x780   : > { %3644 = vrot.lane.b32.xlu0 %v3457_v30, %s6012_s22 }
 0x781   : > { %v5728_v26 = vpop.f32.mrf.mxu1 }
 0x782   : > { %3650 = vrot.lane.b32.xlu1 %v5728_v26, %s6012_s22 }
 0x783   : > { %v3467_v22 = vpop.f32.mrf.mxu1 }
 0x784   : > { %3648 = vrot.lane.b32.xlu0 %v3467_v22, %s6012_s22 }
 0x792   : > { %v3495_v20 = vpop.permute.xlu1 %3494 }
 0x793   : > { %v3669_v15 = vsel %vm502_vm0, %v6948_v50, %v3495_v20 }
 0x794   : > { %v3493_v46 = vpop.permute.xlu0 %3492 }
 0x795   : > { %v3668_v36 = vsel %vm502_vm0, %v6950_v60, %v3493_v46 }
 0x79c   : > { %v3499_v16 = vpop.permute.xlu1 %3498 }
 0x79d   : > { %v3671_v30 = vsel %vm502_vm0, %v6952_v29, %v3499_v16 }
 0x79e   : > { %v3497_v52 = vpop.permute.xlu0 %3496 }
 0x79f   : > { %v3670_v60 = vsel %vm502_vm0, %v6954_v41, %v3497_v52 }
 0x7a0   : > { %v3503_v5 = vpop.permute.xlu1 %3502 }
 0x7a1   : > { %v3673_v29 = vsel %vm502_vm0, %v6956_v44, %v3503_v5 }
 0x7a2   : > { %v3501_v55 = vpop.permute.xlu0 %3500 }
 0x7a3   : > { %v3672_v41 = vsel %vm502_vm0, %v6958_v40, %v3501_v55 }
 0x7a4   : > { %v7052_v6 = vpop.permute.xlu1 %3506 }
 0x7a5   : > { %v3675_v44 = vsel %vm502_vm0, %v6960_v33, %v7052_v6 }
 0x7a6   : > { %v7054_v27 = vpop.permute.xlu0 %3504 }
 0x7a7   : > { %v3674_v40 = vsel %vm502_vm0, %v6962_v53, %v7054_v27 }
 0x7a8   : > { %v7056_v58 = vpop.permute.xlu1 %3510 }
 0x7a9   : > { %v3677_v6 = vsel %vm502_vm0, %v6964_v28, %v7056_v58 }
 0x7aa   : > { %v7058_v1 = vpop.permute.xlu0 %3508 }
 0x7ab   : > { %v3676_v53 = vsel %vm502_vm0, %v6966_v24, %v7058_v1 }
 0x7ac   : > { %v7060_v2 = vpop.permute.xlu1 %3514 }
 0x7ae   : > { %v7062_v4 = vpop.permute.xlu0 %3512 }
 0x7b0   : > { %v7064_v35 = vpop.permute.xlu1 %3518 }
 0x7b2   : > { %v7066_v17 = vpop.permute.xlu0 %3516 }
 0x7b4   : > { %v7068_v43 = vpop.permute.xlu1 %3522 }
 0x7b6   : > { %v7070_v49 = vpop.permute.xlu0 %3520 }
 0x7b8   : > { %v3559_v61 = vpop.permute.xlu1 %3558 }
 0x7b9   : > { %v3685_v23 = vsel %vm1336_vm14, %v3669_v15, %v3559_v61 }
 0x7ba   : > { %v3557_v10 = vpop.permute.xlu0 %3556 }
 0x7bb   : > { %v3684_v32 = vsel %vm1336_vm14, %v3668_v36, %v3557_v10 }
 0x7bc   : > { %v3563_v45 = vpop.permute.xlu1 %3562 }
 0x7bd   : > { %v3687_v26 = vsel %vm1336_vm14, %v3671_v30, %v3563_v45 }
 0x7be   : > { %v3561_v19 = vpop.permute.xlu0 %3560 }
 0x7bf   : > { %v3686_v10 = vsel %vm1336_vm14, %v3670_v60, %v3561_v19 }
 0x7c0   : > { %v3567_v39 = vpop.permute.xlu1 %3566 }
 0x7c1   : > { %v3689_v45 = vsel %vm1336_vm14, %v3673_v29, %v3567_v39 }
 0x7c2   : > { %v3565_v18 = vpop.permute.xlu0 %3564 }
 0x7c3   : > { %v3688_v19 = vsel %vm1336_vm14, %v3672_v41, %v3565_v18 }
 0x7c4   : > { %v3571_v63 = vpop.permute.xlu1 %3570 }
 0x7c5   : > { %v3691_v39 = vsel %vm1336_vm14, %v3675_v44, %v3571_v63 }
 0x7c6   : > { %v3569_v11 = vpop.permute.xlu0 %3568 }
 0x7c7   : > { %v3690_v18 = vsel %vm1336_vm14, %v3674_v40, %v3569_v11 }
 0x7c8   : > { %v3575_v47 = vpop.permute.xlu1 %3574 }
 0x7ca   : > { %v7072_v14 = vpop.permute.xlu0 %3572 }
 0x7cb   : > { %v3692_v11 = vsel %vm1336_vm14, %v3676_v53, %v7072_v14  ;;  %v3678_v14 = vsel %vm502_vm0, %v6970_v57, %v7062_v4 }
 0x7cc   : > { %v7074_v3 = vpop.permute.xlu1 %3578 }
 0x7ce   : > { %v7076_v31 = vpop.permute.xlu0 %3576 }
 0x7d0   : > { %v7078_v13 = vpop.permute.xlu1 %3582 }
 0x7d2   : > { %v7085_v37 = vpop.permute.xlu0 %3580 }
 0x7d4   : > { %v7087_v0 = vpop.permute.xlu1 %3586 }
 0x7d6   : > { %v7090_v25 = vpop.permute.xlu0 %3584 }
 0x7d8   : > { %v3623_v42 = vpop.permute.xlu1 %3622 }
 0x7d9   : > { %v3702_v38 = vsel %vm3700_vm13, %v3685_v23, %v3623_v42 }
 0x7da   : > { %v3621_v34 = vpop.permute.xlu0 %3620  ;;  %v3723_v22 = vadd.f32 %v7097_v48, %v3702_v38 }
 0x7db   : > { %v3701_v50 = vsel %vm3700_vm13, %v3684_v32, %v3621_v34 }
 0x7dc   : > { %v3722_v20 = vadd.f32 %v7097_v48, %v3701_v50  ;;  %v3627_v61 = vpop.permute.xlu1 %3626  ;;  %v3693_v50 = vsel %vm1336_vm14, %v3677_v6, %v3575_v47  ;;  %v3679_v47 = vsel %vm502_vm0, %v6968_v8, %v7060_v2  ;;  %v3694_v8 = vsel %vm1336_vm14, %v3678_v14, %v7076_v31 }
 0x7dd   : > { %v3704_v46 = vsel %vm3700_vm13, %v3687_v26, %v3627_v61  ;;  %v3695_v60 = vsel %vm1336_vm14, %v3679_v47, %v7074_v3  ;;  %v3681_v3 = vsel %vm502_vm0, %v6972_v56, %v7064_v35  ;;  %v3680_v31 = vsel %vm502_vm0, %v6974_v9, %v7066_v17 }
 0x7de   : > { %v3625_v12 = vpop.permute.xlu0 %3624  ;;  %v3738_v59 = vpack.c.bf16 %v3723_v22, %v3722_v20  ;;  %v3725_v54 = vadd.f32 %v7097_v48, %v3704_v46  ;;  %v3697_v29 = vsel %vm1336_vm14, %v3681_v3, %v7078_v13  ;;  %v3696_v56 = vsel %vm1336_vm14, %v3680_v31, %v7085_v37 }
 0x7df   : > { %v3703_v16 = vsel %vm3700_vm13, %v3686_v10, %v3625_v12  ;;  %v3683_v13 = vsel %vm502_vm0, %v6976_v62, %v7068_v43  ;;  %v3682_v37 = vsel %vm502_vm0, %v6978_v7, %v7070_v49 }
 0x7e0   : > { %v3724_v15 = vadd.f32 %v7097_v48, %v3703_v16  ;;  %v3631_v23 = vpop.permute.xlu1 %3630  ;;  %5745 = vmatprep.mubr.bf16.mxu0 %v3738_v59  ;;  %v3698_v62 = vsel %vm1336_vm14, %v3682_v37, %v7090_v25  ;;  %v340_v25 = vld [vmem:[%s7481_s3 + $0xa8] sm:$0x1] }
 0x7e1   : > { %v3706_v52 = vsel %vm3700_vm13, %v3689_v45, %v3631_v23  ;;  %v3699_v23 = vsel %vm1336_vm14, %v3683_v13, %v7087_v0  ;;  %vm3896_vm14 = vcmask 269568  }
 0x7e2   : > { %v3739_v42 = vpack.c.bf16 %v3725_v54, %v3724_v15  ;;  %v3629_v36 = vpop.permute.xlu0 %3628  ;;  %v3727_v38 = vadd.f32 %v7097_v48, %v3706_v52 }
 0x7e3   : > { %v3705_v5 = vsel %vm3700_vm13, %v3688_v19, %v3629_v36 }
 0x7e4   : > { %v3726_v32 = vadd.f32 %v7097_v48, %v3705_v5  ;;  %v3635_v34 = vpop.permute.xlu1 %3634  ;;  %5746 = vmatmul.mubr.bf16.vlgmr.msra.gmra.mxu0 %v3739_v42 }
 0x7e5   : > { %v3708_v55 = vsel %vm3700_vm13, %v3691_v39, %v3635_v34 }
 0x7e6   : > { %v3633_v30 = vpop.permute.xlu0 %3632  ;;  %v3740_v33 = vpack.c.bf16 %v3727_v38, %v3726_v32  ;;  %v3729_v26 = vadd.f32 %v7097_v48, %v3708_v55  ;;  %v3746_v55 = vunpack.c.l.bf16 %v340_v25 }
 0x7e7   : > { %v3707_v63 = vsel %vm3700_vm13, %v3690_v18, %v3633_v30 }
 0x7e8   : > { %v3728_v22 = vadd.f32 %v7097_v48, %v3707_v63  ;;  %v3639_v20 = vpop.permute.xlu1 %3638  ;;  %5749 = vmatprep.mubr.bf16.mxu0 %v3740_v33 }
 0x7e9   : > { %v3710_v27 = vsel %vm3700_vm13, %v3693_v50, %v3639_v20 }
 0x7ea   : > { %v3741_v28 = vpack.c.bf16 %v3729_v26, %v3728_v22  ;;  %v3637_v58 = vpop.permute.xlu0 %3636  ;;  %v3731_v46 = vadd.f32 %v7097_v48, %v3710_v27 }
 0x7eb   : > { %v3709_v61 = vsel %vm3700_vm13, %v3692_v11, %v3637_v58 }
 0x7ec   : > { %v3730_v24 = vadd.f32 %v7097_v48, %v3709_v61  ;;  %v3643_v1 = vpop.permute.xlu1 %3642  ;;  %5750 = vmatmul.mubr.bf16.gmra.mxu0 %v3741_v28 }
 0x7ed   : > { %v3712_v10 = vsel %vm3700_vm13, %v3695_v60, %v3643_v1 }
 0x7ee   : > { %v3641_v2 = vpop.permute.xlu0 %3640  ;;  %v3742_v12 = vpack.c.bf16 %v3731_v46, %v3730_v24  ;;  %v3733_v16 = vadd.f32 %v7097_v48, %v3712_v10 }
 0x7ef   : > { %v3711_v59 = vsel %vm3700_vm13, %v3694_v8, %v3641_v2 }
 0x7f0   : > { %v3732_v57 = vadd.f32 %v7097_v48, %v3711_v59  ;;  %v3647_v4 = vpop.permute.xlu1 %3646  ;;  %5753 = vmatprep.mubr.bf16.mxu0 %v3742_v12 }
 0x7f1   : > { %v3714_v45 = vsel %vm3700_vm13, %v3697_v29, %v3647_v4 }
 0x7f2   : > { %v3743_v35 = vpack.c.bf16 %v3733_v16, %v3732_v57  ;;  %v3645_v54 = vpop.permute.xlu0 %3644  ;;  %v3735_v41 = vadd.f32 %v7097_v48, %v3714_v45 }
 0x7f3   : > { %v3713_v15 = vsel %vm3700_vm13, %v3696_v56, %v3645_v54 }
 0x7f4   : > { %v3734_v9 = vadd.f32 %v7097_v48, %v3713_v15  ;;  %v3651_v17 = vpop.permute.xlu1 %3650  ;;  %5754 = vmatmul.mubr.bf16.gmra.mxu0 %v3743_v35 }
 0x7f5   : > { %v3716_v52 = vsel %vm3700_vm13, %v3699_v23, %v3651_v17 }
 0x7f6   : > { %v3649_v43 = vpop.permute.xlu0 %3648  ;;  %v3744_v19 = vpack.c.bf16 %v3735_v41, %v3734_v9  ;;  %v3737_v0 = vadd.f32 %v7097_v48, %v3716_v52 }
 0x7f7   : > { %v3715_v42 = vsel %vm3700_vm13, %v3698_v62, %v3649_v43 }
 0x7f8   : > { %v3736_v36 = vadd.f32 %v7097_v48, %v3715_v42  ;;  %5757 = vmatprep.mubr.bf16.mxu0 %v3744_v19  ;;  %v3750_v48 = vrot.slane %v3746_v55, %v3720_v51 }
 0x7fa   : > { %v3745_v44 = vpack.c.bf16 %v3737_v0, %v3736_v36 }
 0x7fc   : > { %5758 = vmatmul.mubr.bf16.gmra.mxu0 %v3745_v44 }
 0x8a4   : > { %v5747_v5 = vpop.f32.mrf.mxu0 }
 0x8a5   : > { %v7210_v27 = vadd.f32 %v5747_v5, %v3750_v48 }
 0x8a6   : > { %v3833_v39 = vpop.f32.mrf.mxu0 }
 0x8a7   : > { %v7212_v11 = vadd.f32 %v3833_v39, %v3750_v48  ;;  %v3899_v12 = vsel %vm3896_vm14, %v7210_v27, -inf }
 0x8a8   : > { %v5748_v38 = vpop.f32.mrf.mxu0 }
 0x8a9   : > { %v7200_v63 = vadd.f32 %v5748_v38, %v3750_v48  ;;  %v3897_v3 = vsel %vm3896_vm14, %v7212_v11, -inf  ;;  %v6016_v38 = vmov 32  }
 0x8aa   : > { %v3836_v7 = vpop.f32.mrf.mxu0  ;;  %5829 = vset.pattern.permute.xlu0 %v6016_v38  ;;  %5828 = vset.pattern.permute.xlu1 %v6016_v38 }
 0x8ab   : > { %v7214_v21 = vadd.f32 %v3836_v7, %v3750_v48  ;;  %v3900_v60 = vsel %vm3896_vm14, %v7200_v63, -inf }
 0x8ac   : > { %v5751_v49 = vpop.f32.mrf.mxu0 }
 0x8ad   : > { %v7202_v50 = vadd.f32 %v5751_v49, %v3750_v48  ;;  %v3898_v59 = vsel %vm3896_vm14, %v7214_v21, -inf }
 0x8ae   : > { %v3849_v32 = vpop.f32.mrf.mxu0 }
 0x8af   : > { %v7204_v26 = vadd.f32 %v3849_v32, %v3750_v48  ;;  %v3905_v46 = vsel %vm3896_vm14, %v7202_v50, -inf }
 0x8b0   : > { %v5752_v34 = vpop.f32.mrf.mxu0  ;;  %v3906_v56 = vmax.f32 %v3899_v12, %v3905_v46 }
 0x8b1   : > { %v7198_v6 = vadd.f32 %v5752_v34, %v3750_v48  ;;  %v3901_v24 = vsel %vm3896_vm14, %v7204_v26, -inf }
 0x8b2   : > { %v3852_v40 = vpop.f32.mrf.mxu0  ;;  %v3902_v35 = vmax.f32 %v3897_v3, %v3901_v24 }
 0x8b3   : > { %v7206_v20 = vadd.f32 %v3852_v40, %v3750_v48  ;;  %v3907_v28 = vsel %vm3896_vm14, %v7198_v6, -inf }
 0x8b4   : > { %v5755_v18 = vpop.f32.mrf.mxu0  ;;  %v3908_v29 = vmax.f32 %v3900_v60, %v3907_v28  ;;  %v385_v28 = vld [vmem:[#allocation2 + $0x2b8] sm:$0xff]  ;;  %v384_v60 = vld [vmem:[#allocation2 + $0x2b0] sm:$0xff] }
 0x8b5   : > { %v7218_v58 = vadd.f32 %v5755_v18, %v3750_v48  ;;  %v3903_v14 = vsel %vm3896_vm14, %v7206_v20, -inf  ;;  %v391_v18 = vld [vmem:[#allocation2 + $0x2e8] sm:$0xff] }
 0x8b6   : > { %v3865_v30 = vpop.f32.mrf.mxu0  ;;  %v3904_v54 = vmax.f32 %v3898_v59, %v3903_v14  ;;  %4154 = vmatprep.subr.mxu1 %v391_v18 }
 0x8b7   : > { %v7220_v47 = vadd.f32 %v3865_v30, %v3750_v48  ;;  %v3913_v57 = vsel %vm3896_vm14, %v7218_v58, -inf  ;;  %v390_v30 = vld [vmem:[#allocation2 + $0x2e0] sm:$0xff] }
 0x8b8   : > { %v5756_v33 = vpop.f32.mrf.mxu0  ;;  %v3914_v37 = vmax.f32 %v3906_v56, %v3913_v57  ;;  %4155 = vmatpush1.msra.mxu1 %v390_v30 }
 0x8b9   : > { %v7208_v53 = vadd.f32 %v5756_v33, %v3750_v48  ;;  %v3909_v4 = vsel %vm3896_vm14, %v7220_v47, -inf  ;;  %v388_v33 = vld [vmem:[#allocation2 + $0x2d0] sm:$0xff] }
 0x8ba   : > { %v3868_v22 = vpop.f32.mrf.mxu0  ;;  %v3910_v52 = vmax.f32 %v3902_v35, %v3909_v4 }
 0x8bb   : > { %v7222_v61 = vadd.f32 %v3868_v22, %v3750_v48  ;;  %v3915_v10 = vsel %vm3896_vm14, %v7208_v53, -inf  ;;  %v387_v22 = vld [vmem:[#allocation2 + $0x2c8] sm:$0xff] }
 0x8bc   : > { %v5759_v51 = vpop.f32.mrf.mxu0  ;;  %v3916_v13 = vmax.f32 %v3908_v29, %v3915_v10 }
 0x8bd   : > { %v7234_v8 = vadd.f32 %v5759_v51, %v3750_v48  ;;  %v3911_v31 = vsel %vm3896_vm14, %v7222_v61, -inf  ;;  %v386_v51 = vld [vmem:[#allocation2 + $0x2c0] sm:$0xff] }
 0x8be   : > { %v3881_v1 = vpop.f32.mrf.mxu0  ;;  %v3912_v62 = vmax.f32 %v3904_v54, %v3911_v31  ;;  %v7484_v31 = vmov 0.0  }
 0x8bf   : > { %v7236_v2 = vadd.f32 %v3881_v1, %v3750_v48  ;;  %v3921_v23 = vsel %vm3896_vm14, %v7234_v8, -inf  ;;  %4194 = vmatprep.mubr.f32.mxu1 %v7484_v31  ;;  %4387 = vmatprep.mubr.f32.mxu0 %v7484_v31 }
 0x8c0   : > { %v5760_v16 = vpop.f32.mrf.mxu0  ;;  %v3922_v42 = vmax.f32 %v3914_v37, %v3921_v23 }
 0x8c1   : > { %v7250_v45 = vadd.f32 %v5760_v16, %v3750_v48  ;;  %v3917_v41 = vsel %vm3896_vm14, %v7236_v2, -inf }
 0x8c2   : > { %v3884_v15 = vpop.f32.mrf.mxu0  ;;  %v3918_v0 = vmax.f32 %v3910_v52, %v3917_v41 }
 0x8c3   : > { %v3923_v9 = vsel %vm3896_vm14, %v7250_v45, -inf  ;;  %v7258_v17 = vadd.f32 %v3884_v15, %v3750_v48  ;;  %v389_v48 = vld [vmem:[#allocation2 + $0x2d8] sm:$0xff] }
 0x8c4   : > { %v3924_v43 = vmax.f32 %v3916_v13, %v3923_v9  ;;  %4156 = vmatprep.subr.mxu1 %v389_v48 }
 0x8c5   : > { %v3919_v19 = vsel %vm3896_vm14, %v7258_v17, -inf  ;;  %4157 = vmatpush1.msra.mxu1 %v388_v33 }
 0x8c6   : > { %v3920_v36 = vmax.f32 %v3912_v62, %v3919_v19  ;;  %v3926_v5 = vmax.f32 %v3922_v42, %v3924_v43  ;;  %4158 = vmatprep.subr.mxu1 %v387_v22 }
 0x8c7   : > { %4159 = vmatpush1.msra.mxu1 %v386_v51 }
 0x8c8   : > { %v3925_v44 = vmax.f32 %v3918_v0, %v3920_v36  ;;  %4160 = vmatprep.subr.mxu1 %v385_v28 }
 0x8c9   : > { %4161 = vmatpush1.msra.mxu1 %v384_v60 }
 0x8ca   : > { %v3927_v39 = vmax.f32 %v3925_v44, %v3926_v5 }
 0x8cc   : > { %3928 = vmax.xlane.f32.xlu0 %v3927_v39 }
 0x955   : > { %v3929_v7 = vpop.xlane.xlu0 %3928 }
 0x956   : > { %v3930_v49 = vrot.slane %v3929_v7, 4 }
 0x958   : > { %v3931_v32 = vmax.f32 %v3929_v7, %v3930_v49 }
 0x95a   : > { %v3932_v25 = vrot.slane %v3931_v32, 2 }
 0x95c   : > { %v3933_v34 = vmax.f32 %v3931_v32, %v3932_v25 }
 0x95e   : > { %v3934_v40 = vrot.slane %v3933_v34, 1 }
 0x960   : > { %v3935_v55 = vmax.f32 %v3933_v34, %v3934_v40 }
 0x962   : > { %5796 = vpush %v3935_v55 }
 0x993   : > { %s5797_s23 = spop %5796 }
 0x994   : > { %v7262_v46 = vstv %s5797_s23 }
 0x995   : > { %v3946_v24 = vsub.f32 %v7220_v47, %v7262_v46  ;;  %v3938_v1 = vsub.f32 %v7212_v11, %v7262_v46  ;;  %v3939_v14 = vsub.f32 %v7214_v21, %v7262_v46  ;;  %v3940_v59 = vsub.f32 %v7210_v27, %v7262_v46 }
 0x996   : > { %v3941_v16 = vsub.f32 %v7200_v63, %v7262_v46  ;;  %v3942_v4 = vsub.f32 %v7204_v26, %v7262_v46  ;;  %v3943_v54 = vsub.f32 %v7206_v20, %v7262_v46  ;;  %v3944_v23 = vsub.f32 %v7202_v50, %v7262_v46 }
 0x997   : > { %v3970_v10 = vmul.f32 1.442695, %v3946_v24  ;;  %v3954_v12 = vmul.f32 1.442695, %v3938_v1  ;;  %v3956_v3 = vmul.f32 1.442695, %v3939_v14  ;;  %v3945_v37 = vsub.f32 %v7198_v6, %v7262_v46 }
 0x998   : > { %v3958_v29 = vmul.f32 1.442695, %v3940_v59  ;;  %v3960_v57 = vmul.f32 1.442695, %v3941_v16  ;;  %v3962_v35 = vmul.f32 1.442695, %v3942_v4  ;;  %v3947_v43 = vsub.f32 %v7222_v61, %v7262_v46 }
 0x999   : > { %5916 = vpow2.f32 %v3970_v10  ;;  %v3964_v15 = vmul.f32 1.442695, %v3943_v54  ;;  %v3966_v9 = vmul.f32 1.442695, %v3944_v23  ;;  %v3968_v62 = vmul.f32 1.442695, %v3945_v37 }
 0x99a   : > { %5918 = vpow2.f32 %v3954_v12  ;;  %v3972_v42 = vmul.f32 1.442695, %v3947_v43  ;;  %v3948_v0 = vsub.f32 %v7218_v58, %v7262_v46  ;;  %v3949_v5 = vsub.f32 %v7208_v53, %v7262_v46 }
 0x99b   : > { %5920 = vpow2.f32 %v3956_v3  ;;  %v3950_v7 = vsub.f32 %v7236_v2, %v7262_v46  ;;  %v3951_v25 = vsub.f32 %v7258_v17, %v7262_v46  ;;  %v3952_v55 = vsub.f32 %v7234_v8, %v7262_v46 }
 0x99c   : > { %5922 = vpow2.f32 %v3958_v29  ;;  %v3974_v44 = vmul.f32 1.442695, %v3948_v0  ;;  %v3976_v38 = vmul.f32 1.442695, %v3949_v5  ;;  %v3953_v48 = vsub.f32 %v7250_v45, %v7262_v46 }
 0x99d   : > { %5924 = vpow2.f32 %v3960_v57  ;;  %v3978_v32 = vmul.f32 1.442695, %v3950_v7  ;;  %v3980_v40 = vmul.f32 1.442695, %v3951_v25  ;;  %v3982_v30 = vmul.f32 1.442695, %v3952_v55 }
 0x99e   : > { %5926 = vpow2.f32 %v3962_v35  ;;  %v3984_v22 = vmul.f32 1.442695, %v3953_v48 }
 0x99f   : > { %5928 = vpow2.f32 %v3964_v15 }
 0x9a0   : > { %5930 = vpow2.f32 %v3966_v9 }
 0x9a1   : > { %5932 = vpow2.f32 %v3968_v62 }
 0x9a2   : > { %5934 = vpow2.f32 %v3972_v42 }
 0x9a3   : > { %5936 = vpow2.f32 %v3974_v44 }
 0x9a4   : > { %5938 = vpow2.f32 %v3976_v38 }
 0x9a5   : > { %5940 = vpow2.f32 %v3978_v32 }
 0x9a6   : > { %v5917_v56 = vpop.eup %5916  ;;  %5942 = vpow2.f32 %v3980_v40 }
 0x9a7   : > { %v5919_v13 = vpop.eup %5918  ;;  %4028 = vperm.xlu0 %5829, %v5917_v56   ;;  %5944 = vpow2.f32 %v3982_v30 }
 0x9a8   : > { %3988 = vperm.xlu1 %5828, %v5919_v13   ;;  %v5921_v41 = vpop.eup %5920  ;;  %5946 = vpow2.f32 %v3984_v22 }
 0x9a9   : > { %v5923_v52 = vpop.eup %5922 }
 0x9aa   : > { %v5925_v19 = vpop.eup %5924 }
 0x9ab   : > { %v5927_v36 = vpop.eup %5926 }
 0x9ac   : > { %3993 = vperm.xlu1 %5828, %v5921_v41   ;;  %v5929_v39 = vpop.eup %5928 }
 0x9ad   : > { %v5931_v49 = vpop.eup %5930 }
 0x9ae   : > { %v5933_v34 = vpop.eup %5932 }
 0x9af   : > { %v5935_v18 = vpop.eup %5934 }
 0x9b0   : > { %3998 = vperm.xlu1 %5828, %v5923_v52   ;;  %v5937_v33 = vpop.eup %5936 }
 0x9b1   : > { %v5939_v51 = vpop.eup %5938 }
 0x9b2   : > { %v5941_v28 = vpop.eup %5940 }
 0x9b3   : > { %v5943_v60 = vpop.eup %5942 }
 0x9b4   : > { %4003 = vperm.xlu1 %5828, %v5925_v19   ;;  %v5945_v24 = vpop.eup %5944 }
 0x9b5   : > { %v5947_v1 = vpop.eup %5946 }
 0x9b8   : > { %4008 = vperm.xlu1 %5828, %v5927_v36  }
 0x9bc   : > { %4013 = vperm.xlu1 %5828, %v5929_v39  }
 0x9c0   : > { %4018 = vperm.xlu1 %5828, %v5931_v49  }
 0x9c4   : > { %4023 = vperm.xlu1 %5828, %v5933_v34  }
 0x9c8   : > { %4033 = vperm.xlu1 %5828, %v5935_v18  }
 0x9cc   : > { %4038 = vperm.xlu1 %5828, %v5937_v33  }
 0x9d0   : > { %4043 = vperm.xlu1 %5828, %v5939_v51  }
 0x9d4   : > { %4048 = vperm.xlu1 %5828, %v5941_v28  }
 0x9d8   : > { %4053 = vperm.xlu1 %5828, %v5943_v60  }
 0x9dc   : > { %4058 = vperm.xlu1 %5828, %v5945_v24  }
 0x9e0   : > { %4063 = vperm.xlu1 %5828, %v5947_v1  }
 0xa22   : > { %v7344_v35 = vpop.permute.xlu0 %4028 }
 0xa23   : > { %v7298_v14 = vpop.permute.xlu1 %3988 }
 0xa24   : > { %7518 = vst [vmem:[#allocation5_spill] sm:$0xff] %v7298_v14  ;;  %v4066_v46 = vmul.f32 %v7298_v14, %v7212_v11 }
 0xa26   : > { %4850 = vmatmul.mubr.msk.f32.vlgmr.msra.gmra.mxu1 %vm502_vm0, %v4066_v46  ;;  %v423_v46 = vld [vmem:[#allocation2 + $0x3e8] sm:$0xff] }
 0xa27   : > { %v7303_v10 = vpop.permute.xlu1 %3993  ;;  %4200 = vmatprep.mubr.f32.mxu1 %v7484_v31 }
 0xa28   : > { %7519 = vst [vmem:[#allocation6_spill] sm:$0xff] %v7303_v10  ;;  %v4067_v12 = vmul.f32 %v7303_v10, %v7214_v21  ;;  %v413_v10 = vld [vmem:[#allocation2 + $0x398] sm:$0xff] }
 0xa2a   : > { %4851 = vmatmul.mubr.msk.f32.gmra.mxu1 %vm502_vm0, %v4067_v12  ;;  %v422_v12 = vld [vmem:[#allocation2 + $0x3e0] sm:$0xff] }
 0xa2b   : > { %v7309_v3 = vpop.permute.xlu1 %3998  ;;  %4206 = vmatprep.mubr.f32.mxu1 %v7484_v31 }
 0xa2c   : > { %7520 = vst [vmem:[#allocation7_spill] sm:$0xff] %v7309_v3  ;;  %v4068_v59 = vmul.f32 %v7309_v3, %v7210_v27 }
 0xa2e   : > { %4852 = vmatmul.mubr.msk.f32.gmra.mxu1 %vm502_vm0, %v4068_v59  ;;  %v421_v59 = vld [vmem:[#allocation2 + $0x3d8] sm:$0xff] }
 0xa2f   : > { %v7315_v11 = vpop.permute.xlu1 %4003  ;;  %4212 = vmatprep.mubr.f32.mxu1 %v7484_v31 }
 0xa30   : > { %v4069_v29 = vmul.f32 %v7315_v11, %v7200_v63 }
 0xa32   : > { %4853 = vmatmul.mubr.msk.f32.gmra.mxu1 %vm502_vm0, %v4069_v29 }
 0xa33   : > { %v7321_v21 = vpop.permute.xlu1 %4008  ;;  %4218 = vmatprep.mubr.f32.mxu1 %v7484_v31 }
 0xa34   : > { %v4070_v16 = vmul.f32 %v7321_v21, %v7204_v26 }
 0xa36   : > { %4854 = vmatmul.mubr.msk.f32.gmra.mxu1 %vm502_vm0, %v4070_v16  ;;  %v420_v16 = vld [vmem:[#allocation2 + $0x3d0] sm:$0xff] }
 0xa37   : > { %v7327_v27 = vpop.permute.xlu1 %4013  ;;  %4224 = vmatprep.mubr.f32.mxu1 %v7484_v31 }
 0xa38   : > { %v4071_v57 = vmul.f32 %v7327_v27, %v7206_v20 }
 0xa3a   : > { %4855 = vmatmul.mubr.msk.f32.gmra.mxu1 %vm502_vm0, %v4071_v57 }
 0xa3b   : > { %v7333_v63 = vpop.permute.xlu1 %4018  ;;  %4230 = vmatprep.mubr.f32.mxu1 %v7484_v31 }
 0xa3c   : > { %v4072_v4 = vmul.f32 %v7333_v63, %v7202_v50  ;;  %v4074_v50 = vmul.f32 %v7344_v35, %v7220_v47 }
 0xa3e   : > { %4856 = vmatmul.mubr.msk.f32.gmra.mxu1 %vm502_vm0, %v4072_v4  ;;  %v419_v4 = vld [vmem:[#allocation2 + $0x3c8] sm:$0xff] }
 0xa3f   : > { %v7339_v26 = vpop.permute.xlu1 %4023  ;;  %4236 = vmatprep.mubr.f32.mxu1 %v7484_v31 }
 0xa40   : > { %v4073_v56 = vmul.f32 %v7339_v26, %v7198_v6 }
 0xa42   : > { %4857 = vmatmul.mubr.msk.f32.gmra.mxu1 %vm502_vm0, %v4073_v56 }
 0xa43   : > { %v7347_v20 = vpop.permute.xlu1 %4033  ;;  %4242 = vmatprep.mubr.f32.mxu1 %v7484_v31 }
 0xa44   : > { %v4075_v6 = vmul.f32 %v7347_v20, %v7222_v61 }
 0xa46   : > { %4858 = vmatmul.mubr.msk.f32.gmra.mxu1 %vm502_vm0, %v4074_v50  ;;  %v418_v50 = vld [vmem:[#allocation2 + $0x3c0] sm:$0xff] }
 0xa47   : > { %v7353_v54 = vpop.permute.xlu1 %4038  ;;  %4248 = vmatprep.mubr.f32.mxu1 %v7484_v31 }
 0xa48   : > { %v4076_v15 = vmul.f32 %v7353_v54, %v7218_v58 }
 0xa4a   : > { %4859 = vmatmul.mubr.msk.f32.gmra.mxu1 %vm502_vm0, %v4075_v6 }
 0xa4b   : > { %v7359_v13 = vpop.permute.xlu1 %4043  ;;  %4254 = vmatprep.mubr.f32.mxu1 %v7484_v31 }
 0xa4c   : > { %v4077_v23 = vmul.f32 %v7359_v13, %v7208_v53 }
 0xa4e   : > { %4860 = vmatmul.mubr.msk.f32.gmra.mxu1 %vm502_vm0, %v4076_v15  ;;  %v417_v15 = vld [vmem:[#allocation2 + $0x3b8] sm:$0xff] }
 0xa4f   : > { %v7365_v47 = vpop.permute.xlu1 %4048  ;;  %4260 = vmatprep.mubr.f32.mxu1 %v7484_v31 }
 0xa50   : > { %v4078_v41 = vmul.f32 %v7365_v47, %v7236_v2 }
 0xa52   : > { %4861 = vmatmul.mubr.msk.f32.gmra.mxu1 %vm502_vm0, %v4077_v23 }
 0xa53   : > { %v7371_v61 = vpop.permute.xlu1 %4053  ;;  %4266 = vmatprep.mubr.f32.mxu1 %v7484_v31 }
 0xa54   : > { %v4079_v9 = vmul.f32 %v7371_v61, %v7258_v17 }
 0xa56   : > { %4862 = vmatmul.mubr.msk.f32.gmra.mxu1 %vm502_vm0, %v4078_v41  ;;  %v416_v41 = vld [vmem:[#allocation2 + $0x3b0] sm:$0xff] }
 0xa57   : > { %v7377_v58 = vpop.permute.xlu1 %4058  ;;  %4272 = vmatprep.mubr.f32.mxu1 %v7484_v31 }
 0xa58   : > { %v4080_v53 = vmul.f32 %v7377_v58, %v7234_v8 }
 0xa5a   : > { %4863 = vmatmul.mubr.msk.f32.gmra.mxu1 %vm502_vm0, %v4079_v9 }
 0xa5b   : > { %4278 = vmatprep.mubr.f32.mxu1 %v7484_v31  ;;  %v7386_v37 = vpop.permute.xlu1 %4063 }
 0xa5c   : > { %v4081_v2 = vmul.f32 %v7386_v37, %v7250_v45 }
 0xa5e   : > { %4864 = vmatmul.mubr.msk.f32.gmra.mxu1 %vm502_vm0, %v4080_v53  ;;  %v415_v53 = vld [vmem:[#allocation2 + $0x3a8] sm:$0xff] }
 0xa5f   : > { %4284 = vmatprep.mubr.f32.mxu1 %v7484_v31  ;;  %v414_v31 = vld [vmem:[#allocation2 + $0x3a0] sm:$0xff] }
 0xa62   : > { %4865 = vmatmul.mubr.msk.f32.gmra.mxu1 %vm502_vm0, %v4081_v2  ;;  %vm4493_vm0 = vcmask 64512  }
 0xae6   : > { %v7393_v52 = vpop.f32.mrf.mxu1 }
 0xae8   : > { %v7395_v17 = vpop.f32.mrf.mxu1 }
 0xaea   : > { %v7397_v62 = vpop.f32.mrf.mxu1 }
 0xaec   : > { %v7399_v43 = vpop.f32.mrf.mxu1 }
 0xaee   : > { %v7401_v8 = vpop.f32.mrf.mxu1 }
 0xaf0   : > { %v7403_v19 = vpop.f32.mrf.mxu1 }
 0xaf2   : > { %v7405_v42 = vpop.f32.mrf.mxu1 }
 0xaf4   : > { %v7407_v0 = vpop.f32.mrf.mxu1 }
 0xaf6   : > { %v7409_v36 = vpop.f32.mrf.mxu1 }
 0xaf8   : > { %v7411_v45 = vpop.f32.mrf.mxu1 }
 0xafa   : > { %v7413_v44 = vpop.f32.mrf.mxu1 }
 0xafc   : > { %v7415_v5 = vpop.f32.mrf.mxu1 }
 0xafe   : > { %v7417_v39 = vpop.f32.mrf.mxu1 }
 0xb00   : > { %v7419_v38 = vpop.f32.mrf.mxu1 }
 0xb02   : > { %v7421_v7 = vpop.f32.mrf.mxu1 }
 0xb04   : > { %v7423_v49 = vpop.f32.mrf.mxu1 }
 0xb06   : > { %v7425_v32 = vpop.f32.mrf.mxu1 }
 0xb08   : > { %v4246_v25 = vpop.f32.mrf.mxu1 }
 0xb0a   : > { %v4250_v34 = vpop.f32.mrf.mxu1 }
 0xb0c   : > { %v4252_v40 = vpop.f32.mrf.mxu1 }
 0xb0e   : > { %v4256_v55 = vpop.f32.mrf.mxu1 }
 0xb10   : > { %v4258_v18 = vpop.f32.mrf.mxu1 }
 0xb12   : > { %v4262_v30 = vpop.f32.mrf.mxu1 }
 0xb14   : > { %v4264_v48 = vpop.f32.mrf.mxu1 }
 0xb16   : > { %v4268_v33 = vpop.f32.mrf.mxu1 }
 0xb17   : > { %v4315_v3 = vmul.f32 %v4268_v33, %v416_v41  ;;  %v406_v33 = vld [vmem:[#allocation2 + $0x360] sm:$0xff]  ;;  %v393_v41 = vld [vmem:[#allocation2 + $0x2f8] sm:$0xff] }
 0xb18   : > { %v4270_v22 = vpop.f32.mrf.mxu1 }
 0xb19   : > { %v4316_v14 = vmul.f32 %v4270_v22, %v417_v15  ;;  %v407_v22 = vld [vmem:[#allocation2 + $0x368] sm:$0xff]  ;;  %v396_v15 = vld [vmem:[#allocation2 + $0x310] sm:$0xff] }
 0xb1a   : > { %v4274_v51 = vpop.f32.mrf.mxu1 }
 0xb1b   : > { %v4317_v2 = vmul.f32 %v4274_v51, %v418_v50  ;;  %v408_v51 = vld [vmem:[#allocation2 + $0x370] sm:$0xff]  ;;  %v398_v50 = vld [vmem:[#allocation2 + $0x320] sm:$0xff] }
 0xb1c   : > { %v4276_v28 = vpop.f32.mrf.mxu1 }
 0xb1d   : > { %v4318_v9 = vmul.f32 %v4276_v28, %v419_v4  ;;  %v409_v28 = vld [vmem:[#allocation2 + $0x378] sm:$0xff] }
 0xb1e   : > { %v4280_v60 = vpop.f32.mrf.mxu1  ;;  %v4308_v4 = vmul.f32 %v4246_v25, %v409_v28  ;;  %v434_v28 = vld [vmem:[#allocation2 + $0x490] sm:$0xff] }
 0xb1f   : > { %v4319_v23 = vmul.f32 %v4280_v60, %v420_v16  ;;  %v410_v60 = vld [vmem:[#allocation2 + $0x380] sm:$0xff] }
 0xb20   : > { %v4282_v24 = vpop.f32.mrf.mxu1 }
 0xb21   : > { %v4320_v6 = vmul.f32 %v4282_v24, %v421_v59  ;;  %v411_v24 = vld [vmem:[#allocation2 + $0x388] sm:$0xff]  ;;  %v4312_v59 = vmul.f32 %v4258_v18, %v413_v10  ;;  %v4306_v10 = vmul.f32 %v7423_v49, %v407_v22  ;;  %v401_v18 = vld [vmem:[#allocation2 + $0x338] sm:$0xff]  ;;  %v431_v22 = vld [vmem:[#allocation2 + $0x460] sm:$0xff] }
 0xb22   : > { %v4286_v1 = vpop.f32.mrf.mxu1  ;;  %v4310_v16 = vmul.f32 %v4252_v40, %v411_v24  ;;  %v402_v40 = vld [vmem:[#allocation2 + $0x340] sm:$0xff] }
 0xb23   : > { %v4321_v56 = vmul.f32 %v4286_v1, %v422_v12  ;;  %v4314_v1 = vmul.f32 %v4264_v48, %v415_v53  ;;  %v4313_v12 = vmul.f32 %v4262_v30, %v414_v31  ;;  %v405_v48 = vld [vmem:[#allocation2 + $0x358] sm:$0xff]  ;;  %v404_v31 = vld [vmem:[#allocation2 + $0x350] sm:$0xff]  ;;  %v4301_v49 = vmul.f32 %v7413_v44, %v402_v40  ;;  %v7524_v40 = vld [vmem:[#allocation5_spill] sm:$0xff] }
 0xb24   : > { %v4288_v29 = vpop.f32.mrf.mxu1  ;;  %v4303_v25 = vmul.f32 %v7417_v39, %v404_v31  ;;  %v400_v30 = vld [vmem:[#allocation2 + $0x330] sm:$0xff]  ;;  %v4297_v44 = vmul.f32 %v7405_v42, %v398_v50  ;;  %v4292_v42 = vmul.f32 %v7395_v17, %v393_v41  ;;  %v7521_v17 = vmov 0.0   ;;  %v425_v31 = vld [vmem:[#allocation2 + $0x400] sm:$0xff] }
 0xb25   : > { %v4322_v57 = vmul.f32 %v4288_v29, %v423_v46  ;;  %v412_v46 = vld [vmem:[#allocation2 + $0x390] sm:$0xff] }
 0xb26   : > { %v4311_v29 = vmul.f32 %v4256_v55, %v412_v46  ;;  %v4305_v55 = vmul.f32 %v7421_v7, %v406_v33  ;;  %v4300_v7 = vmul.f32 %v7411_v45, %v401_v18  ;;  %v429_v33 = vld [vmem:[#allocation2 + $0x440] sm:$0xff] }
 0xb27   : > { %4323 = vmatprep.subr.mxu0 %v4322_v57  ;;  %v4309_v57 = vmul.f32 %v4250_v34, %v410_v60  ;;  %v4304_v34 = vmul.f32 %v7419_v38, %v405_v48  ;;  %v4299_v38 = vmul.f32 %v7409_v36, %v400_v30  ;;  %v4295_v36 = vmul.f32 %v7401_v8, %v396_v15  ;;  %v436_v60 = vld [vmem:[#allocation2 + $0x4b0] sm:$0xff]  ;;  %v427_v48 = vld [vmem:[#allocation2 + $0x420] sm:$0xff] }
 0xb28   : > { %4324 = vmatpush1.msra.mxu0 %v4321_v56  ;;  %v399_v56 = vld [vmem:[#allocation2 + $0x328] sm:$0xff] }
 0xb29   : > { %4325 = vmatprep.subr.mxu0 %v4320_v6  ;;  %v397_v6 = vld [vmem:[#allocation2 + $0x318] sm:$0xff]  ;;  %v4298_v39 = vmul.f32 %v7407_v0, %v399_v56  ;;  %v392_v0 = vld [vmem:[#allocation2 + $0x2f0] sm:$0xff] }
 0xb2a   : > { %4326 = vmatpush1.msra.mxu0 %v4319_v23  ;;  %v394_v23 = vld [vmem:[#allocation2 + $0x300] sm:$0xff]  ;;  %v4296_v45 = vmul.f32 %v7403_v19, %v397_v6  ;;  %v4291_v24 = vmul.f32 %v7393_v52, %v392_v0 }
 0xb2b   : > { %4327 = vmatprep.subr.mxu0 %v4318_v9  ;;  %v7444_v9 = vld [vmem:[%s274_s27] sm:$0xff]   ;;  %v4293_v46 = vmul.f32 %v7397_v62, %v394_v23 }
 0xb2c   : > { %4328 = vmatpush1.msra.mxu0 %v4317_v2  ;;  %v439_v2 = vld [vmem:[#allocation2 + $0x4e0] sm:$0xff]  ;;  %v4876_v19 = vunpack.c.l.bf16 %v7444_v9  ;;  %v4877_v62 = vunpack.c.h.bf16 %v7444_v9 }
 0xb2d   : > { %4329 = vmatprep.subr.mxu0 %v4316_v14  ;;  %v4307_v14 = vmul.f32 %v7425_v32, %v408_v51  ;;  %v4415_v8 = vmul.f32 %v7386_v37, %v439_v2  ;;  %v435_v52 = vld [vmem:[#allocation2 + $0x4a0] sm:$0xff]  ;;  %v4412_v37 = vmul.f32 %v7365_v47, %v436_v60  ;;  %v4410_v51 = vmul.f32 %v7353_v54, %v434_v28 }
 0xb2e   : > { %4330 = vmatpush1.msra.mxu0 %v4315_v3  ;;  %v403_v3 = vld [vmem:[#allocation2 + $0x348] sm:$0xff] }
 0xb2f   : > { %4331 = vmatprep.subr.mxu0 %v4314_v1  ;;  %v4302_v32 = vmul.f32 %v7415_v5, %v403_v3  ;;  %v395_v5 = vld [vmem:[#allocation2 + $0x308] sm:$0xff]  ;;  %v438_v1 = vld [vmem:[#allocation2 + $0x4d0] sm:$0xff] }
 0xb30   : > { %4332 = vmatpush1.msra.mxu0 %v4313_v12  ;;  %v4294_v53 = vmul.f32 %v7399_v43, %v395_v5  ;;  %v437_v12 = vld [vmem:[#allocation2 + $0x4c0] sm:$0xff]  ;;  %v4414_v43 = vmul.f32 %v7377_v58, %v438_v1  ;;  %v4411_v58 = vmul.f32 %v7359_v13, %v435_v52  ;;  %v4407_v13 = vmul.f32 %v7339_v26, %v431_v22  ;;  %v424_v3 = vld [vmem:[#allocation2 + $0x3f0] sm:$0xff] }
 0xb31   : > { %4333 = vmatprep.subr.mxu0 %v4312_v59  ;;  %v4413_v59 = vmul.f32 %v7371_v61, %v437_v12  ;;  %v4403_v26 = vmul.f32 %v7315_v11, %v427_v48  ;;  %v441_v11 = vld [vmem:[#allocation2 + $0x4f8] sm:$0xff] }
 0xb32   : > { %4334 = vmatpush1.msra.mxu0 %v4311_v29  ;;  %v433_v29 = vld [vmem:[#allocation2 + $0x480] sm:$0xff] }
 0xb33   : > { %4335 = vmatprep.subr.mxu0 %v4310_v16  ;;  %v432_v16 = vld [vmem:[#allocation2 + $0x470] sm:$0xff]  ;;  %v4409_v61 = vmul.f32 %v7347_v20, %v433_v29  ;;  %v4405_v20 = vmul.f32 %v7327_v27, %v429_v33 }
 0xb34   : > { %4336 = vmatpush1.msra.mxu0 %v4309_v57  ;;  %v4408_v47 = vmul.f32 %v7344_v35, %v432_v16  ;;  %v430_v57 = vld [vmem:[#allocation2 + $0x450] sm:$0xff] }
 0xb35   : > { %4337 = vmatprep.subr.mxu0 %v4308_v4  ;;  %v4406_v54 = vmul.f32 %v7333_v63, %v430_v57  ;;  %v428_v4 = vld [vmem:[#allocation2 + $0x430] sm:$0xff] }
 0xb36   : > { %4338 = vmatpush1.msra.mxu0 %v4307_v14  ;;  %v4404_v35 = vmul.f32 %v7321_v21, %v428_v4  ;;  %v426_v14 = vld [vmem:[#allocation2 + $0x410] sm:$0xff] }
 0xb37   : > { %4339 = vmatprep.subr.mxu0 %v4306_v10  ;;  %v7522_v10 = vld [vmem:[#allocation7_spill] sm:$0xff] }
 0xb38   : > { %4340 = vmatpush1.msra.mxu0 %v4305_v55  ;;  %v4402_v63 = vmul.f32 %v7522_v10, %v426_v14  ;;  %v7523_v55 = vld [vmem:[#allocation6_spill] sm:$0xff]  ;;  %v440_v21 = vld [vmem:[#allocation2 + $0x4f0] sm:$0xff] }
 0xb39   : > { %4341 = vmatprep.subr.mxu0 %v4304_v34  ;;  %v4401_v27 = vmul.f32 %v7523_v55, %v425_v31  ;;  %v4400_v34 = vmul.f32 %v7524_v40, %v424_v3 }
 0xb3a   : > { %4342 = vmatpush1.msra.mxu0 %v4303_v25 }
 0xb3b   : > { %4343 = vmatprep.subr.mxu0 %v4302_v32 }
 0xb3c   : > { %4344 = vmatpush1.msra.mxu0 %v4301_v49 }
 0xb3d   : > { %4345 = vmatprep.subr.mxu0 %v4300_v7 }
 0xb3e   : > { %4346 = vmatpush1.msra.mxu0 %v4299_v38 }
 0xb3f   : > { %4347 = vmatprep.subr.mxu0 %v4298_v39 }
 0xb40   : > { %4348 = vmatpush1.msra.mxu0 %v4297_v44 }
 0xb41   : > { %4349 = vmatprep.subr.mxu0 %v4296_v45 }
 0xb42   : > { %4350 = vmatpush1.msra.mxu0 %v4295_v36 }
 0xb43   : > { %4351 = vmatprep.subr.mxu0 %v4294_v53 }
 0xb44   : > { %4352 = vmatpush1.msra.mxu0 %v4293_v46 }
 0xb45   : > { %4353 = vmatprep.subr.mxu0 %v4292_v42 }
 0xb46   : > { %4354 = vmatpush1.msra.mxu0 %v4291_v24 }
 0xb47   : > { %4388 = vmatmul.mubr.f32.vlgmr.msra.gmra.mxu0 %v4876_v19  ;;  %5761 = vmatprep.subr.mxu0 %v4415_v8 }
 0xb48   : > { %5762 = vmatpush3.msra.mxu0 %v4415_v8  ;;  %4393 = vmatprep.mubr.f32.mxu0 %v7521_v17 }
 0xb49   : > { %5763 = vmatprep.subr.mxu0 %v4414_v43 }
 0xb4a   : > { %5764 = vmatpush3.msra.mxu0 %v4414_v43 }
 0xb4b   : > { %5765 = vmatprep.subr.mxu0 %v4413_v59  ;;  %4394 = vmatmul.mubr.f32.gmra.mxu0 %v4877_v62 }
 0xb4c   : > { %5766 = vmatpush3.msra.mxu0 %v4413_v59  ;;  %5793 = vmatprep.mubr.f32.mxu0 %v4876_v19 }
 0xb4d   : > { %5767 = vmatprep.subr.mxu0 %v4412_v37 }
 0xb4e   : > { %5768 = vmatpush3.msra.mxu0 %v4412_v37 }
 0xb4f   : > { %5769 = vmatprep.subr.mxu0 %v4411_v58 }
 0xb50   : > { %5770 = vmatpush3.msra.mxu0 %v4411_v58 }
 0xb51   : > { %5771 = vmatprep.subr.mxu0 %v4410_v51 }
 0xb52   : > { %5772 = vmatpush3.msra.mxu0 %v4410_v51 }
 0xb53   : > { %5773 = vmatprep.subr.mxu0 %v4409_v61 }
 0xb54   : > { %5774 = vmatpush3.msra.mxu0 %v4409_v61 }
 0xb55   : > { %5775 = vmatprep.subr.mxu0 %v4408_v47 }
 0xb56   : > { %5776 = vmatpush3.msra.mxu0 %v4408_v47 }
 0xb57   : > { %5777 = vmatprep.subr.mxu0 %v4407_v13 }
 0xb58   : > { %5778 = vmatpush3.msra.mxu0 %v4407_v13 }
 0xb59   : > { %5779 = vmatprep.subr.mxu0 %v4406_v54 }
 0xb5a   : > { %5780 = vmatpush3.msra.mxu0 %v4406_v54 }
 0xb5b   : > { %5781 = vmatprep.subr.mxu0 %v4405_v20 }
 0xb5c   : > { %5782 = vmatpush3.msra.mxu0 %v4405_v20 }
 0xb5d   : > { %5783 = vmatprep.subr.mxu0 %v4404_v35 }
 0xb5e   : > { %5784 = vmatpush3.msra.mxu0 %v4404_v35 }
 0xb5f   : > { %5785 = vmatprep.subr.mxu0 %v4403_v26 }
 0xb60   : > { %5786 = vmatpush3.msra.mxu0 %v4403_v26 }
 0xb61   : > { %5787 = vmatprep.subr.mxu0 %v4402_v63 }
 0xb62   : > { %5788 = vmatpush3.msra.mxu0 %v4402_v63 }
 0xb63   : > { %5789 = vmatprep.subr.mxu0 %v4401_v27 }
 0xb64   : > { %5790 = vmatpush3.msra.mxu0 %v4401_v27 }
 0xb65   : > { %5791 = vmatprep.subr.mxu0 %v4400_v34 }
 0xb66   : > { %5792 = vmatpush3.msra.mxu0 %v4400_v34 }
 0xb67   : > { %5794 = vmatmul.mubr.f32.vlgmr.msra.gmra.mxu0 %v4877_v62  ;;  %4530 = vmatprep.subr.mxu0 %v441_v11 }
 0xb68   : > { %4564 = vmatprep.mubr.f32.mxu0 %v7521_v17  ;;  %4531 = vmatpush1.msra.mxu0 %v440_v21 }
 0xc07   : > { %v4389_v18 = vpop.f32.mrf.mxu0 }
 0xc09   : > { %v4391_v25 = vpop.f32.mrf.mxu0 }
 0xc0b   : > { %v4395_v30 = vpop.f32.mrf.mxu0 }
 0xc0d   : > { %v4397_v32 = vpop.f32.mrf.mxu0 }
 0xc27   : > { %v5795_v56 = vpop.f32.mrf.mxu0 }
 0xc29   : > { %v4482_v49 = vpop.f32.mrf.mxu0 }
 0xc2a   : > { %5948 = vrcp.f32 %v4482_v49 }
 0xc2b   : > { %5950 = vrcp.f32 %v5795_v56 }
 0xc37   : > { %v5949_v50 = vpop.eup %5948 }
 0xc38   : > { %4866 = vmatmul.mubr.msk.f32.vlgmr.msra.gmra.mxu0 %vm4493_vm0, %v5949_v50  ;;  %v5951_v7 = vpop.eup %5950 }
 0xc39   : > { %4570 = vmatprep.mubr.f32.mxu0 %v7521_v17 }
 0xc3c   : > { %4867 = vmatmul.mubr.msk.f32.gmra.mxu0 %vm4493_vm0, %v5951_v7 }
 0xcf8   : > { %v4566_v6 = vpop.f32.mrf.mxu0 }
 0xcf9   : > { %v4577_v38 = vmul.f32 %v4566_v6, %v4389_v18 }
 0xcfa   : > { %v4568_v15 = vpop.f32.mrf.mxu0 }
 0xcfb   : > { %4581 = vst [vmem:[%s279_s6] sm:$0xff] %v4577_v38  ;;  %v4578_v39 = vmul.f32 %v4568_v15, %v4391_v25 }
 0xcfc   : > { %v4572_v5 = vpop.f32.mrf.mxu0 }
 0xcfd   : > { %4582 = vst [vmem:[%s279_s6 + $0x8] sm:$0xff] %v4578_v39  ;;  %v4579_v44 = vmul.f32 %v4572_v5, %v4395_v30 }
 0xcfe   : > { %v4574_v23 = vpop.f32.mrf.mxu0 }
 0xcff   : > { %4583 = vst [vmem:[%s279_s6 + $0x10] sm:$0xff] %v4579_v44  ;;  %v4580_v45 = vmul.f32 %v4574_v23, %v4397_v32 }
 0xd01   : > { %4584 = vst [vmem:[%s279_s6 + $0x18] sm:$0xff] %v4580_v45 }
 0xd02 PF: > { %s16_s18 = sadd.s32 1, %s6004_s18  }
 0xd03   : > { %p13_p1 = scmp.ge.s32.totalorder %s16_s18, 4  }
 0xd05   :  { %15 = sbr.rel (!%p13_p1) target bundleno = 1 (0x1), region = 81 }
 0xd0a   :  { %4606 = vsyncpa [#allocation3], 1 }
 0xd0b   :  { %4608 = vsyncpa [#allocation3 + $0x1], 1 }

</bundles_post_ra>
